<compile_context>
chip_gen: v5e
topology: v5e:2x2
jax: 0.10.0
libtpu: 0.0.40
codegen_flags: <defaults>
</compile_context>

<pallas_src>
import numpy as np
import jax
import jax.numpy as jnp
from jax.experimental import pallas as pl
from jax.experimental.pallas import tpu as pltpu

LANES = 128
IN_FEATURES = 256  # fixed by DetectionHead(256, ...)


# ----------------------------------------------------------------------------
# Anchor generation (host-side, deterministic; mirrors AnchorGenerator)
# ----------------------------------------------------------------------------
def generate_anchors(anchor_sizes=(512,), aspect_ratios=(0.5, 1),
                     scales=(1, 1.5, 2), center=((512, 512),), img_size=1024):
    anchors = []
    for size in anchor_sizes:
        for scale in scales:
            scaled = size * scale
            for ratio in aspect_ratios:
                w = scaled * np.sqrt(ratio)
                h = scaled / np.sqrt(ratio)
                for c in center:
                    x_min = max(0, c[0] - w / 2)
                    y_min = max(0, c[1] - h / 2)
                    x_max = min(img_size, c[0] + w / 2)
                    y_max = min(img_size, c[1] + h / 2)
                    anchors.append([x_min, y_min, x_max, y_max])
    return np.asarray(anchors, dtype=np.float32)


# ----------------------------------------------------------------------------
# Host-side packing.
#   1. Pack the three head Linears into one lane-dense (256, 256) weight:
#        lanes [  0, 24): "pos" deltas (dx/dy duplicated per output coordinate)
#        lanes [ 24, 42): class logits
#        lanes [ 42, 48): confidence logits
#        lanes [128,152): "size" deltas (dw/dh duplicated per output coordinate)
#   2. Fold the linear encoder through it:  w_comb = We @ Wpacked  (C_in, 256),
#        b_comb = be @ Wpacked + bpacked                           (1,   256).
#   3. Per-lane anchor constants so delta->box is lane-aligned elementwise:
#        row0 = w/h, row1 = cx/cy, row2 = +-0.5*w/h,
#        row3 = confidence-lane mask, row4 = box-lane mask.
# ----------------------------------------------------------------------------
def pack_model(params, anchors_np):
    NC = params["num_classes"]
    NB = anchors_np.shape[0]
    D = IN_FEATURES
    n_box = 4 * NB
    cls_off = n_box                    # 24
    conf_off = cls_off + NC * NB       # 42
    assert conf_off + NB <= LANES, "packed head outputs must fit in 128 lanes"

    w_enc = np.asarray(params["w_enc"], np.float64)
    b_enc = np.asarray(params["b_enc"], np.float64)
    w_cls = np.asarray(params["w_cls"]); b_cls = np.asarray(params["b_cls"])
    w_box = np.asarray(params["w_box"]); b_box = np.asarray(params["b_box"])
    w_conf = np.asarray(params["w_conf"]); b_conf = np.asarray(params["b_conf"])

    w_all = np.zeros((D, 2 * LANES), np.float64)
    b_all = np.zeros((1, 2 * LANES), np.float64)

    # Box-delta columns, duplicated so every output box lane 4a+r has its needed
    # position delta (dx/dy) in the low 128 lanes and size delta (dw/dh) in the
    # high 128 lanes at the SAME lane index.
    for a in range(NB):
        for r in range(4):
            pos_src = 4 * a + (0 if r in (0, 2) else 1)    # dx or dy
            size_src = 4 * a + (2 if r in (0, 2) else 3)   # dw or dh
            w_all[:, 4 * a + r] = w_box[:, pos_src]
            b_all[0, 4 * a + r] = b_box[0, pos_src]
            w_all[:, LANES + 4 * a + r] = w_box[:, size_src]
            b_all[0, LANES + 4 * a + r] = b_box[0, size_src]

    w_all[:, cls_off:cls_off + NC * NB] = w_cls
    b_all[0, cls_off:cls_off + NC * NB] = b_cls[0]
    w_all[:, conf_off:conf_off + NB] = w_conf
    b_all[0, conf_off:conf_off + NB] = b_conf[0]

    # Fold the (linear, pointwise) encoder into the packed head weights.
    w_comb = (w_enc @ w_all).astype(np.float32)                    # (C_in, 256)
    b_comb = (b_enc @ w_all + b_all).astype(np.float32)            # (1,    256)

    # Per-lane anchor constants (one vreg: 8 x 128). Zero outside their lanes.
    const = np.zeros((8, LANES), np.float32)
    aw = anchors_np[:, 2] - anchors_np[:, 0]
    ah = anchors_np[:, 3] - anchors_np[:, 1]
    acx = anchors_np[:, 0] + 0.5 * aw
    acy = anchors_np[:, 1] + 0.5 * ah
    for a in range(NB):
        const[0, 4 * a:4 * a + 4] = [aw[a], ah[a], aw[a], ah[a]]
        const[1, 4 * a:4 * a + 4] = [acx[a], acy[a], acx[a], acy[a]]
        const[2, 4 * a:4 * a + 4] = [-0.5 * aw[a], -0.5 * ah[a],
                                     0.5 * aw[a], 0.5 * ah[a]]
    const[3, conf_off:conf_off + NB] = 1.0     # confidence-lane mask
    const[4, :n_box] = 1.0                     # box-lane mask

    return {
        "w_comb": jnp.asarray(w_comb),
        "b_comb": jnp.asarray(b_comb),
        "const": jnp.asarray(const),
        "cls_off": cls_off,
        "conf_off": conf_off,
        "num_anchors": NB,
    }


# ----------------------------------------------------------------------------
# Fused kernel: mean-pool over HW + folded encoder/head contraction (K = C_in,
# VPU broadcast-mul-add) + sigmoid on conf lanes + anchor-delta box math,
# written as ONE lane-dense (B_tile, 128) store.
# ----------------------------------------------------------------------------
def fused_detection_kernel(x_ref, w_ref, b_ref, const_ref, out_ref):
    # x_ref: (BT, C, HW) -- HW on the lane axis (pure reshape of native NCHW).
    # Mean is folded BEFORE the matmul (exact for the linear/pointwise encoder).
    C = x_ref.shape[1]
    mean_x = jnp.mean(x_ref[...], axis=2)                 # (BT, C)  lane reduce
    w = w_ref[...]                                         # (C, 256)
    # K = C (=4) contraction: too small for the MXU -> unrolled broadcast-mul-add.
    out = b_ref[...] + mean_x[:, 0:1] * w[0:1, :]          # (BT, 256)
    for c in range(1, C):
        out = out + mean_x[:, c:c + 1] * w[c:c + 1, :]

    lo = out[:, :LANES]     # [pos deltas | cls | conf | 0]   vreg-aligned slice
    hi = out[:, LANES:]     # [size deltas | 0]

    wvec = const_ref[0:1, :]     # anchor w/h per lane (0 outside box lanes)
    cvec = const_ref[1:2, :]     # anchor cx/cy per lane
    swv = const_ref[2:3, :]      # +-0.5 * w/h per lane
    cmask = const_ref[3:4, :]    # 1.0 on confidence lanes
    bmask = const_ref[4:5, :]    # 1.0 on box lanes

    # Mask size deltas to the box lanes before exp (robust against any padding).
    safe_hi = jnp.where(bmask > 0, hi, jnp.zeros_like(hi))
    # adjusted box = pos_delta*w + c +- 0.5*exp(size_delta)*w, lane-aligned.
    box = lo * wvec + cvec + swv * jnp.exp(safe_hi)
    # sigmoid only on confidence lanes; class logits pass through raw.
    head = jnp.where(cmask > 0, jax.nn.sigmoid(lo), lo)

    out_ref[...] = jnp.where(bmask > 0, box, head)         # one lane-dense store


# ----------------------------------------------------------------------------
# Full DetectionModel forward
# ----------------------------------------------------------------------------
def detection_model_forward(images_nchw, packed, num_classes):
    B, C, H, W = images_nchw.shape
    HW = H * W
    NB = packed["num_anchors"]
    cls_off = packed["cls_off"]
    conf_off = packed["conf_off"]

    # Native NCHW layout, just flatten spatial: (B, C, HW) -> HW on lanes.
    x = images_nchw.reshape(B, C, HW)

    # Batch stacked on the M axis; only tile it for very large B (MXU/VMEM size).
    BT = min(B, 256)
    grid = (pl.cdiv(B, BT),)

    out = pl.pallas_call(
        fused_detection_kernel,
        out_shape=jax.ShapeDtypeStruct((B, LANES), jnp.float32),
        grid=grid,
        in_specs=[
            pl.BlockSpec((BT, C, HW), lambda i: (i, 0, 0)),
            pl.BlockSpec((C, 2 * LANES), lambda i: (0, 0)),
            pl.BlockSpec((1, 2 * LANES), lambda i: (0, 0)),
            pl.BlockSpec((8, LANES), lambda i: (0, 0)),
        ],
        out_specs=pl.BlockSpec((BT, LANES), lambda i: (i, 0)),
        compiler_params=pltpu.CompilerParams(
            dimension_semantics=("parallel",)),   # megacore batch-tile sharding (v7x)
    )(x, packed["w_comb"], packed["b_comb"], packed["const"])

    adjusted_boxes = out[:, :4 * NB].reshape(B, NB, 4)
    class_logits = out[:, cls_off:cls_off + num_classes * NB].reshape(B, NB, num_classes)
    conf_scores = out[:, conf_off:conf_off + NB]
    return class_logits, adjusted_boxes, conf_scores


# ----------------------------------------------------------------------------
# Pure-JAX reference (mirrors the PyTorch module, unfused)
# ----------------------------------------------------------------------------
def reference_forward(images_nchw, params, anchors):
    B, C, H, W = images_nchw.shape
    NC = params["num_classes"]
    NB = anchors.shape[0]
    x = jnp.transpose(images_nchw, (0, 2, 3, 1)).reshape(B, H * W, C)
    emb = x @ params["w_enc"] + params["b_enc"]          # synthetic encoder
    feat = jnp.mean(emb, axis=1)                          # mean over H*W
    cls = (feat @ params["w_cls"] + params["b_cls"]).reshape(B, NB, NC)
    box = (feat @ params["w_box"] + params["b_box"]).reshape(B * NB, 4)
    conf = jax.nn.sigmoid(feat @ params["w_conf"] + params["b_conf"])
    a = jnp.tile(anchors, (B, 1))
    w = a[:, 2] - a[:, 0]
    h = a[:, 3] - a[:, 1]
    cx = a[:, 0] + 0.5 * w
    cy = a[:, 1] + 0.5 * h
    pcx = box[:, 0] * w + cx
    pcy = box[:, 1] * h + cy
    pw = jnp.exp(box[:, 2]) * w
    ph = jnp.exp(box[:, 3]) * h
    boxes = jnp.stack(
        [pcx - 0.5 * pw, pcy - 0.5 * ph, pcx + 0.5 * pw, pcy + 0.5 * ph], axis=1)
    return cls, boxes.reshape(B, NB, 4), conf


if __name__ == "__main__":
    B, C_in, H, W = 2, 4, 16, 16
    NUM_CLASSES = 3

    anchors_np = generate_anchors()          # (6, 4)
    NB = anchors_np.shape[0]                 # num_anchors == num_boxes == 6

    key = jax.random.PRNGKey(0)
    ks = jax.random.split(key, 8)
    params = {
        "num_classes": NUM_CLASSES,
        # synthetic pointwise-conv image encoder: C_in -> 256 channels
        "w_enc": jax.random.normal(ks[0], (C_in, IN_FEATURES), jnp.float32) * 0.05,
        "b_enc": jax.random.normal(ks[1], (1, IN_FEATURES), jnp.float32) * 0.01,
        # DetectionHead linears
        "w_cls": jax.random.normal(ks[2], (IN_FEATURES, NUM_CLASSES * NB), jnp.float32) * 0.05,
        "b_cls": jax.random.normal(ks[3], (1, NUM_CLASSES * NB), jnp.float32) * 0.01,
        "w_box": jax.random.normal(ks[4], (IN_FEATURES, 4 * NB), jnp.float32) * 0.05,
        "b_box": jax.random.normal(ks[5], (1, 4 * NB), jnp.float32) * 0.01,
        "w_conf": jax.random.normal(ks[6], (IN_FEATURES, NB), jnp.float32) * 0.05,
        "b_conf": jax.random.normal(ks[7], (1, NB), jnp.float32) * 0.01,
    }
    packed = pack_model(params, anchors_np)

    images = jax.random.normal(jax.random.PRNGKey(1), (B, C_in, H, W), jnp.float32)

    cls_logits, adj_boxes, conf = detection_model_forward(images, packed, NUM_CLASSES)
    jax.block_until_ready((cls_logits, adj_boxes, conf))

    ref_cls, ref_boxes, ref_conf = reference_forward(images, params,
                                                     jnp.asarray(anchors_np))
    np.testing.assert_allclose(np.asarray(cls_logits), np.asarray(ref_cls),
                               rtol=1e-4, atol=1e-4)
    np.testing.assert_allclose(np.asarray(adj_boxes), np.asarray(ref_boxes),
                               rtol=1e-4, atol=1e-2)
    np.testing.assert_allclose(np.asarray(conf), np.asarray(ref_conf),
                               rtol=1e-4, atol=1e-4)

    assert cls_logits.shape == (B, NB, NUM_CLASSES)
    assert adj_boxes.shape == (B, NB, 4)
    assert conf.shape == (B, NB)
    print("KERNEL_OK")
</pallas_src>

<mosaic_0001>
module attributes {stable_mosaic.version = 11 : i64} {
  func.func @fused_detection_kernel(%arg0: i32, %arg1: memref<2x4x256xf32, #tpu.memory_space<vmem>>, %arg2: memref<4x256xf32, #tpu.memory_space<vmem>>, %arg3: memref<1x256xf32, #tpu.memory_space<vmem>>, %arg4: memref<8x128xf32, #tpu.memory_space<vmem>>, %arg5: memref<2x128xf32, #tpu.memory_space<vmem>>) attributes {dimension_semantics = [#tpu.dimension_semantics<parallel>], iteration_bounds = array<i64: 1>, scalar_prefetch = 0 : i64, scratch_operands = 0 : i64, tpu.core_type = #tpu.core_type<tc>, window_params = [{transform_indices = @transform_0, window_bounds = array<i64: 2, 4, 256>}, {pipeline_mode = #tpu.pipeline_mode<synchronous>, transform_indices = @transform_1, window_bounds = array<i64: 4, 256>}, {pipeline_mode = #tpu.pipeline_mode<synchronous>, transform_indices = @transform_2, window_bounds = array<i64: 1, 256>}, {pipeline_mode = #tpu.pipeline_mode<synchronous>, transform_indices = @transform_3, window_bounds = array<i64: 8, 128>}, {transform_indices = @transform_4, window_bounds = array<i64: 2, 128>}]} {
    %c0 = arith.constant 0 : index
    %c0_0 = arith.constant 0 : index
    %c0_1 = arith.constant 0 : index
    %0 = vector.load %arg1[%c0, %c0_0, %c0_1] : memref<2x4x256xf32, #tpu.memory_space<vmem>>, vector<2x4x256xf32>
    %cst = arith.constant dense<0.000000e+00> : vector<2x4xf32>
    %1 = vector.multi_reduction <add>, %0, %cst [2] : vector<2x4x256xf32> to vector<2x4xf32>
    %cst_2 = arith.constant 2.560000e+02 : f32
    %2 = vector.broadcast %cst_2 : f32 to vector<2x4xf32>
    %3 = arith.divf %1, %2 : vector<2x4xf32>
    %c0_3 = arith.constant 0 : index
    %c0_4 = arith.constant 0 : index
    %4 = vector.load %arg2[%c0_3, %c0_4] : memref<4x256xf32, #tpu.memory_space<vmem>>, vector<4x256xf32>
    %c0_5 = arith.constant 0 : index
    %c0_6 = arith.constant 0 : index
    %5 = vector.load %arg3[%c0_5, %c0_6] : memref<1x256xf32, #tpu.memory_space<vmem>>, vector<1x256xf32>
    %6 = vector.extract_strided_slice %3 {offsets = [0, 0], sizes = [2, 1], strides = [1, 1]} : vector<2x4xf32> to vector<2x1xf32>
    %7 = vector.extract_strided_slice %4 {offsets = [0, 0], sizes = [1, 256], strides = [1, 1]} : vector<4x256xf32> to vector<1x256xf32>
    %8 = vector.broadcast %6 : vector<2x1xf32> to vector<2x256xf32>
    %9 = vector.broadcast %7 : vector<1x256xf32> to vector<2x256xf32>
    %10 = arith.mulf %8, %9 : vector<2x256xf32>
    %11 = vector.broadcast %5 : vector<1x256xf32> to vector<2x256xf32>
    %12 = arith.addf %11, %10 : vector<2x256xf32>
    %13 = vector.extract_strided_slice %3 {offsets = [0, 1], sizes = [2, 1], strides = [1, 1]} : vector<2x4xf32> to vector<2x1xf32>
    %14 = vector.extract_strided_slice %4 {offsets = [1, 0], sizes = [1, 256], strides = [1, 1]} : vector<4x256xf32> to vector<1x256xf32>
    %15 = vector.broadcast %13 : vector<2x1xf32> to vector<2x256xf32>
    %16 = vector.broadcast %14 : vector<1x256xf32> to vector<2x256xf32>
    %17 = arith.mulf %15, %16 : vector<2x256xf32>
    %18 = arith.addf %12, %17 : vector<2x256xf32>
    %19 = vector.extract_strided_slice %3 {offsets = [0, 2], sizes = [2, 1], strides = [1, 1]} : vector<2x4xf32> to vector<2x1xf32>
    %20 = vector.extract_strided_slice %4 {offsets = [2, 0], sizes = [1, 256], strides = [1, 1]} : vector<4x256xf32> to vector<1x256xf32>
    %21 = vector.broadcast %19 : vector<2x1xf32> to vector<2x256xf32>
    %22 = vector.broadcast %20 : vector<1x256xf32> to vector<2x256xf32>
    %23 = arith.mulf %21, %22 : vector<2x256xf32>
    %24 = arith.addf %18, %23 : vector<2x256xf32>
    %25 = vector.extract_strided_slice %3 {offsets = [0, 3], sizes = [2, 1], strides = [1, 1]} : vector<2x4xf32> to vector<2x1xf32>
    %26 = vector.extract_strided_slice %4 {offsets = [3, 0], sizes = [1, 256], strides = [1, 1]} : vector<4x256xf32> to vector<1x256xf32>
    %27 = vector.broadcast %25 : vector<2x1xf32> to vector<2x256xf32>
    %28 = vector.broadcast %26 : vector<1x256xf32> to vector<2x256xf32>
    %29 = arith.mulf %27, %28 : vector<2x256xf32>
    %30 = arith.addf %24, %29 : vector<2x256xf32>
    %31 = vector.extract_strided_slice %30 {offsets = [0, 0], sizes = [2, 128], strides = [1, 1]} : vector<2x256xf32> to vector<2x128xf32>
    %32 = vector.extract_strided_slice %30 {offsets = [0, 128], sizes = [2, 128], strides = [1, 1]} : vector<2x256xf32> to vector<2x128xf32>
    %c0_7 = arith.constant 0 : index
    %c0_8 = arith.constant 0 : index
    %33 = vector.load %arg4[%c0_7, %c0_8] : memref<8x128xf32, #tpu.memory_space<vmem>>, vector<1x128xf32>
    %c1 = arith.constant 1 : index
    %c0_9 = arith.constant 0 : index
    %34 = vector.load %arg4[%c1, %c0_9] : memref<8x128xf32, #tpu.memory_space<vmem>>, vector<1x128xf32>
    %c2 = arith.constant 2 : index
    %c0_10 = arith.constant 0 : index
    %35 = vector.load %arg4[%c2, %c0_10] : memref<8x128xf32, #tpu.memory_space<vmem>>, vector<1x128xf32>
    %c3 = arith.constant 3 : index
    %c0_11 = arith.constant 0 : index
    %36 = vector.load %arg4[%c3, %c0_11] : memref<8x128xf32, #tpu.memory_space<vmem>>, vector<1x128xf32>
    %c4 = arith.constant 4 : index
    %c0_12 = arith.constant 0 : index
    %37 = vector.load %arg4[%c4, %c0_12] : memref<8x128xf32, #tpu.memory_space<vmem>>, vector<1x128xf32>
    %cst_13 = arith.constant 0.000000e+00 : f32
    %38 = vector.broadcast %cst_13 : f32 to vector<1x128xf32>
    %39 = arith.cmpf ogt, %37, %38 : vector<1x128xf32>
    %cst_14 = arith.constant 0.000000e+00 : f32
    %40 = vector.broadcast %cst_14 : f32 to vector<2x128xf32>
    %41 = vector.shape_cast %39 : vector<1x128xi1> to vector<1x128xi1>
    %42 = vector.broadcast %41 : vector<1x128xi1> to vector<2x128xi1>
    %43 = arith.select %42, %32, %40 : vector<2x128xi1>, vector<2x128xf32>
    %44 = vector.broadcast %33 : vector<1x128xf32> to vector<2x128xf32>
    %45 = arith.mulf %31, %44 : vector<2x128xf32>
    %46 = vector.broadcast %34 : vector<1x128xf32> to vector<2x128xf32>
    %47 = arith.addf %45, %46 : vector<2x128xf32>
    %48 = math.exp %43 : vector<2x128xf32>
    %49 = vector.broadcast %35 : vector<1x128xf32> to vector<2x128xf32>
    %50 = arith.mulf %49, %48 : vector<2x128xf32>
    %51 = arith.addf %47, %50 : vector<2x128xf32>
    %cst_15 = arith.constant 0.000000e+00 : f32
    %52 = vector.broadcast %cst_15 : f32 to vector<1x128xf32>
    %53 = arith.cmpf ogt, %36, %52 : vector<1x128xf32>
    %54 = arith.negf %31 : vector<2x128xf32>
    %55 = math.exp %54 : vector<2x128xf32>
    %cst_16 = arith.constant 1.000000e+00 : f32
    %56 = vector.broadcast %cst_16 : f32 to vector<2x128xf32>
    %57 = arith.addf %56, %55 : vector<2x128xf32>
    %58 = arith.divf %56, %57 : vector<2x128xf32>
    %59 = vector.shape_cast %53 : vector<1x128xi1> to vector<1x128xi1>
    %60 = vector.broadcast %59 : vector<1x128xi1> to vector<2x128xi1>
    %61 = arith.select %60, %58, %31 : vector<2x128xi1>, vector<2x128xf32>
    %cst_17 = arith.constant 0.000000e+00 : f32
    %62 = vector.broadcast %cst_17 : f32 to vector<1x128xf32>
    %63 = arith.cmpf ogt, %37, %62 : vector<1x128xf32>
    %64 = vector.shape_cast %63 : vector<1x128xi1> to vector<1x128xi1>
    %65 = vector.broadcast %64 : vector<1x128xi1> to vector<2x128xi1>
    %66 = arith.select %65, %51, %61 : vector<2x128xi1>, vector<2x128xf32>
    %c0_18 = arith.constant 0 : index
    %c0_19 = arith.constant 0 : index
    %67 = vector.load %arg5[%c0_18, %c0_19] : memref<2x128xf32, #tpu.memory_space<vmem>>, vector<2x128xf32>
    tpu.vector_store %arg5[%c0_18, %c0_19], %66 {strides = array<i32>} : memref<2x128xf32, #tpu.memory_space<vmem>>, vector<2x128xf32>,
    return
  }
  func.func @transform_0(%arg0: i32) -> (i32, i32, i32) {
    %c0_i32 = arith.constant 0 : i32
    %c0_i32_0 = arith.constant 0 : i32
    %c0_i32_1 = arith.constant 0 : i32
    return %arg0, %c0_i32, %c0_i32_0 : i32, i32, i32
  }
  func.func @transform_1(%arg0: i32) -> (i32, i32) {
    %c0_i32 = arith.constant 0 : i32
    %c0_i32_0 = arith.constant 0 : i32
    %c0_i32_1 = arith.constant 0 : i32
    return %c0_i32, %c0_i32_0 : i32, i32
  }
  func.func @transform_2(%arg0: i32) -> (i32, i32) {
    %c0_i32 = arith.constant 0 : i32
    %c0_i32_0 = arith.constant 0 : i32
    %c0_i32_1 = arith.constant 0 : i32
    return %c0_i32, %c0_i32_0 : i32, i32
  }
  func.func @transform_3(%arg0: i32) -> (i32, i32) {
    %c0_i32 = arith.constant 0 : i32
    %c0_i32_0 = arith.constant 0 : i32
    %c0_i32_1 = arith.constant 0 : i32
    return %c0_i32, %c0_i32_0 : i32, i32
  }
  func.func @transform_4(%arg0: i32) -> (i32, i32) {
    %c0_i32 = arith.constant 0 : i32
    %c0_i32_0 = arith.constant 0 : i32
    return %arg0, %c0_i32 : i32, i32
  }
}

</mosaic_0001>

<bundles_post_ra>
// kernel: tpu_custom_call.1
= control target key start
LH: loop header
LB: loop body
LE: loop exit
PB: predicated region body
PF: predicated region fallthrough
CT: control target
= control target key end

     0   :  { %9 = vsyncpa [#allocation3], 0  ;;  %s5377_s0 = inlined_call_operand.hbm [shape: f32[2,4,256], index: 0, kind: input, shape index: {}]   ;;  %s5378_s1 = inlined_call_operand.hbm [shape: f32[4,256], index: 1, kind: input, shape index: {}]   ;;  %s5379_s2 = inlined_call_operand.hbm [shape: f32[1,256], index: 2, kind: input, shape index: {}]   ;;  %s5380_s3 = inlined_call_operand.hbm [shape: f32[8,128], index: 3, kind: input, shape index: {}]   ;;  %s5381_s4 = inlined_call_operand.hbm [shape: f32[2,128], index: 4, kind: output, shape index: {}]  }
   0x1   :  { %10 = vsyncpa [#allocation6], 0 }
   0x2   :  { %11 = vsyncpa [#allocation9], 0  ;;  %s31_s17 = sshll.u32 %s5378_s1, 4  ;;  %s32_s17 = int_to_ptr.hbm [resolvable:$true] %s31_s17 }
   0x3   :  { %12 = vsyncpa [#allocation4], 0  ;;  %s3235_s18 = smov [#allocation5]   ;;  %s17_s22 = sshll.u32 %s5377_s0, 4  ;;  %s18_s22 = int_to_ptr.hbm [resolvable:$true] %s17_s22 }
   0x4   :  { %s33_s19 = sshll.u32 %s3235_s18, 4  ;;  %s3236_s23 = smov [#allocation2]   ;;  %s34_s19 = int_to_ptr.vmem [resolvable:$true] %s33_s19 }
   0x5   :  { %36 = dma.hbm_to_vmem [thread:$0]  %s32_s17, 128, %s34_s19, [#allocation6]  }
   0x6   :  { %s19_s24 = sshll.u32 %s3236_s23, 4  ;;  %s3237_s25 = smov 128   ;;  %s20_s24 = int_to_ptr.vmem [resolvable:$true] %s19_s24 }
   0x7   :  { %s3238_s26 = smov 8   ;;  %s42_s1 = sshll.u32 %s5379_s2, 4  ;;  %s43_s1 = int_to_ptr.hbm [resolvable:$true] %s42_s1 }
   0x8   :  { %25 = dma.hbm_to_vmem [thread:$0]  %s18_s22, 256, %s20_s24, [#allocation3], %s3237_s25, %s3237_s25, %s3238_s26  }
   0x9   :  { %s3239_s29 = smov [#allocation7]   ;;  %s53_s0 = sshll.u32 %s5380_s3, 4  ;;  %s54_s0 = int_to_ptr.hbm [resolvable:$true] %s53_s0 }
   0xa   :  { %s44_s30 = sshll.u32 %s3239_s29, 4  ;;  %s3240_s7 = smov [#allocation8]   ;;  %s45_s30 = int_to_ptr.vmem [resolvable:$true] %s44_s30 }
   0xb   :  { %47 = dma.hbm_to_vmem [thread:$0]  %s43_s1, 32, %s45_s30, [#allocation6]  }
   0xc   :  { %s55_s8 = sshll.u32 %s3240_s7, 4  ;;  %s56_s8 = int_to_ptr.vmem [resolvable:$true] %s55_s8 }
   0xd   :  { %58 = dma.hbm_to_vmem [thread:$0]  %s54_s0, 128, %s56_s8, [#allocation9]  }
   0xe   :  { %3227 = dma.done.wait [#allocation3], 256  }
   0xf   :  { %3228 = vsyncadd [#allocation3], 4294967040 }
  0x10   :  { %3229 = dma.done.wait [#allocation6], 160  }
  0x11   :  { %3230 = vsyncadd [#allocation6], 4294967136 }
  0x12   :  { %3231 = dma.done.wait [#allocation9], 128  }
  0x13   :  { %3232 = vsyncadd [#allocation9], 4294967168  ;;  %v5382_v0 = vlaneseq  ;;  %v3292_v4 = vld [vmem:[#allocation5] sm:$0xff]  ;;  %v75_v5 = vld [vmem:[#allocation2] sm:$0xff]  ;;  %vm90_vm0 = vcmask 1043456   ;;  %v3241_v38 = vmov 256.0  }
  0x14   :  { %v76_v6 = vld [vmem:[#allocation2 + $0x8] sm:$0xff]  ;;  %v115_v7 = vperm.slane %v3292_v4, 0  ;;  %79 = vst [vmem:[#allocation1] ss:$2 sm:$0xff] %v75_v5  ;;  %v116_v26 = vperm.slane %v3292_v4, 4  ;;  %v837_v34 = vperm.slane %v3292_v4, 1  ;;  %3099 = vrcp.f32 %v3241_v38 }
  0x15   :  { %v3282_v1 = vshrl.u32 %v5382_v0, 7  ;;  %83 = vst [vmem:[#allocation1 + $0x10] ss:$2 sm:$0xff] %v76_v6  ;;  %v838_v36 = vperm.slane %v3292_v4, 5  ;;  %v5383_v54 = vmov 0   ;;  %v1521_v59 = vperm.slane %v3292_v4, 2 }
  0x16   :  { %v119_v8 = vperm.slane %v115_v7, 0  ;;  %v3331_v29 = vperm.slane %v116_v26, 0  ;;  %v3358_v35 = vperm.slane %v837_v34, 1  ;;  %vm677_vm2 = vcmask 130112   ;;  %s3243_s2 = smov [#allocation10]   ;;  %s2939_s11 = sshll.u32 %s5381_s4, 4  ;;  %s2940_s11 = int_to_ptr.hbm [resolvable:$true] %s2939_s11 }
  0x17   :  { %5446 = vst [vmem:[#allocation15_spill] sm:$0xff] %v3282_v1  ;;  %2961 = vset.pattern.permute.xlu1 %v3282_v1  ;;  %v3286_v2 = vadd.s32 16, %v3282_v1  ;;  %v3289_v3 = vadd.s32 120, %v3282_v1  ;;  %v3297_v13 = vadd.s32 8, %v3282_v1  ;;  %v3300_v17 = vadd.s32 24, %v3282_v1  ;;  %s2937_s3 = sshll.u32 %s3243_s2, 4  ;;  %s2938_s3 = int_to_ptr.vmem [resolvable:$true] %s2937_s3 }
  0x18   :  { %v3305_v21 = vadd.s32 40, %v3282_v1  ;;  %v3308_v22 = vadd.s32 48, %v3282_v1  ;;  %v3313_v23 = vadd.s32 56, %v3282_v1  ;;  %v3316_v24 = vadd.s32 64, %v3282_v1 }
  0x19   :  { %5447 = vst [vmem:[#allocation16_spill] sm:$0xff] %v3286_v2  ;;  %2963 = vset.pattern.permute.xlu2 %v3286_v2  ;;  %2975 = vset.pattern.permute.xlu0 %v3289_v3  ;;  %v3319_v25 = vadd.s32 32, %v3282_v1  ;;  %v3326_v27 = vadd.s32 72, %v3282_v1  ;;  %v3329_v28 = vadd.s32 80, %v3282_v1  ;;  %v3338_v30 = vadd.s32 88, %v3282_v1 }
  0x1a   :  { %5448 = vst [vmem:[#allocation17_spill] sm:$0xff] %v3289_v3  ;;  %v3341_v31 = vadd.s32 96, %v3282_v1  ;;  %v3347_v32 = vadd.s32 112, %v3282_v1  ;;  %v3351_v33 = vadd.s32 104, %v3282_v1  ;;  %v3379_v37 = vperm.slane %v838_v36, 1  ;;  %v3100_v39 = vpop.eup %3099 }
  0x1b   :  { %v80_v9 = vld.sshfl [vmem:[#allocation1] sm:$0xff pattern:$0x75316420]  ;;  %v81_v10 = vld.sshfl [vmem:[#allocation1 + $0x8] sm:$0xff pattern:$0x75316420]  ;;  %vm106_vm1 = vweird.f32 %v3100_v39 }
  0x1c   :  { %v91_v11 = vsel %vm90_vm0, %v80_v9, 0.0  ;;  %v92_v12 = vsel %vm90_vm0, %v81_v10, 0.0  ;;  %5449 = vst [vmem:[#allocation18_spill] sm:$0xff] %v3297_v13  ;;  %v84_v15 = vld.sshfl [vmem:[#allocation1 + $0x10] sm:$0xff pattern:$0x75316420] }
  0x1d   :  { %v93_v14 = vadd.f32 %v92_v12, %v91_v11  ;;  %v85_v16 = vld.sshfl [vmem:[#allocation1 + $0x18] sm:$0xff pattern:$0x75316420]  ;;  %5450 = vst [vmem:[#allocation19_spill] sm:$0xff] %v3300_v17  ;;  %v96_v18 = vsel %vm90_vm0, %v84_v15, 0.0  ;;  %v102_v40 = vmul.f32 256.0, %v3100_v39 }
  0x1e   :  { %v97_v19 = vsel %vm90_vm0, %v85_v16, 0.0  ;;  %5451 = vst [vmem:[#allocation20_spill] sm:$0xff] %v3305_v21  ;;  %v3439_v63 = vperm.slane %v1521_v59, 2  ;;  %vm681_vm3 = vcmask 195712   ;;  %vm685_vm4 = vcmask 261312  }
  0x1f   :  { %127 = vperm.xlu1 %2961, %v119_v8   ;;  %94 = vadd.xlane.f32.xlu0 %v93_v14  ;;  %v98_v20 = vadd.f32 %v97_v19, %v96_v18  ;;  %5452 = vst [vmem:[#allocation21_spill] sm:$0xff] %v3308_v22  ;;  %v103_v41 = vsub.f32 1.0, %v102_v40  ;;  %vm689_vm5 = vcmask 326912   ;;  %vm693_vm6 = vcmask 392512  }
  0x20   :  { %5453 = vst [vmem:[#allocation22_spill] sm:$0xff] %v3313_v23  ;;  %vm697_vm7 = vcmask 458112   ;;  %vm701_vm8 = vcmask 523712   ;;  %vm705_vm9 = vcmask 589312   ;;  %vm709_vm10 = vcmask 654912  }
  0x21   :  { %139 = vperm.xlu2 %2963, %v119_v8   ;;  %5454 = vst [vmem:[#allocation23_spill] sm:$0xff] %v3316_v24  ;;  %v104_v43 = vmul.f32 %v3100_v39, %v103_v41  ;;  %v1522_v41 = vperm.slane %v3292_v4, 6  ;;  %vm713_vm11 = vcmask 720512   ;;  %vm717_vm12 = vcmask 786112  }
  0x22   :  { %5455 = vst [vmem:[#allocation24_spill] sm:$0xff] %v3319_v25  ;;  %vm721_vm13 = vcmask 851712   ;;  %vm725_vm14 = vcmask 917312   ;;  %vm729_vm15 = vcmask 982912   ;;  %vm733_vm0 = vcmask 1048512  }
  0x23   :  { %5456 = vst [vmem:[#allocation25_spill] sm:$0xff] %v3326_v27  ;;  %v105_v44 = vadd.f32 %v3100_v39, %v104_v43 }
  0x24   :  { %5457 = vst [vmem:[#allocation26_spill] sm:$0xff] %v3329_v28 }
  0x25   :  { %5458 = vst [vmem:[#allocation27_spill] sm:$0xff] %v3338_v30  ;;  %v3402_v47 = vsel %vm106_vm1, %v3100_v39, %v105_v44  ;;  %vm828_vm1 = vcmask 1041409  }
  0x26   :  { %5459 = vst [vmem:[#allocation28_spill] sm:$0xff] %v3341_v31 }
  0x27   :  { %2962 = vset.pattern.permute.xlu1 %v3297_v13  ;;  %99 = vadd.xlane.f32.xlu0 %v98_v20  ;;  %5460 = vst [vmem:[#allocation29_spill] sm:$0xff] %v3347_v32 }
  0x28   :  { %5461 = vst [vmem:[#allocation30_spill] sm:$0xff] %v3351_v33 }
  0x29   :  { %2964 = vset.pattern.permute.xlu2 %v3300_v17 }
  0x2f   :  { %133 = vperm.xlu1 %2962, %v119_v8  }
  0x31   :  { %145 = vperm.xlu2 %2964, %v119_v8  }
  0x37   :  { %2965 = vset.pattern.permute.xlu1 %v3305_v21 }
  0x39   :  { %2966 = vset.pattern.permute.xlu2 %v3308_v22 }
  0x3b   :  { %217 = vperm.xlu0 %2975, %v119_v8  }
  0x3f   :  { %157 = vperm.xlu1 %2965, %v119_v8  }
  0x41   :  { %163 = vperm.xlu2 %2966, %v119_v8  }
  0x43   :  { %2976 = vset.pattern.permute.xlu0 %v3319_v25 }
  0x47   :  { %2967 = vset.pattern.permute.xlu1 %v3313_v23 }
  0x49   :  { %2968 = vset.pattern.permute.xlu2 %v3316_v24 }
  0x4b   :  { %151 = vperm.xlu0 %2976, %v119_v8  }
  0x4f   :  { %169 = vperm.xlu1 %2967, %v119_v8  }
  0x51   :  { %175 = vperm.xlu2 %2968, %v119_v8  }
  0x53   :  { %247 = vperm.xlu0 %2976, %v3331_v29  }
  0x57   :  { %2969 = vset.pattern.permute.xlu1 %v3326_v27 }
  0x59   :  { %2970 = vset.pattern.permute.xlu2 %v3329_v28 }
  0x5b   :  { %2985 = vset.pattern.permute.xlu0 %v3326_v27 }
  0x5f   :  { %181 = vperm.xlu1 %2969, %v119_v8  }
  0x61   :  { %187 = vperm.xlu2 %2970, %v119_v8  }
  0x63   :  { %277 = vperm.xlu0 %2985, %v3331_v29  }
  0x67   :  { %2971 = vset.pattern.permute.xlu1 %v3338_v30 }
  0x69   :  { %2972 = vset.pattern.permute.xlu2 %v3341_v31 }
  0x6b   :  { %2990 = vset.pattern.permute.xlu0 %v3347_v32 }
  0x6f   :  { %193 = vperm.xlu1 %2971, %v119_v8  }
  0x71   :  { %199 = vperm.xlu2 %2972, %v119_v8  }
  0x73   :  { %307 = vperm.xlu0 %2990, %v3331_v29  }
  0x77   :  { %2973 = vset.pattern.permute.xlu1 %v3351_v33 }
  0x79   :  { %2974 = vset.pattern.permute.xlu2 %v3347_v32 }
  0x7b   :  { %2995 = vset.pattern.permute.xlu0 %v3297_v13  ;;  %v3393_v42 = vpop.permute.xlu2 %139 }
  0x7f   :  { %205 = vperm.xlu1 %2973, %v119_v8  }
  0x81   :  { %211 = vperm.xlu2 %2974, %v119_v8  }
  0x83   :  { %855 = vperm.xlu0 %2995, %v3358_v35  }
  0x87   :  { %2977 = vset.pattern.permute.xlu1 %v3282_v1 }
  0x89   :  { %2978 = vset.pattern.permute.xlu2 %v3297_v13 }
  0x8b   :  { %3000 = vset.pattern.permute.xlu0 %v3308_v22  ;;  %v3398_v45 = vpop.permute.xlu2 %145 }
  0x8f   :  { %223 = vperm.xlu1 %2977, %v3331_v29  }
  0x91   :  { %229 = vperm.xlu2 %2978, %v3331_v29   ;;  %v3400_v46 = vpop.permute.xlu1 %127 }
  0x92   :  { %v95_v48 = vpop.xlane.xlu0 %94 }
  0x93   :  { %885 = vperm.xlu0 %3000, %v3358_v35   ;;  %v3406_v49 = vmul.f32 %v3402_v47, %v95_v48 }
  0x95   :  { %5462 = vst [vmem:[#allocation31_spill] sm:$0xff] %v3406_v49  ;;  %v3411_v50 = vperm.slane %v3406_v49, 0 }
  0x97   :  { %2979 = vset.pattern.permute.xlu1 %v3286_v2  ;;  %v347_v53 = vmul.f32 %v3400_v46, %v3411_v50  ;;  %v349_v58 = vmul.f32 %v3393_v42, %v3411_v50 }
  0x99   :  { %2980 = vset.pattern.permute.xlu2 %v3300_v17 }
  0x9a   :  { %v3422_v55 = vpop.xlane.xlu0 %99 }
  0x9b   :  { %3005 = vset.pattern.permute.xlu0 %v3338_v30  ;;  %v3415_v52 = vpop.permute.xlu2 %163 }
  0x9c   :  { %v353_v14 = vmul.f32 %v3415_v52, %v3411_v50 }
  0x9f   :  { %235 = vperm.xlu1 %2979, %v3331_v29  }
  0xa1   :  { %241 = vperm.xlu2 %2980, %v3331_v29   ;;  %v3413_v51 = vpop.permute.xlu1 %133 }
  0xa2   :  { %v348_v62 = vmul.f32 %v3413_v51, %v3411_v50 }
  0xa3   :  { %915 = vperm.xlu0 %3005, %v3358_v35  }
  0xa7   :  { %2981 = vset.pattern.permute.xlu1 %v3305_v21 }
  0xa9   :  { %2982 = vset.pattern.permute.xlu2 %v3308_v22 }
  0xab   :  { %3010 = vset.pattern.permute.xlu0 %v3282_v1  ;;  %v3426_v57 = vpop.permute.xlu2 %175 }
  0xad   :  { %v3433_v60 = vpop.permute.xlu0 %217 }
  0xae   :  { %v362_v39 = vmul.f32 %v3433_v60, %v3411_v50 }
  0xaf   :  { %253 = vperm.xlu1 %2981, %v3331_v29  }
  0xb1   :  { %259 = vperm.xlu2 %2982, %v3331_v29   ;;  %v3424_v56 = vpop.permute.xlu1 %157 }
  0xb2   :  { %v352_v6 = vmul.f32 %v3424_v56, %v3411_v50 }
  0xb3   :  { %945 = vperm.xlu0 %3010, %v3379_v37  }
  0xb7   :  { %2983 = vset.pattern.permute.xlu1 %v3313_v23 }
  0xb9   :  { %2984 = vset.pattern.permute.xlu2 %v3316_v24 }
  0xbb   :  { %3015 = vset.pattern.permute.xlu0 %v3305_v21  ;;  %v3441_v5 = vpop.permute.xlu2 %187 }
  0xbc   :  { %v357_v15 = vmul.f32 %v3441_v5, %v3411_v50 }
  0xbd   :  { %v3449_v8 = vpop.permute.xlu0 %151 }
  0xbe   :  { %v351_v9 = vmul.f32 %v3449_v8, %v3411_v50 }
  0xbf   :  { %265 = vperm.xlu1 %2983, %v3331_v29  }
  0xc1   :  { %271 = vperm.xlu2 %2984, %v3331_v29   ;;  %v3435_v61 = vpop.permute.xlu1 %169 }
  0xc2   :  { %v354_v10 = vmul.f32 %v3435_v61, %v3411_v50 }
  0xc3   :  { %975 = vperm.xlu0 %3015, %v3379_v37  }
  0xc5   :  { %v3493_v44 = vpop.permute.xlu0 %247 }
  0xc7   :  { %2986 = vset.pattern.permute.xlu1 %v3329_v28 }
  0xc9   :  { %2987 = vset.pattern.permute.xlu2 %v3338_v30 }
  0xcb   :  { %3020 = vset.pattern.permute.xlu0 %v3329_v28  ;;  %v3455_v11 = vpop.permute.xlu2 %199 }
  0xcc   :  { %v359_v34 = vmul.f32 %v3455_v11, %v3411_v50 }
  0xcf   :  { %283 = vperm.xlu1 %2986, %v3331_v29  }
  0xd1   :  { %289 = vperm.xlu2 %2987, %v3331_v29   ;;  %v3447_v7 = vpop.permute.xlu1 %181 }
  0xd2   :  { %v356_v19 = vmul.f32 %v3447_v7, %v3411_v50 }
  0xd3   :  { %1005 = vperm.xlu0 %3020, %v3379_v37  }
  0xd7   :  { %2988 = vset.pattern.permute.xlu1 %v3341_v31 }
  0xd9   :  { %2989 = vset.pattern.permute.xlu2 %v3351_v33 }
  0xdb   :  { %3025 = vset.pattern.permute.xlu0 %v3289_v3  ;;  %v3465_v16 = vpop.permute.xlu2 %211 }
  0xdf   :  { %295 = vperm.xlu1 %2988, %v3331_v29  }
  0xe1   :  { %301 = vperm.xlu2 %2989, %v3331_v29   ;;  %v3458_v12 = vpop.permute.xlu1 %193 }
  0xe3   :  { %1035 = vperm.xlu0 %3025, %v3379_v37  }
  0xe7   :  { %2991 = vset.pattern.permute.xlu1 %v3289_v3 }
  0xe9   :  { %2992 = vset.pattern.permute.xlu2 %v5383_v54 }
  0xea   :  { %481 = vperm.xlu2 %2992, %v347_v53  }
  0xeb   :  { %3030 = vset.pattern.permute.xlu0 %v3286_v2  ;;  %v3474_v26 = vpop.permute.xlu2 %229 }
  0xef   :  { %313 = vperm.xlu1 %2991, %v3331_v29  }
  0xf1   :  { %v3467_v18 = vpop.permute.xlu1 %205 }
  0xf2   :  { %487 = vperm.xlu2 %2992, %v349_v58   ;;  %v360_v20 = vmul.f32 %v3467_v18, %v3411_v50  ;;  %v3499_v58 = vperm.slane %v1522_v41, 2 }
  0xf3   :  { %1545 = vperm.xlu0 %3030, %v3439_v63  }
  0xf4   :  { %5463 = vst [vmem:[#allocation32_spill] sm:$0xff] %v3499_v58 }
  0xf7   :  { %2993 = vset.pattern.permute.xlu1 %v5383_v54 }
  0xf8   :  { %484 = vperm.xlu1 %2993, %v348_v62  }
  0xfa   :  { %496 = vperm.xlu2 %2992, %v352_v6  }
  0xfb   :  { %3035 = vset.pattern.permute.xlu0 %v3313_v23  ;;  %v3483_v38 = vpop.permute.xlu2 %241 }
  0xfc   :  { %v366_v40 = vmul.f32 %v3483_v38, %v3411_v50 }
 0x100   :  { %493 = vperm.xlu1 %2993, %v351_v9   ;;  %v3508_v9 = vpop.permute.xlu0 %277 }
 0x101   :  { %v3476_v29 = vpop.permute.xlu1 %223 }
 0x102   :  { %502 = vperm.xlu2 %2992, %v354_v10   ;;  %v363_v36 = vmul.f32 %v3476_v29, %v3411_v50  ;;  %v372_v10 = vmul.f32 %v3508_v9, %v3411_v50 }
 0x103   :  { %1575 = vperm.xlu0 %3035, %v3439_v63  }
 0x108   :  { %499 = vperm.xlu1 %2993, %v353_v14  }
 0x10a   :  { %511 = vperm.xlu2 %2992, %v357_v15  }
 0x10b   :  { %3040 = vset.pattern.permute.xlu0 %v3341_v31  ;;  %v3495_v48 = vpop.permute.xlu2 %259 }
 0x10c   :  { %v369_v59 = vmul.f32 %v3495_v48, %v3411_v50 }
 0x110   :  { %508 = vperm.xlu1 %2993, %v356_v19  }
 0x111   :  { %v3491_v43 = vpop.permute.xlu1 %235 }
 0x112   :  { %520 = vperm.xlu2 %2992, %v360_v20   ;;  %v365_v53 = vmul.f32 %v3491_v43, %v3411_v50 }
 0x113   :  { %1605 = vperm.xlu0 %3040, %v3439_v63  }
 0x118   :  { %517 = vperm.xlu1 %2993, %v359_v34  }
 0x11a   :  { %529 = vperm.xlu2 %2992, %v363_v36   ;;  %v3525_v36 = vpop.permute.xlu0 %307 }
 0x11b   :  { %3049 = vset.pattern.permute.xlu0 %v3308_v22  ;;  %v3513_v14 = vpop.permute.xlu2 %271 }
 0x11c   :  { %v371_v15 = vmul.f32 %v3513_v14, %v3411_v50 }
 0x120   :  { %526 = vperm.xlu1 %2993, %v362_v39   ;;  %v3529_v39 = vmul.f32 %v3402_v47, %v3422_v55 }
 0x121   :  { %v3504_v62 = vpop.permute.xlu1 %253 }
 0x122   :  { %538 = vperm.xlu2 %2992, %v366_v40   ;;  %v368_v6 = vmul.f32 %v3504_v62, %v3411_v50  ;;  %5464 = vst [vmem:[#allocation33_spill] sm:$0xff] %v3529_v39  ;;  %v377_v40 = vmul.f32 %v3525_v36, %v3411_v50  ;;  %v3615_v0 = vpop.permute.xlu0 %855 }
 0x123   :  { %1665 = vperm.xlu0 %3049, %v3499_v58  }
 0x128   :  { %535 = vperm.xlu1 %2993, %v365_v53   ;;  %v3536_v53 = vperm.slane %v3529_v39, 0 }
 0x12a   :  { %547 = vperm.xlu2 %2992, %v369_v59   ;;  %v2205_v59 = vperm.slane %v3292_v4, 3 }
 0x12b   :  { %3054 = vset.pattern.permute.xlu0 %v3338_v30  ;;  %v3518_v19 = vpop.permute.xlu2 %289 }
 0x12c   :  { %v374_v20 = vmul.f32 %v3518_v19, %v3411_v50 }
 0x130   :  { %544 = vperm.xlu1 %2993, %v368_v6   ;;  %v380_v6 = vmul.f32 %v3413_v51, %v3536_v53 }
 0x131   :  { %v3522_v34 = vpop.permute.xlu1 %265 }
 0x132   :  { %556 = vperm.xlu2 %2992, %v372_v10   ;;  %v3542_v10 = vperm.slane %v2205_v59, 3  ;;  %v389_v59 = vmul.f32 %v3441_v5, %v3536_v53 }
 0x133   :  { %1695 = vperm.xlu0 %3054, %v3499_v58  }
 0x134   :  { %5465 = vst [vmem:[#allocation34_spill] sm:$0xff] %v3542_v10 }
 0x138   :  { %553 = vperm.xlu1 %2993, %v371_v15   ;;  %v383_v15 = vmul.f32 %v3449_v8, %v3536_v53  ;;  %v381_v8 = vmul.f32 %v3393_v42, %v3536_v53  ;;  %v395_v42 = vmul.f32 %v3476_v29, %v3536_v53  ;;  %v390_v29 = vmul.f32 %v3458_v12, %v3536_v53 }
 0x13b   :  { %3055 = vset.pattern.permute.xlu0 %v3297_v13 }
 0x140   :  { %562 = vperm.xlu1 %2993, %v374_v20   ;;  %v386_v20 = vmul.f32 %v3435_v61, %v3536_v53  ;;  %v392_v61 = vmul.f32 %v3467_v18, %v3536_v53  ;;  %v387_v18 = vmul.f32 %v3426_v57, %v3536_v53 }
 0x141   :  { %v3533_v41 = vpop.permute.xlu1 %283 }
 0x143   :  { %1635 = vperm.xlu0 %3055, %v3499_v58   ;;  %v350_v58 = vmul.f32 %v3398_v45, %v3411_v50 }
 0x148   :  { %571 = vperm.xlu1 %2993, %v377_v40  }
 0x14b   :  { %2223 = vperm.xlu0 %3055, %v3542_v10  }
 0x150   :  { %580 = vperm.xlu1 %2993, %v380_v6  }
 0x151   :  { %v296_v47 = vpop.permute.xlu1 %295 }
 0x152   :  { %v375_v55 = vmul.f32 %v296_v47, %v3411_v50 }
 0x153   :  { %3067 = vset.pattern.permute.xlu0 %v3308_v22 }
 0x154   :  { %565 = vperm.xlu2 %2992, %v375_v55   ;;  %v3562_v55 = vpop.permute.xlu2 %301 }
 0x158   :  { %589 = vperm.xlu1 %2993, %v383_v15   ;;  %v384_v15 = vmul.f32 %v3424_v56, %v3536_v53  ;;  %v398_v56 = vmul.f32 %v3483_v38, %v3536_v53  ;;  %v393_v38 = vmul.f32 %v3465_v16, %v3536_v53 }
 0x15b   :  { %2253 = vperm.xlu0 %3067, %v3542_v10  }
 0x160   :  { %598 = vperm.xlu1 %2993, %v386_v20   ;;  %v3571_v20 = vpop.permute.xlu2 %481 }
 0x161   :  { %v314_v51 = vpop.permute.xlu1 %313 }
 0x162   :  { %v378_v40 = vmul.f32 %v314_v51, %v3411_v50 }
 0x163   :  { %3072 = vset.pattern.permute.xlu0 %v3338_v30 }
 0x164   :  { %574 = vperm.xlu2 %2992, %v378_v40   ;;  %v2206_v40 = vperm.slane %v3292_v4, 7  ;;  %v401_v4 = vmul.f32 %v3495_v48, %v3536_v53 }
 0x168   :  { %607 = vperm.xlu1 %2993, %v389_v59   ;;  %v3579_v59 = vperm.slane %v2206_v40, 3  ;;  %v396_v40 = vmul.f32 %v3474_v26, %v3536_v53 }
 0x16a   :  { %v3558_v6 = vpop.permute.xlu1 %484  ;;  %5466 = vst [vmem:[#allocation35_spill] sm:$0xff] %v3579_v59 }
 0x16b   :  { %2283 = vperm.xlu0 %3072, %v3542_v10  }
 0x16c   :  { %583 = vperm.xlu2 %2992, %v381_v8  }
 0x170   :  { %616 = vperm.xlu1 %2993, %v392_v61   ;;  %v3585_v61 = vpop.permute.xlu2 %487 }
 0x172   :  { %v3569_v5 = vpop.permute.xlu1 %493 }
 0x173   :  { %3077 = vset.pattern.permute.xlu0 %v3282_v1 }
 0x174   :  { %592 = vperm.xlu2 %2992, %v384_v15  }
 0x178   :  { %625 = vperm.xlu1 %2993, %v395_v42   ;;  %v3595_v42 = vpop.permute.xlu2 %496 }
 0x17a   :  { %v3581_v8 = vpop.permute.xlu1 %499 }
 0x17b   :  { %5467 = vst [vmem:[#allocation36_spill] sm:$0xff] %v3581_v8  ;;  %2313 = vperm.xlu0 %3077, %v3579_v59  }
 0x17c   :  { %601 = vperm.xlu2 %2992, %v387_v18   ;;  %v404_v18 = vmul.f32 %v3508_v9, %v3536_v53  ;;  %v410_v9 = vmul.f32 %v314_v51, %v3536_v53  ;;  %v405_v51 = vmul.f32 %v3533_v41, %v3536_v53 }
 0x180   :  { %634 = vperm.xlu1 %2993, %v398_v56   ;;  %v407_v56 = vmul.f32 %v296_v47, %v3536_v53  ;;  %v402_v47 = vmul.f32 %v3522_v34, %v3536_v53 }
 0x182   :  { %v3592_v15 = vpop.permute.xlu1 %508 }
 0x183   :  { %5468 = vst [vmem:[#allocation37_spill] sm:$0xff] %v3592_v15  ;;  %3082 = vset.pattern.permute.xlu0 %v3305_v21 }
 0x184   :  { %610 = vperm.xlu2 %2992, %v390_v29   ;;  %v3605_v29 = vpop.permute.xlu2 %502 }
 0x188   :  { %643 = vperm.xlu1 %2993, %v401_v4   ;;  %v399_v4 = vmul.f32 %v3493_v44, %v3536_v53 }
 0x18a   :  { %v3602_v48 = vpop.permute.xlu1 %517 }
 0x18b   :  { %2343 = vperm.xlu0 %3082, %v3579_v59   ;;  %5469 = vst [vmem:[#allocation38_spill] sm:$0xff] %v3602_v48 }
 0x18c   :  { %619 = vperm.xlu2 %2992, %v393_v38  }
 0x190   :  { %652 = vperm.xlu1 %2993, %v404_v18   ;;  %v3613_v18 = vpop.permute.xlu2 %511 }
 0x192   :  { %v3611_v38 = vpop.permute.xlu1 %526 }
 0x193   :  { %3087 = vset.pattern.permute.xlu0 %v3329_v28  ;;  %5470 = vst [vmem:[#allocation39_spill] sm:$0xff] %v3611_v38 }
 0x194   :  { %628 = vperm.xlu2 %2992, %v396_v40  }
 0x198   :  { %661 = vperm.xlu1 %2993, %v407_v56   ;;  %v3623_v56 = vpop.permute.xlu0 %885 }
 0x19a   :  { %v3620_v40 = vpop.permute.xlu1 %535 }
 0x19b   :  { %2373 = vperm.xlu0 %3087, %v3579_v59   ;;  %5471 = vst [vmem:[#allocation40_spill] sm:$0xff] %v3620_v40  ;;  %v5475_v40 = vmov 0  }
 0x19c   :  { %637 = vperm.xlu2 %2992, %v399_v4   ;;  %v3627_v4 = vpop.permute.xlu2 %520 }
 0x19d   :  { %5472 = vst [vmem:[#allocation41_spill] sm:$0xff] %v3627_v4 }
 0x1a0   :  { %670 = vperm.xlu1 %2993, %v410_v9   ;;  %v3631_v9 = vpop.permute.xlu0 %915 }
 0x1a2   :  { %v3635_v54 = vpop.permute.xlu1 %544 }
 0x1a3   :  { %3092 = vset.pattern.permute.xlu0 %v3289_v3  ;;  %5473 = vst [vmem:[#allocation42_spill] sm:$0xff] %v3635_v54 }
 0x1a4   :  { %646 = vperm.xlu2 %2992, %v402_v47   ;;  %v408_v47 = vmul.f32 %v3562_v55, %v3536_v53  ;;  %v3638_v10 = vpop.permute.xlu2 %529 }
 0x1a5   :  { %5474 = vst [vmem:[#allocation43_spill] sm:$0xff] %v3638_v10 }
 0x1a8   :  { %2996 = vset.pattern.permute.xlu1 %v3286_v2 }
 0x1aa   :  { %v3646_v38 = vpop.permute.xlu1 %553 }
 0x1ab   :  { %2403 = vperm.xlu0 %3092, %v3579_v59   ;;  %5476 = vst [vmem:[#allocation44_spill] sm:$0xff] %v3646_v38 }
 0x1ac   :  { %655 = vperm.xlu2 %2992, %v405_v51   ;;  %v3643_v51 = vpop.permute.xlu0 %945  ;;  %v3649_v54 = vpop.permute.xlu2 %538 }
 0x1ad   :  { %5477 = vst [vmem:[#allocation45_spill] sm:$0xff] %v3649_v54 }
 0x1b0   :  { %861 = vperm.xlu1 %2996, %v3358_v35  }
 0x1b2   :  { %v3657_v10 = vpop.permute.xlu1 %562 }
 0x1b3   :  { %3093 = vset.pattern.permute.xlu0 %v5475_v40  ;;  %5478 = vst [vmem:[#allocation46_spill] sm:$0xff] %v3657_v10 }
 0x1b4   :  { %664 = vperm.xlu2 %2992, %v408_v47   ;;  %490 = vperm.xlu0 %3093, %v350_v58   ;;  %v355_v47 = vmul.f32 %v3426_v57, %v3411_v50  ;;  %v3654_v59 = vpop.permute.xlu0 %975  ;;  %v3659_v48 = vpop.permute.xlu2 %547  ;;  %v358_v58 = vmul.f32 %v3458_v12, %v3411_v50  ;;  %v364_v12 = vmul.f32 %v3474_v26, %v3411_v50 }
 0x1b5   :  { %5479 = vst [vmem:[#allocation47_spill] sm:$0xff] %v3659_v48 }
 0x1b8   :  { %2998 = vset.pattern.permute.xlu1 %v3319_v25 }
 0x1ba   :  { %v3667_v57 = vpop.permute.xlu1 %571 }
 0x1bb   :  { %5480 = vst [vmem:[#allocation48_spill] sm:$0xff] %v3667_v57 }
 0x1bc   :  { %2994 = vset.pattern.permute.xlu2 %v3282_v1  ;;  %505 = vperm.xlu0 %3093, %v355_v47   ;;  %v3664_v38 = vpop.permute.xlu0 %1005  ;;  %v361_v47 = vmul.f32 %v3465_v16, %v3411_v50  ;;  %v3674_v48 = vpop.permute.xlu2 %556  ;;  %v367_v16 = vmul.f32 %v3493_v44, %v3411_v50 }
 0x1bd   :  { %5481 = vst [vmem:[#allocation49_spill] sm:$0xff] %v3674_v48 }
 0x1c0   :  { %873 = vperm.xlu1 %2998, %v3358_v35  }
 0x1c2   :  { %v3684_v54 = vpop.permute.xlu1 %580 }
 0x1c4   :  { %849 = vperm.xlu2 %2994, %v3358_v35   ;;  %514 = vperm.xlu0 %3093, %v358_v58   ;;  %v3672_v10 = vpop.permute.xlu0 %1035  ;;  %v3682_v57 = vpop.permute.xlu2 %565 }
 0x1c5   :  { %5483 = vst [vmem:[#allocation51_spill] sm:$0xff] %v3682_v57 }
 0x1c8   :  { %3001 = vset.pattern.permute.xlu1 %v3313_v23 }
 0x1ca   :  { %v3694_v26 = vpop.permute.xlu1 %589 }
 0x1cc   :  { %2997 = vset.pattern.permute.xlu2 %v3300_v17  ;;  %523 = vperm.xlu0 %3093, %v361_v47   ;;  %v3680_v58 = vpop.permute.xlu0 %1545  ;;  %v3692_v48 = vpop.permute.xlu2 %574 }
 0x1cd   :  { %5482 = vst [vmem:[#allocation50_spill] sm:$0xff] %v3680_v58 }
 0x1ce   :  { %5485 = vst [vmem:[#allocation53_spill] sm:$0xff] %v3692_v48 }
 0x1d0   :  { %891 = vperm.xlu1 %3001, %v3358_v35  }
 0x1d2   :  { %v3705_v44 = vpop.permute.xlu1 %598 }
 0x1d3   :  { %5487 = vst [vmem:[#allocation55_spill] sm:$0xff] %v3705_v44  ;;  %v3969_v44 = vperm.slane %v3529_v39, 1 }
 0x1d4   :  { %867 = vperm.xlu2 %2997, %v3358_v35   ;;  %532 = vperm.xlu0 %3093, %v364_v12   ;;  %v3690_v47 = vpop.permute.xlu0 %1575  ;;  %v370_v12 = vmul.f32 %v3522_v34, %v3411_v50  ;;  %v3702_v57 = vpop.permute.xlu2 %583 }
 0x1d5   :  { %5484 = vst [vmem:[#allocation52_spill] sm:$0xff] %v3690_v47 }
 0x1d8   :  { %3003 = vset.pattern.permute.xlu1 %v3326_v27 }
 0x1dc   :  { %2999 = vset.pattern.permute.xlu2 %v3305_v21  ;;  %541 = vperm.xlu0 %3093, %v367_v16   ;;  %v3700_v58 = vpop.permute.xlu0 %1605  ;;  %v373_v16 = vmul.f32 %v3533_v41, %v3411_v50  ;;  %v3713_v34 = vpop.permute.xlu2 %592 }
 0x1dd   :  { %5486 = vst [vmem:[#allocation54_spill] sm:$0xff] %v3700_v58  ;;  %v3715_v58 = vpop.permute.xlu1 %607 }
 0x1de   :  { %5489 = vst [vmem:[#allocation57_spill] sm:$0xff] %v3715_v58 }
 0x1e0   :  { %903 = vperm.xlu1 %3003, %v3358_v35  }
 0x1e4   :  { %879 = vperm.xlu2 %2999, %v3358_v35   ;;  %550 = vperm.xlu0 %3093, %v370_v12   ;;  %v3710_v47 = vpop.permute.xlu0 %1665  ;;  %v376_v12 = vmul.f32 %v3562_v55, %v3411_v50  ;;  %v3723_v41 = vpop.permute.xlu2 %601  ;;  %v382_v50 = vmul.f32 %v3398_v45, %v3536_v53 }
 0x1e5   :  { %5488 = vst [vmem:[#allocation56_spill] sm:$0xff] %v3710_v47  ;;  %v3730_v58 = vpop.permute.xlu1 %616 }
 0x1e6   :  { %5491 = vst [vmem:[#allocation59_spill] sm:$0xff] %v3723_v41 }
 0x1e7   :  { %5493 = vst [vmem:[#allocation61_spill] sm:$0xff] %v3730_v58 }
 0x1e8   :  { %3006 = vset.pattern.permute.xlu1 %v3341_v31 }
 0x1ec   :  { %3002 = vset.pattern.permute.xlu2 %v3316_v24  ;;  %559 = vperm.xlu0 %3093, %v373_v16   ;;  %v3720_v48 = vpop.permute.xlu0 %1695  ;;  %v379_v16 = vmul.f32 %v3400_v46, %v3536_v53  ;;  %v3736_v55 = vpop.permute.xlu2 %610  ;;  %v385_v46 = vmul.f32 %v3415_v52, %v3536_v53 }
 0x1ed   :  { %5490 = vst [vmem:[#allocation58_spill] sm:$0xff] %v3720_v48  ;;  %v3740_v48 = vpop.permute.xlu1 %625 }
 0x1ee   :  { %5494 = vst [vmem:[#allocation62_spill] sm:$0xff] %v3736_v55 }
 0x1ef   :  { %5496 = vst [vmem:[#allocation64_spill] sm:$0xff] %v3740_v48 }
 0x1f0   :  { %921 = vperm.xlu1 %3006, %v3358_v35  }
 0x1f4   :  { %897 = vperm.xlu2 %3002, %v3358_v35   ;;  %568 = vperm.xlu0 %3093, %v376_v12   ;;  %v3728_v47 = vpop.permute.xlu0 %1635 }
 0x1f5   :  { %5492 = vst [vmem:[#allocation60_spill] sm:$0xff] %v3728_v47  ;;  %v3748_v47 = vpop.permute.xlu2 %619  ;;  %v3751_v45 = vpop.permute.xlu1 %634 }
 0x1f6   :  { %5498 = vst [vmem:[#allocation66_spill] sm:$0xff] %v3748_v47 }
 0x1f7   :  { %5499 = vst [vmem:[#allocation67_spill] sm:$0xff] %v3751_v45 }
 0x1f8   :  { %3008 = vset.pattern.permute.xlu1 %v3347_v32 }
 0x1fc   :  { %3004 = vset.pattern.permute.xlu2 %v3329_v28  ;;  %577 = vperm.xlu0 %3093, %v379_v16   ;;  %v3738_v12 = vpop.permute.xlu0 %2223 }
 0x1fd   :  { %5495 = vst [vmem:[#allocation63_spill] sm:$0xff] %v3738_v12  ;;  %v3759_v52 = vpop.permute.xlu2 %628 }
 0x1fe   :  { %5501 = vst [vmem:[#allocation69_spill] sm:$0xff] %v3759_v52 }
 0x200   :  { %933 = vperm.xlu1 %3008, %v3358_v35  }
 0x204   :  { %909 = vperm.xlu2 %3004, %v3358_v35   ;;  %586 = vperm.xlu0 %3093, %v382_v50   ;;  %v3746_v16 = vpop.permute.xlu0 %2253  ;;  %v388_v50 = vmul.f32 %v3447_v7, %v3536_v53 }
 0x205   :  { %5497 = vst [vmem:[#allocation65_spill] sm:$0xff] %v3746_v16  ;;  %v3761_v16 = vpop.permute.xlu1 %643  ;;  %v3769_v7 = vpop.permute.xlu2 %637 }
 0x206   :  { %5502 = vst [vmem:[#allocation70_spill] sm:$0xff] %v3761_v16 }
 0x207   :  { %5504 = vst [vmem:[#allocation72_spill] sm:$0xff] %v3769_v7 }
 0x208   :  { %3011 = vset.pattern.permute.xlu1 %v3297_v13 }
 0x20c   :  { %3007 = vset.pattern.permute.xlu2 %v3351_v33  ;;  %595 = vperm.xlu0 %3093, %v385_v46   ;;  %v3756_v12 = vpop.permute.xlu0 %2283  ;;  %v391_v46 = vmul.f32 %v3455_v11, %v3536_v53  ;;  %v397_v11 = vmul.f32 %v3491_v43, %v3536_v53 }
 0x20d   :  { %5500 = vst [vmem:[#allocation68_spill] sm:$0xff] %v3756_v12  ;;  %v3774_v12 = vpop.permute.xlu1 %652 }
 0x20e   :  { %5505 = vst [vmem:[#allocation73_spill] sm:$0xff] %v3774_v12 }
 0x210   :  { %951 = vperm.xlu1 %3011, %v3379_v37  }
 0x214   :  { %927 = vperm.xlu2 %3007, %v3358_v35   ;;  %604 = vperm.xlu0 %3093, %v388_v50   ;;  %v3766_v45 = vpop.permute.xlu0 %2313  ;;  %v394_v50 = vmul.f32 %v3433_v60, %v3536_v53  ;;  %v400_v60 = vmul.f32 %v3504_v62, %v3536_v53 }
 0x215   :  { %5503 = vst [vmem:[#allocation71_spill] sm:$0xff] %v3766_v45  ;;  %v3786_v45 = vpop.permute.xlu1 %661 }
 0x216   :  { %5509 = vst [vmem:[#allocation77_spill] sm:$0xff] %v3786_v45 }
 0x218   :  { %3013 = vset.pattern.permute.xlu1 %v3300_v17 }
 0x21c   :  { %3009 = vset.pattern.permute.xlu2 %v3289_v3  ;;  %613 = vperm.xlu0 %3093, %v391_v46   ;;  %v3776_v3 = vpop.permute.xlu0 %2343 }
 0x21d   :  { %5506 = vst [vmem:[#allocation74_spill] sm:$0xff] %v3776_v3  ;;  %v3797_v43 = vpop.permute.xlu1 %670 }
 0x21e   :  { %5512 = vst [vmem:[#allocation80_spill] sm:$0xff] %v3797_v43 }
 0x220   :  { %963 = vperm.xlu1 %3013, %v3379_v37  }
 0x224   :  { %939 = vperm.xlu2 %3009, %v3358_v35   ;;  %622 = vperm.xlu0 %3093, %v394_v50   ;;  %v3782_v35 = vpop.permute.xlu2 %646  ;;  %v3784_v46 = vpop.permute.xlu0 %2373 }
 0x225   :  { %5507 = vst [vmem:[#allocation75_spill] sm:$0xff] %v3782_v35 }
 0x226   :  { %5508 = vst [vmem:[#allocation76_spill] sm:$0xff] %v3784_v46 }
 0x228   :  { %3016 = vset.pattern.permute.xlu1 %v3308_v22 }
 0x22c   :  { %3012 = vset.pattern.permute.xlu2 %v3286_v2  ;;  %631 = vperm.xlu0 %3093, %v397_v11   ;;  %v3792_v50 = vpop.permute.xlu0 %2403  ;;  %v3794_v3 = vpop.permute.xlu2 %655  ;;  %v403_v11 = vmul.f32 %v3513_v14, %v3536_v53 }
 0x22d   :  { %5510 = vst [vmem:[#allocation78_spill] sm:$0xff] %v3792_v50  ;;  %v3807_v50 = vpop.permute.xlu1 %861 }
 0x22e   :  { %5511 = vst [vmem:[#allocation79_spill] sm:$0xff] %v3794_v3 }
 0x230   :  { %981 = vperm.xlu1 %3016, %v3379_v37  }
 0x234   :  { %957 = vperm.xlu2 %3012, %v3379_v37   ;;  %640 = vperm.xlu0 %3093, %v400_v60   ;;  %v3803_v46 = vpop.permute.xlu0 %490  ;;  %v3805_v62 = vpop.permute.xlu2 %664  ;;  %v406_v60 = vmul.f32 %v3518_v19, %v3536_v53 }
 0x235   :  { %5513 = vst [vmem:[#allocation81_spill] sm:$0xff] %v3805_v62  ;;  %v3815_v14 = vpop.permute.xlu1 %873  ;;  %v409_v62 = vmul.f32 %v3525_v36, %v3536_v53 }
 0x238   :  { %3018 = vset.pattern.permute.xlu1 %v3316_v24 }
 0x23c   :  { %3014 = vset.pattern.permute.xlu2 %v3319_v25  ;;  %649 = vperm.xlu0 %3093, %v403_v11   ;;  %v3813_v43 = vpop.permute.xlu2 %849  ;;  %v3817_v11 = vpop.permute.xlu0 %505 }
 0x23d   :  { %5514 = vst [vmem:[#allocation82_spill] sm:$0xff] %v3817_v11 }
 0x240   :  { %993 = vperm.xlu1 %3018, %v3379_v37  }
 0x242   :  { %v3825_v19 = vpop.permute.xlu1 %891 }
 0x244   :  { %969 = vperm.xlu2 %3014, %v3379_v37   ;;  %658 = vperm.xlu0 %3093, %v406_v60   ;;  %v3823_v2 = vpop.permute.xlu2 %867  ;;  %v3828_v60 = vperm.slane %v3406_v49, 1  ;;  %v3833_v45 = vpop.permute.xlu0 %514 }
 0x245   :  { %5515 = vst [vmem:[#allocation83_spill] sm:$0xff] %v3833_v45 }
 0x246   :  { %v1071_v7 = vmul.f32 %v3807_v50, %v3828_v60  ;;  %v1095_v11 = vmul.f32 %v3664_v38, %v3828_v60 }
 0x248   :  { %3021 = vset.pattern.permute.xlu1 %v3338_v30 }
 0x24c   :  { %3017 = vset.pattern.permute.xlu2 %v3313_v23  ;;  %667 = vperm.xlu0 %3093, %v409_v62   ;;  %v1073_v23 = vmul.f32 %v3815_v14, %v3828_v60  ;;  %v3836_v36 = vpop.permute.xlu2 %879  ;;  %v3843_v49 = vpop.permute.xlu0 %523 }
 0x24d   :  { %5516 = vst [vmem:[#allocation84_spill] sm:$0xff] %v3843_v49  ;;  %v1074_v52 = vmul.f32 %v3836_v36, %v3828_v60  ;;  %v1106_v39 = vmul.f32 %v3836_v36, %v3969_v44  ;;  %v1108_v36 = vmul.f32 %v3825_v19, %v3969_v44 }
 0x250   :  { %1011 = vperm.xlu1 %3021, %v3379_v37  }
 0x252   :  { %v3838_v53 = vpop.permute.xlu1 %903 }
 0x253   :  { %v1078_v62 = vmul.f32 %v3838_v53, %v3828_v60 }
 0x254   :  { %987 = vperm.xlu2 %3017, %v3379_v37   ;;  %1210 = vperm.xlu0 %3093, %v1073_v23   ;;  %v3846_v3 = vpop.permute.xlu2 %897  ;;  %v1069_v23 = vmul.f32 %v3813_v43, %v3828_v60  ;;  %v3856_v16 = vpop.permute.xlu0 %532 }
 0x255   :  { %5517 = vst [vmem:[#allocation85_spill] sm:$0xff] %v3856_v16 }
 0x258   :  { %3023 = vset.pattern.permute.xlu1 %v3351_v33 }
 0x25c   :  { %3019 = vset.pattern.permute.xlu2 %v3326_v27  ;;  %1225 = vperm.xlu0 %3093, %v1078_v62   ;;  %v3867_v33 = vpop.permute.xlu0 %541 }
 0x25d   :  { %5518 = vst [vmem:[#allocation86_spill] sm:$0xff] %v3867_v33 }
 0x25e   :  { %v3858_v62 = vpop.permute.xlu2 %909 }
 0x25f   :  { %v1079_v33 = vmul.f32 %v3858_v62, %v3828_v60 }
 0x260   :  { %1023 = vperm.xlu1 %3023, %v3379_v37  }
 0x262   :  { %v3848_v12 = vpop.permute.xlu1 %921 }
 0x263   :  { %v1081_v35 = vmul.f32 %v3848_v12, %v3828_v60 }
 0x264   :  { %999 = vperm.xlu2 %3019, %v3379_v37  }
 0x265   :  { %1234 = vperm.xlu0 %3093, %v1081_v35  }
 0x268   :  { %3026 = vset.pattern.permute.xlu1 %v5475_v40 }
 0x269   :  { %1198 = vperm.xlu1 %3026, %v1069_v23   ;;  %v1076_v23 = vmul.f32 %v3825_v19, %v3828_v60 }
 0x26c   :  { %3022 = vset.pattern.permute.xlu2 %v3341_v31  ;;  %v3876_v31 = vpop.permute.xlu0 %550 }
 0x26d   :  { %5519 = vst [vmem:[#allocation87_spill] sm:$0xff] %v3876_v31 }
 0x26e   :  { %v3863_v48 = vpop.permute.xlu2 %927 }
 0x271   :  { %1204 = vperm.xlu1 %3026, %v1071_v7  }
 0x272   :  { %v3885_v16 = vpop.permute.xlu1 %933 }
 0x274   :  { %1017 = vperm.xlu2 %3022, %v3379_v37  }
 0x279   :  { %1213 = vperm.xlu1 %3026, %v1074_v52   ;;  %v1070_v52 = vmul.f32 %v3615_v0, %v3828_v60 }
 0x27c   :  { %3024 = vset.pattern.permute.xlu2 %v3347_v32  ;;  %v3883_v32 = vpop.permute.xlu0 %559 }
 0x27d   :  { %5520 = vst [vmem:[#allocation88_spill] sm:$0xff] %v3883_v32 }
 0x27e   :  { %v3870_v35 = vpop.permute.xlu2 %939 }
 0x27f   :  { %v1084_v7 = vmul.f32 %v3870_v35, %v3828_v60 }
 0x281   :  { %1219 = vperm.xlu1 %3026, %v1076_v23   ;;  %1243 = vperm.xlu0 %3093, %v1084_v7   ;;  %v1082_v23 = vmul.f32 %v3863_v48, %v3828_v60 }
 0x282   :  { %v3896_v7 = vpop.permute.xlu1 %951 }
 0x284   :  { %1029 = vperm.xlu2 %3024, %v3379_v37   ;;  %v3898_v32 = vpop.permute.xlu0 %568 }
 0x285   :  { %5521 = vst [vmem:[#allocation89_spill] sm:$0xff] %v3898_v32 }
 0x289   :  { %1228 = vperm.xlu1 %3026, %v1079_v33   ;;  %v1072_v33 = vmul.f32 %v3823_v2, %v3828_v60 }
 0x28c   :  { %3027 = vset.pattern.permute.xlu2 %v5475_v40  ;;  %v1090_v40 = vmul.f32 %v3654_v59, %v3828_v60  ;;  %v3908_v31 = vpop.permute.xlu0 %577 }
 0x28d   :  { %1201 = vperm.xlu2 %3027, %v1070_v52   ;;  %v1085_v52 = vmul.f32 %v3643_v51, %v3828_v60 }
 0x28e   :  { %v3888_v30 = vpop.permute.xlu2 %957 }
 0x28f   :  { %v1087_v37 = vmul.f32 %v3888_v30, %v3828_v60 }
 0x291   :  { %1237 = vperm.xlu1 %3026, %v1082_v23   ;;  %1252 = vperm.xlu0 %3093, %v1087_v37   ;;  %v1075_v23 = vmul.f32 %v3623_v56, %v3828_v60 }
 0x292   :  { %v3906_v37 = vpop.permute.xlu1 %963 }
 0x293   :  { %v1088_v32 = vmul.f32 %v3906_v37, %v3828_v60 }
 0x295   :  { %1207 = vperm.xlu2 %3027, %v1072_v33   ;;  %v1077_v33 = vmul.f32 %v3846_v3, %v3828_v60 }
 0x299   :  { %1246 = vperm.xlu1 %3026, %v1085_v52   ;;  %1261 = vperm.xlu0 %3093, %v1090_v40   ;;  %v3918_v52 = vpop.permute.xlu0 %586 }
 0x29d   :  { %1216 = vperm.xlu2 %3027, %v1075_v23   ;;  %v1080_v23 = vmul.f32 %v3631_v9, %v3828_v60 }
 0x29e   :  { %v3922_v49 = vpop.permute.xlu2 %969 }
 0x2a1   :  { %1255 = vperm.xlu1 %3026, %v1088_v32   ;;  %v1083_v32 = vmul.f32 %v3885_v16, %v3828_v60  ;;  %v3928_v28 = vpop.permute.xlu0 %595 }
 0x2a2   :  { %v3914_v47 = vpop.permute.xlu1 %981 }
 0x2a3   :  { %v1091_v40 = vmul.f32 %v3914_v47, %v3828_v60 }
 0x2a5   :  { %1222 = vperm.xlu2 %3027, %v1077_v33  }
 0x2a9   :  { %1264 = vperm.xlu1 %3026, %v1091_v40   ;;  %v1086_v40 = vmul.f32 %v3896_v7, %v3828_v60 }
 0x2ad   :  { %1231 = vperm.xlu2 %3027, %v1080_v23   ;;  %v3936_v23 = vpop.permute.xlu0 %604 }
 0x2ae   :  { %v3932_v55 = vpop.permute.xlu2 %987  ;;  %5522 = vst [vmem:[#allocation90_spill] sm:$0xff] %v3936_v23 }
 0x2b2   :  { %v3924_v58 = vpop.permute.xlu1 %993 }
 0x2b3   :  { %v1093_v33 = vmul.f32 %v3924_v58, %v3828_v60 }
 0x2b5   :  { %1240 = vperm.xlu2 %3027, %v1083_v32   ;;  %1270 = vperm.xlu0 %3093, %v1093_v33   ;;  %v1089_v32 = vmul.f32 %v3922_v49, %v3828_v60  ;;  %v3948_v41 = vpop.permute.xlu0 %613 }
 0x2b6   :  { %5523 = vst [vmem:[#allocation91_spill] sm:$0xff] %v3948_v41 }
 0x2bd   :  { %1249 = vperm.xlu2 %3027, %v1086_v40   ;;  %v1092_v40 = vmul.f32 %v3932_v55, %v3828_v60  ;;  %v3956_v23 = vpop.permute.xlu0 %622 }
 0x2be   :  { %v3938_v27 = vpop.permute.xlu2 %999  ;;  %5524 = vst [vmem:[#allocation92_spill] sm:$0xff] %v3956_v23 }
 0x2bf   :  { %v1094_v45 = vmul.f32 %v3938_v27, %v3828_v60 }
 0x2c1   :  { %1273 = vperm.xlu1 %3026, %v1094_v45  }
 0x2c2   :  { %v3942_v15 = vpop.permute.xlu1 %1011 }
 0x2c3   :  { %v1096_v33 = vmul.f32 %v3942_v15, %v3828_v60 }
 0x2c5   :  { %1258 = vperm.xlu2 %3027, %v1089_v32   ;;  %1279 = vperm.xlu0 %3093, %v1096_v33   ;;  %v1100_v32 = vmul.f32 %v3672_v10, %v3828_v60  ;;  %v3964_v41 = vpop.permute.xlu0 %631 }
 0x2c6   :  { %5525 = vst [vmem:[#allocation93_spill] sm:$0xff] %v3964_v41 }
 0x2cd   :  { %1267 = vperm.xlu2 %3027, %v1092_v40   ;;  %v3981_v8 = vpop.permute.xlu0 %640 }
 0x2ce   :  { %v3952_v4 = vpop.permute.xlu2 %1017 }
 0x2cf   :  { %v1097_v45 = vmul.f32 %v3952_v4, %v3828_v60 }
 0x2d1   :  { %1282 = vperm.xlu1 %3026, %v1097_v45  }
 0x2d2   :  { %v3962_v33 = vpop.permute.xlu1 %1023 }
 0x2d3   :  { %v1098_v40 = vmul.f32 %v3962_v33, %v3828_v60 }
 0x2d5   :  { %1276 = vperm.xlu2 %3027, %v1095_v11   ;;  %v1103_v11 = vmul.f32 %v3807_v50, %v3969_v44 }
 0x2d9   :  { %1291 = vperm.xlu1 %3026, %v1100_v32   ;;  %v1101_v32 = vmul.f32 %v3813_v43, %v3969_v44  ;;  %v1105_v43 = vmul.f32 %v3815_v14, %v3969_v44 }
 0x2db   :  { %v3979_v41 = vpop.permute.xlu1 %1198 }
 0x2dd   :  { %1285 = vperm.xlu2 %3027, %v1098_v40   ;;  %v1102_v40 = vmul.f32 %v3615_v0, %v3969_v44  ;;  %v3997_v0 = vpop.permute.xlu0 %649 }
 0x2de   :  { %v3971_v45 = vpop.permute.xlu2 %1029 }
 0x2df   :  { %v1099_v23 = vmul.f32 %v3971_v45, %v3828_v60  ;;  %v1104_v60 = vmul.f32 %v3823_v2, %v3969_v44  ;;  %v1112_v2 = vmul.f32 %v3631_v9, %v3969_v44  ;;  %v1115_v9 = vmul.f32 %v3885_v16, %v3969_v44 }
 0x2e0   :  { %v1116_v16 = vmul.f32 %v3870_v35, %v3969_v44  ;;  %v1120_v35 = vmul.f32 %v3906_v37, %v3969_v44 }
 0x2e1   :  { %1288 = vperm.xlu0 %3093, %v1099_v23   ;;  %1300 = vperm.xlu1 %3026, %v1103_v11   ;;  %v1109_v11 = vmul.f32 %v3846_v3, %v3969_v44 }
 0x2e3   :  { %v3991_v23 = vpop.permute.xlu1 %1204 }
 0x2e5   :  { %1294 = vperm.xlu2 %3027, %v1101_v32   ;;  %v4011_v3 = vpop.permute.xlu0 %658 }
 0x2e7   :  { %v3987_v50 = vpop.permute.xlu2 %1201 }
 0x2e9   :  { %1297 = vperm.xlu0 %3093, %v1102_v40   ;;  %1309 = vperm.xlu1 %3026, %v1106_v39   ;;  %v1107_v39 = vmul.f32 %v3623_v56, %v3969_v44  ;;  %v1111_v56 = vmul.f32 %v3858_v62, %v3969_v44  ;;  %v1118_v62 = vmul.f32 %v3896_v7, %v3969_v44 }
 0x2ea   :  { %v1119_v7 = vmul.f32 %v3888_v30, %v3969_v44  ;;  %v1127_v30 = vmul.f32 %v3664_v38, %v3969_v44  ;;  %v1130_v38 = vmul.f32 %v3962_v33, %v3969_v44  ;;  %v1131_v33 = vmul.f32 %v3971_v45, %v3969_v44 }
 0x2eb   :  { %v4007_v14 = vpop.permute.xlu1 %1213 }
 0x2ed   :  { %1303 = vperm.xlu2 %3027, %v1104_v60   ;;  %v1110_v60 = vmul.f32 %v3838_v53, %v3969_v44  ;;  %v1114_v53 = vmul.f32 %v3863_v48, %v3969_v44  ;;  %v1121_v48 = vmul.f32 %v3922_v49, %v3969_v44  ;;  %v1122_v49 = vmul.f32 %v3654_v59, %v3969_v44 }
 0x2ee   :  { %v1126_v59 = vmul.f32 %v3938_v27, %v3969_v44 }
 0x2ef   :  { %v3999_v32 = vpop.permute.xlu2 %1207 }
 0x2f1   :  { %1306 = vperm.xlu0 %3093, %v1105_v43   ;;  %1318 = vperm.xlu1 %3026, %v1109_v11   ;;  %v1113_v11 = vmul.f32 %v3848_v12, %v3969_v44  ;;  %v1117_v12 = vmul.f32 %v3643_v51, %v3969_v44 }
 0x2f3   :  { %v4021_v19 = vpop.permute.xlu1 %1219 }
 0x2f5   :  { %1312 = vperm.xlu2 %3027, %v1107_v39   ;;  %v4025_v39 = vpop.permute.xlu0 %667 }
 0x2f6   :  { %5526 = vst [vmem:[#allocation94_spill] sm:$0xff] %v4025_v39 }
 0x2f7   :  { %v4009_v40 = vpop.permute.xlu2 %1216 }
 0x2f9   :  { %1315 = vperm.xlu0 %3093, %v1108_v36   ;;  %1327 = vperm.xlu1 %3026, %v1112_v2  }
 0x2fb   :  { %v4035_v36 = vpop.permute.xlu1 %1228 }
 0x2fd   :  { %1321 = vperm.xlu2 %3027, %v1110_v60   ;;  %v4037_v60 = vpop.permute.xlu0 %1210 }
 0x2ff   :  { %v4019_v43 = vpop.permute.xlu2 %1222 }
 0x301   :  { %1324 = vperm.xlu0 %3093, %v1111_v56   ;;  %1336 = vperm.xlu1 %3026, %v1115_v9  }
 0x303   :  { %v4047_v9 = vpop.permute.xlu1 %1237 }
 0x305   :  { %1330 = vperm.xlu2 %3027, %v1113_v11   ;;  %v1124_v11 = vmul.f32 %v3932_v55, %v3969_v44  ;;  %v4053_v51 = vpop.permute.xlu0 %1225 }
 0x307   :  { %v4031_v2 = vpop.permute.xlu2 %1231 }
 0x309   :  { %1333 = vperm.xlu0 %3093, %v1114_v53   ;;  %1345 = vperm.xlu1 %3026, %v1118_v62   ;;  %v1123_v62 = vmul.f32 %v3914_v47, %v3969_v44 }
 0x30b   :  { %v4063_v37 = vpop.permute.xlu1 %1246 }
 0x30d   :  { %1339 = vperm.xlu2 %3027, %v1116_v16   ;;  %v4067_v55 = vpop.permute.xlu0 %1234 }
 0x30f   :  { %v4043_v56 = vpop.permute.xlu2 %1240 }
 0x311   :  { %1342 = vperm.xlu0 %3093, %v1117_v12   ;;  %1354 = vperm.xlu1 %3026, %v1121_v48   ;;  %v1125_v12 = vmul.f32 %v3924_v58, %v3969_v44  ;;  %v1129_v58 = vmul.f32 %v3952_v4, %v3969_v44 }
 0x315   :  { %1348 = vperm.xlu2 %3027, %v1119_v7   ;;  %v4077_v47 = vpop.permute.xlu0 %1243  ;;  %v4079_v7 = vpop.permute.xlu1 %1255 }
 0x317   :  { %v4055_v53 = vpop.permute.xlu2 %1249 }
 0x319   :  { %1363 = vperm.xlu1 %3026, %v1124_v11   ;;  %1351 = vperm.xlu0 %3093, %v1120_v35   ;;  %v1128_v35 = vmul.f32 %v3942_v15, %v3969_v44  ;;  %v1132_v15 = vmul.f32 %v3672_v10, %v3969_v44 }
 0x31d   :  { %1357 = vperm.xlu2 %3027, %v1122_v49   ;;  %v4087_v27 = vpop.permute.xlu0 %1252  ;;  %v4092_v49 = vpop.permute.xlu1 %1264 }
 0x31e   :  { %5528 = vst [vmem:[#allocation96_spill] sm:$0xff] %v4092_v49 }
 0x31f   :  { %v4065_v16 = vpop.permute.xlu2 %1258 }
 0x321   :  { %1372 = vperm.xlu1 %3026, %v1127_v30   ;;  %1360 = vperm.xlu0 %3093, %v1123_v62  }
 0x325   :  { %1366 = vperm.xlu2 %3027, %v1125_v12   ;;  %v4099_v4 = vpop.permute.xlu0 %1261 }
 0x327   :  { %v4075_v48 = vpop.permute.xlu2 %1267 }
 0x329   :  { %1381 = vperm.xlu1 %3026, %v1130_v38   ;;  %1369 = vperm.xlu0 %3093, %v1126_v59  }
 0x32d   :  { %1375 = vperm.xlu2 %3027, %v1128_v35   ;;  %v4107_v45 = vpop.permute.xlu0 %1270  ;;  %v5535_v35 = vlaneseq }
 0x32e   :  { %5531 = vst [vmem:[#allocation99_spill] sm:$0xff] %v4107_v45 }
 0x32f   :  { %v4085_v11 = vpop.permute.xlu2 %1276 }
 0x330   :  { %5527 = vst [vmem:[#allocation95_spill] sm:$0xff] %v4085_v11 }
 0x331   :  { %3028 = vset.pattern.permute.xlu1 %v3282_v1  ;;  %1378 = vperm.xlu0 %3093, %v1129_v58   ;;  %v4121_v58 = vand.u32 127, %v5535_v35 }
 0x333   :  { %v4101_v62 = vpop.permute.xlu1 %1273  ;;  %v4139_v35 = vadd.s32 4294967280, %v4121_v58  ;;  %v4163_v39 = vadd.s32 4294967240, %v4121_v58 }
 0x334   :  { %5530 = vst [vmem:[#allocation98_spill] sm:$0xff] %v4101_v62 }
 0x335   :  { %1384 = vperm.xlu2 %3027, %v1131_v33   ;;  %v4124_v33 = vadd.s32 4294967288, %v4121_v58 }
 0x337   :  { %v4096_v30 = vpop.permute.xlu2 %1285  ;;  %v4115_v44 = vpop.permute.xlu0 %1279  ;;  %v1390_v1 = vperm.slane %v3987_v50, %v4124_v33 }
 0x338   :  { %5529 = vst [vmem:[#allocation97_spill] sm:$0xff] %v4096_v30  ;;  %v766_v30 = vperm.slane %v3908_v31, %v4121_v58  ;;  %v4149_v31 = vadd.s32 4294967256, %v4121_v58 }
 0x339   :  { %1533 = vperm.xlu1 %3028, %v3439_v63   ;;  %1387 = vperm.xlu0 %3093, %v1132_v15   ;;  %5533 = vst [vmem:[#allocation101_spill] sm:$0xff] %v4115_v44  ;;  %v769_v44 = vperm.slane %v3702_v57, %v4139_v35 }
 0x33d   :  { %3029 = vset.pattern.permute.xlu2 %v3297_v13 }
 0x33f   :  { %v4104_v12 = vpop.permute.xlu2 %1294 }
 0x341   :  { %3031 = vset.pattern.permute.xlu1 %v3300_v17 }
 0x343   :  { %v4109_v59 = vpop.permute.xlu1 %1282 }
 0x344   :  { %5532 = vst [vmem:[#allocation100_spill] sm:$0xff] %v4109_v59 }
 0x345   :  { %1539 = vperm.xlu2 %3029, %v3439_v63  }
 0x347   :  { %v4112_v10 = vpop.permute.xlu2 %1303 }
 0x349   :  { %1551 = vperm.xlu1 %3031, %v3439_v63  }
 0x34b   :  { %v4117_v38 = vpop.permute.xlu1 %1291 }
 0x34c   :  { %5534 = vst [vmem:[#allocation102_spill] sm:$0xff] %v4117_v38  ;;  %v767_v38 = vperm.slane %v3684_v54, %v4124_v33 }
 0x34d   :  { %3032 = vset.pattern.permute.xlu2 %v3319_v25  ;;  %v676_v25 = vperm.slane %v3558_v6, %v4124_v33 }
 0x34e   :  { %v768_v6 = vsel %vm677_vm2, %v767_v38, %v766_v30  ;;  %v4166_v30 = vadd.s32 4294967264, %v4121_v58 }
 0x34f   :  { %v4127_v15 = vpop.permute.xlu2 %1312  ;;  %v770_v57 = vsel %vm681_vm3, %v769_v44, %v768_v6 }
 0x350   :  { %v773_v49 = vperm.slane %v3694_v26, %v4166_v30  ;;  %v688_v50 = vperm.slane %v3569_v5, %v4166_v30  ;;  %v775_v26 = vperm.slane %v3713_v34, %v4149_v31  ;;  %v4213_v34 = vadd.s32 4294967224, %v4121_v58 }
 0x351   :  { %3033 = vset.pattern.permute.xlu1 %v3305_v21  ;;  %v4142_v21 = vadd.s32 4294967272, %v4121_v58 }
 0x353   :  { %v4129_v13 = vpop.permute.xlu1 %1300  ;;  %v4131_v17 = vpop.permute.xlu0 %1288  ;;  %v771_v59 = vperm.slane %v3918_v52, %v4142_v21  ;;  %v684_v54 = vperm.slane %v3803_v46, %v4142_v21  ;;  %v1394_v5 = vperm.slane %v3999_v32, %v4142_v21 }
 0x354   :  { %5536 = vst [vmem:[#allocation103_spill] sm:$0xff] %v4131_v17  ;;  %v674_v17 = vperm.slane %v3571_v20, %v4121_v58  ;;  %v680_v20 = vperm.slane %v3585_v61, %v4139_v35  ;;  %v4178_v61 = vadd.s32 4294967248, %v4121_v58  ;;  %v1454_v32 = vperm.slane %v4129_v13, %v4139_v35 }
 0x355   :  { %1557 = vperm.xlu2 %3032, %v3439_v63   ;;  %v772_v62 = vsel %vm685_vm4, %v771_v59, %v770_v57  ;;  %v700_v59 = vperm.slane %v3605_v29, %v4163_v39 }
 0x356   :  { %v678_v11 = vsel %vm677_vm2, %v676_v25, %v674_v17  ;;  %v4169_v17 = vadd.s32 4294967216, %v4121_v58  ;;  %v4172_v25 = vadd.s32 4294967192, %v4121_v58  ;;  %v777_v57 = vperm.slane %v3928_v28, %v4178_v61 }
 0x357   :  { %v682_v38 = vsel %vm681_vm3, %v680_v20, %v678_v11  ;;  %v4184_v45 = vpop.permute.xlu2 %1321  ;;  %v692_v11 = vperm.slane %v3595_v42, %v4149_v31  ;;  %v1389_v20 = vperm.slane %v3979_v41, %v4121_v58  ;;  %v1451_v42 = vperm.slane %v4104_v12, %v4121_v58 }
 0x358   :  { %v686_v44 = vsel %vm685_vm4, %v684_v54, %v682_v38  ;;  %v774_v54 = vsel %vm689_vm5, %v773_v49, %v772_v62  ;;  %v1392_v28 = vperm.slane %v3991_v23, %v4139_v35  ;;  %v5537_v62 = vld [vmem:[#allocation36_spill] sm:$0xff]  ;;  %v4225_v38 = vadd.s32 4294967232, %v4121_v58 }
 0x359   :  { %1563 = vperm.xlu1 %3033, %v3439_v63   ;;  %v690_v29 = vsel %vm689_vm5, %v688_v50, %v686_v44  ;;  %v696_v12 = vperm.slane %v5537_v62, %v4178_v61  ;;  %v4238_v41 = vadd.s32 4294967200, %v4121_v58 }
 0x35a   :  { %v694_v44 = vsel %vm693_vm6, %v692_v11, %v690_v29  ;;  %v1396_v11 = vperm.slane %v4037_v60, %v4166_v30 }
 0x35b   :  { %v4175_v46 = vpop.permute.xlu1 %1309  ;;  %v1298_v52 = vpop.permute.xlu0 %1297  ;;  %v698_v29 = vsel %vm697_vm7, %v696_v12, %v694_v44  ;;  %v5541_v12 = vld [vmem:[#allocation41_spill] sm:$0xff] }
 0x35c   :  { %v1452_v6 = vperm.slane %v1298_v52, %v4124_v33  ;;  %v1391_v52 = vsel %vm677_vm2, %v1390_v1, %v1389_v20  ;;  %v776_v1 = vsel %vm693_vm6, %v775_v26, %v774_v54 }
 0x35d   :  { %3034 = vset.pattern.permute.xlu2 %v3308_v22  ;;  %v778_v23 = vsel %vm697_vm7, %v777_v57, %v776_v1  ;;  %v1456_v57 = vperm.slane %v4112_v10, %v4142_v21  ;;  %v5540_v1 = vld [vmem:[#allocation90_spill] sm:$0xff]  ;;  %v1400_v10 = vperm.slane %v4009_v40, %v4178_v61  ;;  %v702_v40 = vsel %vm701_vm8, %v700_v59, %v698_v29  ;;  %v5616_v22 = vld [vmem:[#allocation56_spill] sm:$0xff] }
 0x35e   :  { %v1453_v49 = vsel %vm677_vm2, %v1452_v6, %v1451_v42  ;;  %v1393_v6 = vsel %vm681_vm3, %v1392_v28, %v1391_v52  ;;  %v5538_v42 = vld [vmem:[#allocation55_spill] sm:$0xff]  ;;  %v5539_v52 = vld [vmem:[#allocation82_spill] sm:$0xff] }
 0x35f   :  { %v779_v62 = vperm.slane %v5538_v42, %v4163_v39  ;;  %v1395_v26 = vsel %vm685_vm4, %v1394_v5, %v1393_v6  ;;  %v1455_v54 = vsel %vm681_vm3, %v1454_v32, %v1453_v49  ;;  %v704_v5 = vperm.slane %v5539_v52, %v4225_v38  ;;  %v4249_v49 = vpop.permute.xlu2 %1330  ;;  %v5543_v52 = vld [vmem:[#allocation37_spill] sm:$0xff] }
 0x360   :  { %v783_v32 = vperm.slane %v5540_v1, %v4213_v34  ;;  %v1397_v60 = vsel %vm689_vm5, %v1396_v11, %v1395_v26  ;;  %v1457_v6 = vsel %vm685_vm4, %v1456_v57, %v1455_v54  ;;  %v708_v1 = vperm.slane %v5543_v52, %v4213_v34  ;;  %v5544_v52 = vld [vmem:[#allocation57_spill] sm:$0xff] }
 0x361   :  { %3036 = vset.pattern.permute.xlu1 %v3316_v24  ;;  %v780_v28 = vsel %vm701_vm8, %v779_v62, %v778_v23  ;;  %v1398_v23 = vperm.slane %v4007_v14, %v4149_v31  ;;  %v4267_v26 = vadd.s32 4294967208, %v4121_v58  ;;  %v1460_v54 = vperm.slane %v4175_v46, %v4149_v31 }
 0x362   :  { %v706_v11 = vsel %vm705_vm9, %v704_v5, %v702_v40  ;;  %v785_v44 = vperm.slane %v5544_v52, %v4169_v17  ;;  %v1402_v5 = vperm.slane %v4021_v19, %v4163_v39 }
 0x363   :  { %v4230_v50 = vpop.permute.xlu1 %1318  ;;  %v1307_v20 = vpop.permute.xlu0 %1306 }
 0x364   :  { %v1458_v13 = vperm.slane %v1307_v20, %v4166_v30  ;;  %v5542_v20 = vld [vmem:[#allocation59_spill] sm:$0xff]  ;;  %v1466_v52 = vperm.slane %v4230_v50, %v4225_v38 }
 0x365   :  { %1569 = vperm.xlu2 %3034, %v3439_v63   ;;  %v781_v42 = vperm.slane %v5542_v20, %v4225_v38  ;;  %v1404_v20 = vperm.slane %v4019_v43, %v4225_v38  ;;  %v5545_v43 = vld [vmem:[#allocation83_spill] sm:$0xff] }
 0x366   :  { %v1459_v62 = vsel %vm689_vm5, %v1458_v13, %v1457_v6  ;;  %v1399_v13 = vsel %vm693_vm6, %v1398_v23, %v1397_v60  ;;  %v710_v60 = vsel %vm709_vm10, %v708_v1, %v706_v11  ;;  %v5548_v1 = vld [vmem:[#allocation62_spill] sm:$0xff] }
 0x367   :  { %v782_v14 = vsel %vm705_vm9, %v781_v42, %v780_v28  ;;  %v1401_v6 = vsel %vm697_vm7, %v1400_v10, %v1399_v13  ;;  %v1461_v59 = vsel %vm693_vm6, %v1460_v54, %v1459_v62  ;;  %v1462_v28 = vperm.slane %v4127_v15, %v4178_v61  ;;  %v5546_v42 = vld [vmem:[#allocation25_spill] sm:$0xff]  ;;  %v5547_v62 = vld [vmem:[#allocation91_spill] sm:$0xff] }
 0x368   :  { %v784_v57 = vsel %vm709_vm10, %v783_v32, %v782_v14  ;;  %v716_v10 = vperm.slane %v5545_v43, %v4267_v26  ;;  %v789_v40 = vperm.slane %v5547_v62, %v4238_v41  ;;  %v1403_v19 = vsel %vm701_vm8, %v1402_v5, %v1401_v6  ;;  %v4314_v5 = vpop.permute.xlu2 %1339  ;;  %v5551_v43 = vld [vmem:[#allocation26_spill] sm:$0xff]  ;;  %v5552_v62 = vld [vmem:[#allocation61_spill] sm:$0xff] }
 0x369   :  { %1581 = vperm.xlu1 %3036, %v3439_v63   ;;  %v786_v23 = vsel %vm713_vm11, %v785_v44, %v784_v57  ;;  %v1463_v15 = vsel %vm697_vm7, %v1462_v28, %v1461_v59  ;;  %v4298_v54 = vadd.s32 4294967176, %v4121_v58  ;;  %v787_v11 = vperm.slane %v5548_v1, %v4267_v26 }
 0x36a   :  { %v1405_v14 = vsel %vm705_vm9, %v1404_v20, %v1403_v19  ;;  %v5550_v57 = vperm.slane %v3613_v18, %v4169_v17  ;;  %v1406_v59 = vperm.slane %v4053_v51, %v4213_v34  ;;  %v4317_v20 = vadd.s32 4294967184, %v4121_v58 }
 0x36b   :  { %v1328_v29 = vpop.permute.xlu1 %1327  ;;  %v1316_v46 = vpop.permute.xlu0 %1315  ;;  %v1410_v51 = vperm.slane %v4031_v2, %v4267_v26  ;;  %v791_v19 = vperm.slane %v5552_v62, %v4172_v25  ;;  %v4359_v62 = vld [vmem:[#allocation7] sm:$0x3] }
 0x36c   :  { %v1464_v32 = vperm.slane %v1316_v46, %v4163_v39  ;;  %v5549_v46 = vld [vmem:[#allocation38_spill] sm:$0xff]  ;;  %v714_v6 = vsel %vm713_vm11, %v5550_v57, %v710_v60  ;;  %v1407_v60 = vsel %vm709_vm10, %v1406_v59, %v1405_v14  ;;  %v1472_v57 = vperm.slane %v1328_v29, %v4267_v26 }
 0x36d   :  { %3037 = vset.pattern.permute.xlu2 %v5546_v42  ;;  %v720_v44 = vperm.slane %v5549_v46, %v4238_v41  ;;  %v718_v28 = vsel %vm717_vm12, %v716_v10, %v714_v6  ;;  %v1408_v10 = vperm.slane %v4035_v36, %v4169_v17  ;;  %v1474_v59 = vperm.slane %v4249_v49, %v4238_v41 }
 0x36e   :  { %v1465_v13 = vsel %vm701_vm8, %v1464_v32, %v1463_v15  ;;  %v788_v32 = vsel %vm717_vm12, %v787_v11, %v786_v23  ;;  %v1468_v23 = vperm.slane %v4184_v45, %v4213_v34  ;;  %v5553_v11 = vld [vmem:[#allocation84_spill] sm:$0xff]  ;;  %v1412_v29 = vperm.slane %v4067_v55, %v4238_v41 }
 0x36f   :  { %v790_v18 = vsel %vm721_vm13, %v789_v40, %v788_v32  ;;  %v1467_v50 = vsel %vm705_vm9, %v1466_v52, %v1465_v13  ;;  %v722_v40 = vsel %vm721_vm13, %v720_v44, %v718_v28  ;;  %v728_v2 = vperm.slane %v5553_v11, %v4317_v20  ;;  %v5554_v45 = vld [vmem:[#allocation92_spill] sm:$0xff]  ;;  %v5555_v28 = vld [vmem:[#allocation66_spill] sm:$0xff] }
 0x370   :  { %v792_v13 = vsel %vm725_vm14, %v791_v19, %v790_v18  ;;  %v1409_v46 = vsel %vm713_vm11, %v1408_v10, %v1407_v60  ;;  %v1469_v36 = vsel %vm709_vm10, %v1468_v23, %v1467_v50  ;;  %v795_v6 = vperm.slane %v5554_v45, %v4298_v54  ;;  %v1349_v11 = vpop.permute.xlu2 %1348 }
 0x371   :  { %3038 = vset.pattern.permute.xlu1 %v5551_v43  ;;  %v1411_v44 = vsel %vm717_vm12, %v1410_v51, %v1409_v46  ;;  %v793_v32 = vperm.slane %v5555_v28, %v4317_v20  ;;  %v5556_v60 = vperm.slane %v5541_v12, %v4172_v25  ;;  %v1416_v55 = vperm.slane %v4043_v56, %v4317_v20  ;;  %v5557_v12 = vld [vmem:[#allocation39_spill] sm:$0xff] }
 0x372   :  { %v1413_v10 = vsel %vm721_vm13, %v1412_v29, %v1411_v44  ;;  %v732_v23 = vperm.slane %v5557_v12, %v4298_v54  ;;  %v412_v46 = vperm.slane %v4359_v62, 0  ;;  %v5558_v44 = vld [vmem:[#allocation27_spill] sm:$0xff]  ;;  %v5564_v12 = vld [vmem:[#allocation93_spill] sm:$0xff] }
 0x373   :  { %v1337_v15 = vpop.permute.xlu1 %1336  ;;  %v1325_v1 = vpop.permute.xlu0 %1324  ;;  %v726_v50 = vsel %vm725_vm14, %v5556_v60, %v722_v40  ;;  %v794_v19 = vsel %vm729_vm15, %v793_v32, %v792_v13  ;;  %v1414_v40 = vperm.slane %v4047_v9, %v4172_v25  ;;  %v1418_v9 = vperm.slane %v4077_v47, %v4298_v54 }
 0x374   :  { %v1470_v14 = vperm.slane %v1325_v1, %v4169_v17  ;;  %v730_v49 = vsel %vm729_vm15, %v728_v2, %v726_v50  ;;  %v796_v1 = vsel %vm733_vm0, %v795_v6, %v794_v19  ;;  %v1478_v6 = vperm.slane %v1337_v15, %v4317_v20  ;;  %v5559_v15 = vld [vmem:[#allocation30_spill] sm:$0xff]  ;;  %v5560_v50 = vld [vmem:[#allocation85_spill] sm:$0xff] }
 0x375   :  { %1587 = vperm.xlu2 %3037, %v3439_v63   ;;  %v734_v13 = vsel %vm733_vm0, %v732_v23, %v730_v49  ;;  %v1415_v56 = vsel %vm725_vm14, %v1414_v40, %v1413_v10  ;;  %v736_v49 = vperm.slane %v5560_v50, %v4124_v33  ;;  %v5563_v10 = vld [vmem:[#allocation43_spill] sm:$0xff]  ;;  %v800_v23 = vperm.slane %v5564_v12, %v4139_v35 }
 0x376   :  { %v1471_v52 = vsel %vm713_vm11, %v1470_v14, %v1469_v36  ;;  %v829_v36 = vsel %vm828_vm1, %v796_v1, %v734_v13  ;;  %v1417_v45 = vsel %vm729_vm15, %v1416_v55, %v1415_v56  ;;  %v735_v55 = vperm.slane %v5563_v10, %v4121_v58  ;;  %v5565_v13 = vld [vmem:[#allocation64_spill] sm:$0xff] }
 0x377   :  { %v1473_v18 = vsel %vm717_vm12, %v1472_v57, %v1471_v52  ;;  %v833_v32 = vadd.f32 %v829_v36, %v412_v46  ;;  %v1419_v29 = vsel %vm733_vm0, %v1418_v9, %v1417_v45  ;;  %v797_v46 = vperm.slane %v5565_v13, %v4121_v58  ;;  %v5571_v13 = vld [vmem:[#allocation29_spill] sm:$0xff] }
 0x378   :  { %v1475_v51 = vsel %vm721_vm13, %v1474_v59, %v1473_v18  ;;  %v1480_v59 = vperm.slane %v4314_v5, %v4298_v54  ;;  %v5562_v5 = vld [vmem:[#allocation69_spill] sm:$0xff]  ;;  %v1485_v56 = vperm.slane %v1349_v11, %v4139_v35  ;;  %v737_v36 = vsel %vm677_vm2, %v736_v49, %v735_v55 }
 0x379   :  { %1593 = vperm.xlu1 %3038, %v3439_v63   ;;  %v798_v19 = vperm.slane %v5562_v5, %v4124_v33  ;;  %v806_v5 = vperm.slane %v3981_v8, %v4149_v31  ;;  %v1421_v12 = vperm.slane %v4055_v53, %v4124_v33  ;;  %v1420_v8 = vperm.slane %v4063_v37, %v4121_v58  ;;  %v5572_v53 = vld [vmem:[#allocation42_spill] sm:$0xff] }
 0x37b   :  { %v1346_v2 = vpop.permute.xlu1 %1345  ;;  %v1334_v14 = vpop.permute.xlu0 %1333 }
 0x37c   :  { %v1476_v57 = vperm.slane %v1334_v14, %v4172_v25  ;;  %v1483_v1 = vperm.slane %v1346_v2, %v4124_v33  ;;  %v799_v2 = vsel %vm677_vm2, %v798_v19, %v797_v46 }
 0x37d   :  { %3039 = vset.pattern.permute.xlu2 %v5558_v44 }
 0x37e   :  { %v1477_v52 = vsel %vm725_vm14, %v1476_v57, %v1475_v51  ;;  %v1358_v57 = vpop.permute.xlu2 %1357 }
 0x37f   :  { %v1479_v28 = vsel %vm729_vm15, %v1478_v6, %v1477_v52  ;;  %v5566_v6 = vld [vmem:[#allocation40_spill] sm:$0xff]  ;;  %v801_v52 = vsel %vm681_vm3, %v800_v23, %v799_v2 }
 0x380   :  { %v1481_v18 = vsel %vm733_vm0, %v1480_v59, %v1479_v28  ;;  %v738_v9 = vperm.slane %v5566_v6, %v4139_v35  ;;  %v5567_v28 = vld [vmem:[#allocation67_spill] sm:$0xff]  ;;  %v744_v6 = vperm.slane %v5572_v53, %v4149_v31 }
 0x381   :  { %v1513_v60 = vsel %vm828_vm1, %v1481_v18, %v1419_v29  ;;  %3041 = vset.pattern.permute.xlu1 %v5559_v15  ;;  %v5568_v29 = vld [vmem:[#allocation86_spill] sm:$0xff] }
 0x382   :  { %v4391_v47 = vadd.f32 %v1513_v60, %v833_v32  ;;  %v802_v32 = vperm.slane %v5567_v28, %v4142_v21  ;;  %v739_v11 = vsel %vm681_vm3, %v738_v9, %v737_v36  ;;  %v742_v18 = vperm.slane %v5568_v29, %v4166_v30  ;;  %v5569_v60 = vld [vmem:[#allocation45_spill] sm:$0xff] }
 0x383   :  { %v1343_v51 = vpop.permute.xlu0 %1342  ;;  %v1355_v40 = vpop.permute.xlu1 %1354  ;;  %v740_v50 = vperm.slane %v5569_v60, %v4142_v21  ;;  %v1423_v29 = vperm.slane %v4087_v27, %v4139_v35  ;;  %v5576_v60 = vld [vmem:[#allocation47_spill] sm:$0xff] }
 0x384   :  { %5561 = vst [vmem:[#allocation36_spill] sm:$0xff] %v4391_v47  ;;  %v1482_v14 = vperm.slane %v1343_v51, %v4121_v58  ;;  %v803_v49 = vsel %vm685_vm4, %v802_v32, %v801_v52  ;;  %v5570_v51 = vld [vmem:[#allocation72_spill] sm:$0xff]  ;;  %v5573_v52 = vld [vmem:[#allocation70_spill] sm:$0xff]  ;;  %v1422_v32 = vsel %vm677_vm2, %v1421_v12, %v1420_v8 }
 0x385   :  { %1599 = vperm.xlu2 %3039, %v3439_v63   ;;  %v804_v10 = vperm.slane %v5570_v51, %v4166_v30  ;;  %v741_v55 = vsel %vm685_vm4, %v740_v50, %v739_v11  ;;  %v808_v28 = vperm.slane %v5573_v52, %v4178_v61  ;;  %v5574_v11 = vld [vmem:[#allocation87_spill] sm:$0xff]  ;;  %v746_v50 = vperm.slane %v5576_v60, %v4178_v61 }
 0x386   :  { %v1484_v45 = vsel %vm677_vm2, %v1483_v1, %v1482_v14  ;;  %v743_v1 = vsel %vm689_vm5, %v742_v18, %v741_v55  ;;  %v1489_v14 = vperm.slane %v1355_v40, %v4166_v30  ;;  %v1367_v2 = vpop.permute.xlu2 %1366  ;;  %v5575_v18 = vld [vmem:[#allocation17_spill] sm:$0xff]  ;;  %v1427_v55 = vperm.slane %v4065_v16, %v4166_v30 }
 0x387   :  { %v1486_v59 = vsel %vm681_vm3, %v1485_v56, %v1484_v45  ;;  %v805_v46 = vsel %vm689_vm5, %v804_v10, %v803_v49  ;;  %v1491_v56 = vperm.slane %v1358_v57, %v4149_v31  ;;  %v745_v57 = vsel %vm693_vm6, %v744_v6, %v743_v1  ;;  %v5579_v6 = vld [vmem:[#allocation73_spill] sm:$0xff] }
 0x388   :  { %v807_v9 = vsel %vm693_vm6, %v806_v5, %v805_v46  ;;  %v812_v5 = vperm.slane %v3997_v0, %v4225_v38  ;;  %v1424_v10 = vsel %vm681_vm3, %v1423_v29, %v1422_v32  ;;  %v747_v27 = vsel %vm697_vm7, %v746_v50, %v745_v57 }
 0x389   :  { %1611 = vperm.xlu1 %3041, %v3439_v63   ;;  %v809_v49 = vsel %vm697_vm7, %v808_v28, %v807_v9  ;;  %v1497_v53 = vperm.slane %v1367_v2, %v4225_v38  ;;  %v814_v9 = vperm.slane %v5579_v6, %v4213_v34  ;;  %v1429_v57 = vperm.slane %v4099_v4, %v4149_v31 }
 0x38a   :  { %v818_v60 = vperm.slane %v4011_v3, %v4267_v26  ;;  %v1433_v4 = vperm.slane %v4075_v48, %v4163_v39  ;;  %v5585_v48 = vld [vmem:[#allocation99_spill] sm:$0xff] }
 0x38b   :  { %v1352_v19 = vpop.permute.xlu0 %1351  ;;  %v1364_v36 = vpop.permute.xlu1 %1363 }
 0x38c   :  { %v1487_v23 = vperm.slane %v1352_v19, %v4142_v21  ;;  %v5577_v19 = vld [vmem:[#allocation75_spill] sm:$0xff] }
 0x38d   :  { %3042 = vset.pattern.permute.xlu2 %v5571_v13  ;;  %v810_v51 = vperm.slane %v5577_v19, %v4163_v39 }
 0x38e   :  { %v1488_v45 = vsel %vm685_vm4, %v1487_v23, %v1486_v59  ;;  %v748_v59 = vperm.slane %v5574_v11, %v4163_v39  ;;  %v1425_v23 = vperm.slane %v4079_v7, %v4142_v21  ;;  %v1376_v50 = vpop.permute.xlu2 %1375 }
 0x38f   :  { %v1490_v40 = vsel %vm689_vm5, %v1489_v14, %v1488_v45  ;;  %v5578_v14 = vld [vmem:[#allocation44_spill] sm:$0xff]  ;;  %v811_v8 = vsel %vm701_vm8, %v810_v51, %v809_v49  ;;  %v5582_v49 = vld [vmem:[#allocation79_spill] sm:$0xff] }
 0x390   :  { %v1492_v37 = vsel %vm693_vm6, %v1491_v56, %v1490_v40  ;;  %v750_v46 = vperm.slane %v5578_v14, %v4225_v38  ;;  %v749_v0 = vsel %vm701_vm8, %v748_v59, %v747_v27  ;;  %v1495_v56 = vperm.slane %v1364_v36, %v4163_v39  ;;  %v5580_v36 = vld [vmem:[#allocation88_spill] sm:$0xff]  ;;  %v5584_v27 = vld [vmem:[#allocation46_spill] sm:$0xff] }
 0x391   :  { %3043 = vset.pattern.permute.xlu1 %v5575_v18  ;;  %v813_v16 = vsel %vm705_vm9, %v812_v5, %v811_v8  ;;  %v1426_v45 = vsel %vm685_vm4, %v1425_v23, %v1424_v10  ;;  %v754_v32 = vperm.slane %v5580_v36, %v4169_v17  ;;  %v816_v5 = vperm.slane %v5582_v49, %v4169_v17  ;;  %v5583_v10 = vld [vmem:[#allocation96_spill] sm:$0xff]  ;;  %v5589_v36 = vld [vmem:[#allocation89_spill] sm:$0xff] }
 0x392   :  { %v1428_v40 = vsel %vm689_vm5, %v1427_v55, %v1426_v45  ;;  %v751_v28 = vsel %vm705_vm9, %v750_v46, %v749_v0  ;;  %v815_v29 = vsel %vm709_vm10, %v814_v9, %v813_v16  ;;  %v1431_v55 = vperm.slane %v5583_v10, %v4178_v61  ;;  %v5587_v45 = vld [vmem:[#allocation98_spill] sm:$0xff]  ;;  %v5588_v9 = vld [vmem:[#allocation77_spill] sm:$0xff] }
 0x393   :  { %v1361_v12 = vpop.permute.xlu0 %1360  ;;  %v1373_v11 = vpop.permute.xlu1 %1372  ;;  %v1430_v19 = vsel %vm693_vm6, %v1429_v57, %v1428_v40  ;;  %v756_v3 = vperm.slane %v5584_v27, %v4267_v26  ;;  %v1435_v0 = vperm.slane %v5585_v48, %v4225_v38  ;;  %v820_v40 = vperm.slane %v5588_v9, %v4238_v41  ;;  %v5593_v49 = vld [vmem:[#allocation81_spill] sm:$0xff] }
 0x394   :  { %v1493_v1 = vperm.slane %v1361_v12, %v4178_v61  ;;  %v1432_v46 = vsel %vm697_vm7, %v1431_v55, %v1430_v19  ;;  %v1501_v8 = vperm.slane %v1373_v11, %v4169_v17  ;;  %v5590_v11 = vld [vmem:[#allocation51_spill] sm:$0xff] }
 0x395   :  { %1617 = vperm.xlu2 %3042, %v3439_v63   ;;  %v1434_v16 = vsel %vm701_vm8, %v1433_v4, %v1432_v46  ;;  %v5594_v4 = vld [vmem:[#allocation101_spill] sm:$0xff] }
 0x396   :  { %v1494_v7 = vsel %vm697_vm7, %v1493_v1, %v1492_v37  ;;  %v5581_v37 = vld [vmem:[#allocation49_spill] sm:$0xff] }
 0x397   :  { %v1496_v52 = vsel %vm701_vm8, %v1495_v56, %v1494_v7  ;;  %v752_v59 = vperm.slane %v5581_v37, %v4213_v34  ;;  %v5586_v56 = vld [vmem:[#allocation15_spill] sm:$0xff]  ;;  %v1503_v7 = vperm.slane %v1376_v50, %v4267_v26  ;;  %v758_v37 = vperm.slane %v5590_v11, %v4238_v41  ;;  %v5592_v50 = vld [vmem:[#allocation16_spill] sm:$0xff] }
 0x398   :  { %v1498_v2 = vsel %vm705_vm9, %v1497_v53, %v1496_v52  ;;  %v1437_v53 = vperm.slane %v5587_v45, %v4213_v34  ;;  %v5600_v11 = vld [vmem:[#allocation103_spill] sm:$0xff] }
 0x399   :  { %1623 = vperm.xlu1 %3043, %v3439_v63   ;;  %v753_v51 = vsel %vm709_vm10, %v752_v59, %v751_v28  ;;  %v817_v63 = vsel %vm713_vm11, %v816_v5, %v815_v29  ;;  %v5591_v29 = vld [vmem:[#allocation94_spill] sm:$0xff]  ;;  %v822_v5 = vperm.slane %v5593_v49, %v4172_v25  ;;  %v5602_v49 = vld [vmem:[#allocation97_spill] sm:$0xff] }
 0x39a   :  { %v755_v23 = vsel %vm713_vm11, %v754_v32, %v753_v51  ;;  %v819_v14 = vsel %vm717_vm12, %v818_v60, %v817_v63  ;;  %v760_v32 = vperm.slane %v5589_v36, %v4172_v25  ;;  %v1436_v60 = vsel %vm705_vm9, %v1435_v0, %v1434_v16  ;;  %v1385_v63 = vpop.permute.xlu2 %1384  ;;  %v5597_v0 = vld [vmem:[#allocation48_spill] sm:$0xff] }
 0x39b   :  { %v1370_v12 = vpop.permute.xlu0 %1369  ;;  %v757_v28 = vsel %vm717_vm12, %v756_v3, %v755_v23  ;;  %v821_v59 = vsel %vm721_vm13, %v820_v40, %v819_v14  ;;  %v1438_v19 = vsel %vm709_vm10, %v1437_v53, %v1436_v60  ;;  %v1441_v51 = vperm.slane %v5594_v4, %v4267_v26  ;;  %v1382_v10 = vpop.permute.xlu1 %1381  ;;  %v5596_v3 = vld [vmem:[#allocation100_spill] sm:$0xff] }
 0x39c   :  { %v1499_v1 = vperm.slane %v1370_v12, %v4213_v34  ;;  %v759_v55 = vsel %vm721_vm13, %v758_v37, %v757_v28  ;;  %v5595_v12 = vld [vmem:[#allocation95_spill] sm:$0xff]  ;;  %v1443_v23 = vperm.slane %v5596_v3, %v4238_v41  ;;  %v823_v46 = vsel %vm725_vm14, %v822_v5, %v821_v59 }
 0x39d   :  { %3044 = vset.pattern.permute.xlu2 %v5586_v56  ;;  %v1439_v27 = vperm.slane %v5595_v12, %v4169_v17  ;;  %v761_v14 = vsel %vm725_vm14, %v760_v32, %v759_v55  ;;  %v1507_v53 = vperm.slane %v1382_v10, %v4172_v25  ;;  %v1447_v37 = vperm.slane %v5600_v11, %v4317_v20 }
 0x39e   :  { %v1500_v6 = vsel %vm709_vm10, %v1499_v1, %v1498_v2  ;;  %v824_v2 = vperm.slane %v5591_v29, %v4317_v20  ;;  %v5601_v29 = vld [vmem:[#allocation53_spill] sm:$0xff]  ;;  %v1445_v5 = vperm.slane %v5602_v49, %v4172_v25  ;;  %v413_v55 = vperm.slane %v4359_v62, 1 }
 0x39f   :  { %v1502_v52 = vsel %vm713_vm11, %v1501_v8, %v1500_v6  ;;  %v762_v8 = vperm.slane %v5597_v0, %v4317_v20  ;;  %v1440_v45 = vsel %vm713_vm11, %v1439_v27, %v1438_v19  ;;  %v5599_v6 = vld [vmem:[#allocation80_spill] sm:$0xff] }
 0x3a0   :  { %v1504_v57 = vsel %vm717_vm12, %v1503_v7, %v1502_v52  ;;  %v825_v16 = vsel %vm729_vm15, %v824_v2, %v823_v46  ;;  %v5598_v7 = vld [vmem:[#allocation32_spill] sm:$0xff]  ;;  %v826_v9 = vperm.slane %v5599_v6, %v4298_v54  ;;  %v1442_v40 = vsel %vm717_vm12, %v1441_v51, %v1440_v45 }
 0x3a1   :  { %3045 = vset.pattern.permute.xlu1 %v5592_v50  ;;  %v1509_v52 = vperm.slane %v1385_v63, %v4317_v20  ;;  %v763_v36 = vsel %vm729_vm15, %v762_v8, %v761_v14  ;;  %v1444_v32 = vsel %vm721_vm13, %v1443_v23, %v1442_v40  ;;  %v764_v2 = vperm.slane %v5601_v29, %v4298_v54  ;;  %v5604_v63 = vld [vmem:[#allocation102_spill] sm:$0xff]  ;;  %v5608_v6 = vld [vmem:[#allocation20_spill] sm:$0xff] }
 0x3a2   :  { %v827_v60 = vsel %vm733_vm0, %v826_v9, %v825_v16  ;;  %v1446_v10 = vsel %vm725_vm14, %v1445_v5, %v1444_v32  ;;  %v4590_v9 = vpop.permute.xlu2 %1539  ;;  %v5609_v40 = vld [vmem:[#allocation22_spill] sm:$0xff] }
 0x3a3   :  { %v1379_v1 = vpop.permute.xlu0 %1378  ;;  %v765_v51 = vsel %vm733_vm0, %v764_v2, %v763_v36  ;;  %v1448_v27 = vsel %vm729_vm15, %v1447_v37, %v1446_v10 }
 0x3a4   :  { %v1505_v48 = vperm.slane %v1379_v1, %v4238_v41  ;;  %v830_v12 = vsel %vm828_vm1, %v827_v60, %v765_v51  ;;  %v1449_v1 = vperm.slane %v5604_v63, %v4298_v54  ;;  %v5610_v60 = vld [vmem:[#allocation28_spill] sm:$0xff]  ;;  %v5613_v63 = vld [vmem:[#allocation50_spill] sm:$0xff] }
 0x3a5   :  { %1629 = vperm.xlu2 %3044, %v5598_v7   ;;  %v834_v62 = vadd.f32 %v830_v12, %v413_v55  ;;  %v5611_v51 = vld [vmem:[#allocation60_spill] sm:$0xff]  ;;  %v5612_v12 = vmov 0  }
 0x3a6   :  { %v1506_v28 = vsel %vm721_vm13, %v1505_v48, %v1504_v57  ;;  %v5603_v57 = vld [vmem:[#allocation31_spill] sm:$0xff]  ;;  %v1450_v0 = vsel %vm733_vm0, %v1449_v1, %v1448_v27 }
 0x3a7   :  { %v1508_v59 = vsel %vm725_vm14, %v1507_v53, %v1506_v28  ;;  %v4566_v4 = vperm.slane %v5603_v57, 2  ;;  %v5605_v48 = vld [vmem:[#allocation19_spill] sm:$0xff]  ;;  %v5607_v53 = vld [vmem:[#allocation24_spill] sm:$0xff] }
 0x3a8   :  { %v1510_v19 = vsel %vm729_vm15, %v1509_v52, %v1508_v59 }
 0x3a9   :  { %1641 = vperm.xlu1 %3045, %v5598_v7   ;;  %v1770_v10 = vmul.f32 %v5611_v51, %v4566_v4  ;;  %v1754_v55 = vmul.f32 %v4590_v9, %v4566_v4  ;;  %v1755_v1 = vmul.f32 %v5613_v63, %v4566_v4 }
 0x3ab   :  { %v4573_v3 = vpop.permute.xlu1 %1533  ;;  %v1388_v23 = vpop.permute.xlu0 %1387 }
 0x3ac   :  { %v1753_v14 = vmul.f32 %v4573_v3, %v4566_v4  ;;  %v1511_v46 = vperm.slane %v1388_v23, %v4298_v54 }
 0x3ad   :  { %3046 = vset.pattern.permute.xlu2 %v5605_v48 }
 0x3ae   :  { %v1512_v8 = vsel %vm733_vm0, %v1511_v46, %v1510_v19  ;;  %1882 = vperm.xlu0 %3093, %v1753_v14  }
 0x3af   :  { %v1514_v16 = vsel %vm828_vm1, %v1512_v8, %v1450_v0  ;;  %v4596_v28 = vpop.permute.xlu2 %1557  ;;  %v5614_v8 = vld [vmem:[#allocation52_spill] sm:$0xff] }
 0x3b0   :  { %v4584_v45 = vadd.f32 %v1514_v16, %v834_v62  ;;  %v1760_v16 = vmul.f32 %v5614_v8, %v4566_v4 }
 0x3b1   :  { %3047 = vset.pattern.permute.xlu1 %v5607_v53 }
 0x3b2   :  { %5606 = vst [vmem:[#allocation55_spill] sm:$0xff] %v4584_v45  ;;  %v1775_v45 = vmul.f32 %v5616_v22, %v4566_v4 }
 0x3b5   :  { %1647 = vperm.xlu2 %3046, %v5598_v7  }
 0x3b9   :  { %1653 = vperm.xlu1 %3047, %v5598_v7  }
 0x3bb   :  { %v4593_v52 = vpop.permute.xlu1 %1551 }
 0x3bc   :  { %v1756_v27 = vmul.f32 %v4593_v52, %v4566_v4 }
 0x3bd   :  { %3048 = vset.pattern.permute.xlu2 %v5608_v6 }
 0x3bf   :  { %v4604_v11 = vpop.permute.xlu2 %1569 }
 0x3c0   :  { %v1759_v14 = vmul.f32 %v4604_v11, %v4566_v4 }
 0x3c1   :  { %3050 = vset.pattern.permute.xlu1 %v5609_v40 }
 0x3c5   :  { %1659 = vperm.xlu2 %3048, %v5598_v7  }
 0x3c9   :  { %1671 = vperm.xlu1 %3050, %v5598_v7  }
 0x3cb   :  { %v4599_v36 = vpop.permute.xlu1 %1563 }
 0x3cc   :  { %v1758_v32 = vmul.f32 %v4599_v36, %v4566_v4 }
 0x3cd   :  { %3051 = vset.pattern.permute.xlu2 %v3316_v24 }
 0x3ce   :  { %1897 = vperm.xlu0 %3093, %v1758_v32   ;;  %v5615_v32 = vld [vmem:[#allocation54_spill] sm:$0xff] }
 0x3cf   :  { %v4608_v37 = vpop.permute.xlu2 %1587 }
 0x3d0   :  { %v1762_v0 = vmul.f32 %v4608_v37, %v4566_v4 }
 0x3d1   :  { %3052 = vset.pattern.permute.xlu1 %v5546_v42 }
 0x3d5   :  { %1677 = vperm.xlu2 %3051, %v5598_v7  }
 0x3d9   :  { %1683 = vperm.xlu1 %3052, %v5598_v7  }
 0x3db   :  { %v4611_v59 = vpop.permute.xlu1 %1581 }
 0x3dc   :  { %v1761_v29 = vmul.f32 %v4611_v59, %v4566_v4 }
 0x3dd   :  { %3053 = vset.pattern.permute.xlu2 %v5551_v43 }
 0x3de   :  { %1906 = vperm.xlu0 %3093, %v1761_v29   ;;  %v1765_v29 = vmul.f32 %v5615_v32, %v4566_v4 }
 0x3df   :  { %v4616_v2 = vpop.permute.xlu2 %1599 }
 0x3e0   :  { %v1764_v49 = vmul.f32 %v4616_v2, %v4566_v4 }
 0x3e1   :  { %3056 = vset.pattern.permute.xlu1 %v5610_v60 }
 0x3e5   :  { %1689 = vperm.xlu2 %3053, %v5598_v7  }
 0x3e6   :  { %1915 = vperm.xlu0 %3093, %v1764_v49  }
 0x3e9   :  { %1701 = vperm.xlu1 %3056, %v5598_v7  }
 0x3eb   :  { %v4640_v23 = vpop.permute.xlu1 %1593 }
 0x3ed   :  { %3057 = vset.pattern.permute.xlu2 %v5559_v15 }
 0x3ef   :  { %v4624_v5 = vpop.permute.xlu2 %1617 }
 0x3f0   :  { %v1767_v19 = vmul.f32 %v4624_v5, %v4566_v4 }
 0x3f1   :  { %3058 = vset.pattern.permute.xlu1 %v5571_v13 }
 0x3f2   :  { %1924 = vperm.xlu0 %3093, %v1767_v19  }
 0x3f5   :  { %1707 = vperm.xlu2 %3057, %v5598_v7  }
 0x3f9   :  { %1713 = vperm.xlu1 %3058, %v5598_v7  }
 0x3fa   :  { %1933 = vperm.xlu0 %3093, %v1770_v10  }
 0x3fb   :  { %v4647_v46 = vpop.permute.xlu1 %1611 }
 0x3fd   :  { %3059 = vset.pattern.permute.xlu2 %v5575_v18 }
 0x3ff   :  { %v4661_v19 = vpop.permute.xlu2 %1629 }
 0x400   :  { %v1769_v10 = vmul.f32 %v4661_v19, %v4566_v4 }
 0x401   :  { %3060 = vset.pattern.permute.xlu1 %v5612_v12 }
 0x402   :  { %1885 = vperm.xlu1 %3060, %v1754_v55  }
 0x405   :  { %1719 = vperm.xlu2 %3059, %v5598_v7   ;;  %v1757_v7 = vmul.f32 %v4596_v28, %v4566_v4 }
 0x40a   :  { %1891 = vperm.xlu1 %3060, %v1756_v27   ;;  %v1763_v27 = vmul.f32 %v4640_v23, %v4566_v4 }
 0x40b   :  { %v4653_v62 = vpop.permute.xlu1 %1623 }
 0x40d   :  { %3061 = vset.pattern.permute.xlu2 %v5612_v12 }
 0x40e   :  { %1888 = vperm.xlu2 %3061, %v1755_v1   ;;  %v1768_v1 = vmul.f32 %v4653_v62, %v4566_v4 }
 0x412   :  { %1900 = vperm.xlu1 %3060, %v1759_v14   ;;  %v4671_v14 = vpop.permute.xlu2 %1647 }
 0x416   :  { %1894 = vperm.xlu2 %3061, %v1757_v7  }
 0x41a   :  { %1909 = vperm.xlu1 %3060, %v1762_v0   ;;  %v1766_v0 = vmul.f32 %v4647_v46, %v4566_v4 }
 0x41b   :  { %v4665_v55 = vpop.permute.xlu1 %1641 }
 0x41e   :  { %1903 = vperm.xlu2 %3061, %v1760_v16  }
 0x420   :  { %v4659_v49 = vpop.permute.xlu0 %1882 }
 0x422   :  { %1918 = vperm.xlu1 %3060, %v1765_v29   ;;  %v1771_v29 = vmul.f32 %v4665_v55, %v4566_v4 }
 0x426   :  { %1912 = vperm.xlu2 %3061, %v1763_v27   ;;  %v4681_v27 = vpop.permute.xlu2 %1659 }
 0x42a   :  { %1927 = vperm.xlu1 %3060, %v1768_v1   ;;  %v1774_v1 = vmul.f32 %v4681_v27, %v4566_v4 }
 0x42b   :  { %v4673_v7 = vpop.permute.xlu1 %1653 }
 0x42c   :  { %v1773_v16 = vmul.f32 %v4673_v7, %v4566_v4 }
 0x42e   :  { %1921 = vperm.xlu2 %3061, %v1766_v0   ;;  %1942 = vperm.xlu0 %3093, %v1773_v16   ;;  %v1772_v0 = vmul.f32 %v4671_v14, %v4566_v4 }
 0x42f   :  { %v4687_v12 = vpop.permute.xlu2 %1677 }
 0x432   :  { %1936 = vperm.xlu1 %3060, %v1771_v29   ;;  %v1777_v29 = vmul.f32 %v4687_v12, %v4566_v4 }
 0x436   :  { %1930 = vperm.xlu2 %3061, %v1769_v10  }
 0x43a   :  { %1945 = vperm.xlu1 %3060, %v1774_v1  }
 0x43b   :  { %v4689_v44 = vpop.permute.xlu1 %1671 }
 0x43c   :  { %v1776_v16 = vmul.f32 %v4689_v44, %v4566_v4 }
 0x43e   :  { %1939 = vperm.xlu2 %3061, %v1772_v0   ;;  %1951 = vperm.xlu0 %3093, %v1776_v16   ;;  %v5617_v0 = vld [vmem:[#allocation58_spill] sm:$0xff] }
 0x43f   :  { %v4699_v57 = vpop.permute.xlu2 %1689  ;;  %v1780_v16 = vmul.f32 %v5617_v0, %v4566_v4 }
 0x440   :  { %v4697_v10 = vpop.permute.xlu0 %1897  ;;  %v1779_v18 = vmul.f32 %v4699_v57, %v4566_v4 }
 0x442   :  { %1954 = vperm.xlu1 %3060, %v1777_v29  }
 0x446   :  { %1948 = vperm.xlu2 %3061, %v1775_v45   ;;  %1960 = vperm.xlu0 %3093, %v1779_v18   ;;  %v5618_v45 = vld [vmem:[#allocation33_spill] sm:$0xff] }
 0x447   :  { %v4722_v60 = vperm.slane %v5618_v45, 2 }
 0x44a   :  { %1963 = vperm.xlu1 %3060, %v1780_v16   ;;  %v1785_v16 = vmul.f32 %v4573_v3, %v4722_v60 }
 0x44b   :  { %v4709_v13 = vpop.permute.xlu1 %1683 }
 0x44c   :  { %v1778_v47 = vmul.f32 %v4709_v13, %v4566_v4 }
 0x44e   :  { %1957 = vperm.xlu2 %3061, %v1778_v47   ;;  %v1791_v47 = vmul.f32 %v4604_v11, %v4722_v60  ;;  %v1786_v11 = vmul.f32 %v4590_v9, %v4722_v60 }
 0x44f   :  { %v4713_v1 = vpop.permute.xlu2 %1707 }
 0x450   :  { %v1782_v29 = vmul.f32 %v4713_v1, %v4566_v4  ;;  %v4717_v15 = vpop.permute.xlu0 %1906 }
 0x452   :  { %1969 = vperm.xlu0 %3093, %v1782_v29   ;;  %v1788_v29 = vmul.f32 %v4593_v52, %v4722_v60  ;;  %v1787_v52 = vmul.f32 %v5613_v63, %v4722_v60 }
 0x458   :  { %v4726_v43 = vpop.permute.xlu0 %1915 }
 0x45a   :  { %1978 = vperm.xlu0 %3093, %v1785_v16  }
 0x45b   :  { %v4730_v42 = vpop.permute.xlu1 %1701 }
 0x45c   :  { %v1781_v24 = vmul.f32 %v4730_v42, %v4566_v4 }
 0x45e   :  { %1966 = vperm.xlu2 %3061, %v1781_v24  }
 0x45f   :  { %v4734_v18 = vpop.permute.xlu2 %1719 }
 0x460   :  { %v1784_v3 = vmul.f32 %v4734_v18, %v4566_v4 }
 0x462   :  { %1987 = vperm.xlu0 %3093, %v1788_v29  }
 0x464   :  { %v4740_v45 = vpop.permute.xlu0 %1924 }
 0x466   :  { %1975 = vperm.xlu2 %3061, %v1784_v3   ;;  %v1794_v3 = vmul.f32 %v4608_v37, %v4722_v60 }
 0x468   :  { %v1889_v40 = vpop.permute.xlu2 %1888 }
 0x46a   :  { %1996 = vperm.xlu0 %3093, %v1791_v47   ;;  %v1790_v47 = vmul.f32 %v4599_v36, %v4722_v60  ;;  %v1789_v36 = vmul.f32 %v4596_v28, %v4722_v60  ;;  %v5620_v28 = vperm.slane %v4697_v10, %v4149_v31  ;;  %v1803_v10 = vmul.f32 %v4665_v55, %v4722_v60 }
 0x46b   :  { %v4746_v24 = vpop.permute.xlu1 %1713 }
 0x46c   :  { %v1783_v29 = vmul.f32 %v4746_v24, %v4566_v4  ;;  %v1934_v6 = vpop.permute.xlu0 %1933  ;;  %v2076_v4 = vperm.slane %v1889_v40, %v4139_v35  ;;  %v1793_v40 = vmul.f32 %v4611_v59, %v4722_v60 }
 0x46d   :  { %v2105_v53 = vperm.slane %v1934_v6, %v4124_v33  ;;  %v5619_v6 = vperm.slane %v4659_v49, %v4121_v58 }
 0x46e   :  { %1984 = vperm.xlu2 %3061, %v1787_v52   ;;  %1972 = vperm.xlu1 %3060, %v1783_v29   ;;  %v1797_v52 = vmul.f32 %v5615_v32, %v4722_v60  ;;  %v1800_v32 = vmul.f32 %v4653_v62, %v4722_v60 }
 0x470   :  { %v1895_v16 = vpop.permute.xlu2 %1894 }
 0x471   :  { %v2080_v49 = vperm.slane %v1895_v16, %v4166_v30  ;;  %v1796_v16 = vmul.f32 %v4616_v2, %v4722_v60 }
 0x472   :  { %2005 = vperm.xlu0 %3093, %v1794_v3  }
 0x474   :  { %v1886_v63 = vpop.permute.xlu1 %1885 }
 0x475   :  { %v2074_v48 = vperm.slane %v1886_v63, %v4124_v33 }
 0x476   :  { %1993 = vperm.xlu2 %3061, %v1790_v47   ;;  %1981 = vperm.xlu1 %3060, %v1786_v11  }
 0x477   :  { %v2075_v37 = vsel %vm677_vm2, %v2074_v48, %v5619_v6 }
 0x478   :  { %v1904_v29 = vpop.permute.xlu2 %1903  ;;  %v2077_v9 = vsel %vm681_vm3, %v2076_v4, %v2075_v37  ;;  %v1792_v4 = vmul.f32 %v5614_v8, %v4722_v60  ;;  %v5621_v8 = vperm.slane %v4717_v15, %v4225_v38  ;;  %v1806_v15 = vmul.f32 %v4681_v27, %v4722_v60 }
 0x479   :  { %v2086_v62 = vperm.slane %v1904_v29, %v4163_v39  ;;  %v1799_v29 = vmul.f32 %v4624_v5, %v4722_v60  ;;  %v5622_v5 = vperm.slane %v4726_v43, %v4267_v26 }
 0x47a   :  { %2014 = vperm.xlu0 %3093, %v1797_v52  }
 0x47c   :  { %v1892_v3 = vpop.permute.xlu1 %1891 }
 0x47d   :  { %v2078_v11 = vperm.slane %v1892_v3, %v4142_v21 }
 0x47e   :  { %2002 = vperm.xlu2 %3061, %v1793_v40   ;;  %1990 = vperm.xlu1 %3060, %v1789_v36   ;;  %v1795_v40 = vmul.f32 %v4640_v23, %v4722_v60 }
 0x47f   :  { %v2079_v48 = vsel %vm685_vm4, %v2078_v11, %v2077_v9 }
 0x480   :  { %v2081_v47 = vsel %vm689_vm5, %v2080_v49, %v2079_v48  ;;  %v1913_v63 = vpop.permute.xlu2 %1912 }
 0x481   :  { %v2083_v59 = vsel %vm693_vm6, %v5620_v28, %v2081_v47  ;;  %v2092_v55 = vperm.slane %v1913_v63, %v4169_v17  ;;  %v1802_v28 = vmul.f32 %v5611_v51, %v4722_v60  ;;  %v5623_v51 = vperm.slane %v4740_v45, %v4317_v20 }
 0x482   :  { %2023 = vperm.xlu0 %3093, %v1800_v32   ;;  %v1812_v45 = vmul.f32 %v5617_v0, %v4722_v60 }
 0x484   :  { %v1901_v6 = vpop.permute.xlu1 %1900 }
 0x485   :  { %v2084_v37 = vperm.slane %v1901_v6, %v4178_v61  ;;  %v1809_v6 = vmul.f32 %v4687_v12, %v4722_v60 }
 0x486   :  { %2011 = vperm.xlu2 %3061, %v1796_v16   ;;  %1999 = vperm.xlu1 %3060, %v1792_v4  }
 0x487   :  { %v2085_v52 = vsel %vm697_vm7, %v2084_v37, %v2083_v59  ;;  %v1798_v59 = vmul.f32 %v4647_v46, %v4722_v60 }
 0x488   :  { %v2087_v9 = vsel %vm701_vm8, %v2086_v62, %v2085_v52  ;;  %v1922_v36 = vpop.permute.xlu2 %1921  ;;  %v1801_v62 = vmul.f32 %v4661_v19, %v4722_v60  ;;  %v1805_v52 = vmul.f32 %v4673_v7, %v4722_v60  ;;  %v1804_v7 = vmul.f32 %v4671_v14, %v4722_v60 }
 0x489   :  { %v2089_v2 = vsel %vm705_vm9, %v5621_v8, %v2087_v9  ;;  %v2098_v16 = vperm.slane %v1922_v36, %v4172_v25 }
 0x48a   :  { %2032 = vperm.xlu0 %3093, %v1803_v10  }
 0x48c   :  { %v1910_v3 = vpop.permute.xlu1 %1909 }
 0x48d   :  { %v2090_v11 = vperm.slane %v1910_v3, %v4213_v34 }
 0x48e   :  { %2020 = vperm.xlu2 %3061, %v1799_v29   ;;  %2008 = vperm.xlu1 %3060, %v1795_v40   ;;  %v1808_v40 = vmul.f32 %v4689_v44, %v4722_v60  ;;  %v1807_v44 = vmul.f32 %v5616_v22, %v4722_v60  ;;  %v1810_v22 = vmul.f32 %v4709_v13, %v4722_v60 }
 0x48f   :  { %v2091_v49 = vsel %vm709_vm10, %v2090_v11, %v2089_v2 }
 0x490   :  { %v2093_v48 = vsel %vm713_vm11, %v2092_v55, %v2091_v49  ;;  %v1931_v32 = vpop.permute.xlu2 %1930  ;;  %v1815_v55 = vmul.f32 %v4746_v24, %v4722_v60 }
 0x491   :  { %v2104_v23 = vperm.slane %v1931_v32, %v4121_v58  ;;  %v2095_v47 = vsel %vm717_vm12, %v5622_v5, %v2093_v48  ;;  %v1811_v32 = vmul.f32 %v4699_v57, %v4722_v60  ;;  %v1814_v57 = vmul.f32 %v4713_v1, %v4722_v60 }
 0x492   :  { %2041 = vperm.xlu0 %3093, %v1806_v15   ;;  %v1813_v1 = vmul.f32 %v4730_v42, %v4722_v60  ;;  %v5624_v42 = vld [vmem:[#allocation34_spill] sm:$0xff] }
 0x493   :  { %v2106_v63 = vsel %vm677_vm2, %v2105_v53, %v2104_v23 }
 0x494   :  { %v1919_v27 = vpop.permute.xlu1 %1918 }
 0x495   :  { %v2096_v4 = vperm.slane %v1919_v27, %v4238_v41 }
 0x496   :  { %2017 = vperm.xlu1 %3060, %v1798_v59   ;;  %2029 = vperm.xlu2 %3061, %v1802_v28  }
 0x497   :  { %v2097_v43 = vsel %vm721_vm13, %v2096_v4, %v2095_v47 }
 0x498   :  { %v2099_v53 = vsel %vm725_vm14, %v2098_v16, %v2097_v43  ;;  %v1940_v37 = vpop.permute.xlu2 %1939 }
 0x499   :  { %v2101_v46 = vsel %vm729_vm15, %v5623_v51, %v2099_v53  ;;  %v2109_v11 = vperm.slane %v1940_v37, %v4142_v21 }
 0x49a   :  { %2050 = vperm.xlu0 %3093, %v1809_v6  }
 0x49c   :  { %v1928_v10 = vpop.permute.xlu1 %1927 }
 0x49d   :  { %v2102_v9 = vperm.slane %v1928_v10, %v4298_v54 }
 0x49e   :  { %2026 = vperm.xlu1 %3060, %v1801_v62   ;;  %2038 = vperm.xlu2 %3061, %v1805_v52  }
 0x49f   :  { %v4832_v12 = vsel %vm733_vm0, %v2102_v9, %v2101_v46 }
 0x4a0   :  { %v1949_v36 = vpop.permute.xlu2 %1948  ;;  %v1943_v8 = vpop.permute.xlu0 %1942 }
 0x4a1   :  { %v2115_v2 = vperm.slane %v1949_v36, %v4178_v61  ;;  %v2111_v19 = vperm.slane %v1943_v8, %v4166_v30  ;;  %v1816_v36 = vmul.f32 %v4734_v18, %v4722_v60 }
 0x4a2   :  { %2059 = vperm.xlu0 %3093, %v1812_v45  }
 0x4a4   :  { %v1937_v29 = vpop.permute.xlu1 %1936 }
 0x4a5   :  { %v2107_v3 = vperm.slane %v1937_v29, %v4139_v35 }
 0x4a6   :  { %2035 = vperm.xlu1 %3060, %v1804_v7   ;;  %2047 = vperm.xlu2 %3061, %v1808_v40  }
 0x4a7   :  { %v2108_v0 = vsel %vm681_vm3, %v2107_v3, %v2106_v63  ;;  %v5625_v3 = vld [vmem:[#allocation19_spill] sm:$0xff] }
 0x4a8   :  { %v2110_v49 = vsel %vm685_vm4, %v2109_v11, %v2108_v0  ;;  %v1958_v15 = vpop.permute.xlu2 %1957 }
 0x4a9   :  { %v2121_v14 = vperm.slane %v1958_v15, %v4213_v34  ;;  %v2112_v48 = vsel %vm689_vm5, %v2111_v19, %v2110_v49 }
 0x4aa   :  { %2068 = vperm.xlu0 %3093, %v1815_v55  }
 0x4ac   :  { %v1946_v23 = vpop.permute.xlu1 %1945 }
 0x4ad   :  { %v2113_v5 = vperm.slane %v1946_v23, %v4149_v31 }
 0x4ae   :  { %2044 = vperm.xlu1 %3060, %v1807_v44   ;;  %2056 = vperm.xlu2 %3061, %v1811_v32   ;;  %v5627_v44 = vld [vmem:[#allocation20_spill] sm:$0xff] }
 0x4af   :  { %v2114_v24 = vsel %vm693_vm6, %v2113_v5, %v2112_v48  ;;  %v5626_v48 = vld [vmem:[#allocation24_spill] sm:$0xff] }
 0x4b0   :  { %v2116_v47 = vsel %vm697_vm7, %v2115_v2, %v2114_v24  ;;  %v1952_v63 = vpop.permute.xlu0 %1951 }
 0x4b1   :  { %v2117_v28 = vperm.slane %v1952_v63, %v4163_v39 }
 0x4b3   :  { %v2118_v59 = vsel %vm701_vm8, %v2117_v28, %v2116_v47 }
 0x4b4   :  { %v1955_v27 = vpop.permute.xlu1 %1954 }
 0x4b5   :  { %v2119_v4 = vperm.slane %v1955_v27, %v4225_v38 }
 0x4b6   :  { %2053 = vperm.xlu1 %3060, %v1810_v22   ;;  %2065 = vperm.xlu2 %3061, %v1814_v57  }
 0x4b7   :  { %v2120_v16 = vsel %vm705_vm9, %v2119_v4, %v2118_v59 }
 0x4b8   :  { %v1967_v43 = vpop.permute.xlu2 %1966  ;;  %v2122_v6 = vsel %vm709_vm10, %v2121_v14, %v2120_v16  ;;  %v1961_v53 = vpop.permute.xlu0 %1960 }
 0x4b9   :  { %v2127_v37 = vperm.slane %v1967_v43, %v4238_v41  ;;  %v2123_v51 = vperm.slane %v1961_v53, %v4169_v17 }
 0x4bb   :  { %v2124_v13 = vsel %vm713_vm11, %v2123_v51, %v2122_v6  ;;  %v5628_v51 = vld [vmem:[#allocation22_spill] sm:$0xff] }
 0x4bc   :  { %v1964_v46 = vpop.permute.xlu1 %1963 }
 0x4bd   :  { %v2125_v62 = vperm.slane %v1964_v46, %v4267_v26 }
 0x4be   :  { %2062 = vperm.xlu1 %3060, %v1813_v1   ;;  %3062 = vset.pattern.permute.xlu2 %v5586_v56 }
 0x4bf   :  { %v2126_v52 = vsel %vm717_vm12, %v2125_v62, %v2124_v13  ;;  %v5629_v13 = vld [vmem:[#allocation23_spill] sm:$0xff] }
 0x4c0   :  { %v1976_v10 = vpop.permute.xlu2 %1975  ;;  %v2128_v9 = vsel %vm721_vm13, %v2127_v37, %v2126_v52 }
 0x4c1   :  { %v2133_v45 = vperm.slane %v1976_v10, %v4298_v54 }
 0x4c4   :  { %v1970_v8 = vpop.permute.xlu0 %1969 }
 0x4c5   :  { %v2129_v2 = vperm.slane %v1970_v8, %v4172_v25 }
 0x4c6   :  { %2071 = vperm.xlu1 %3060, %v1816_v36   ;;  %2217 = vperm.xlu2 %3062, %v5624_v42  }
 0x4c7   :  { %v2130_v19 = vsel %vm725_vm14, %v2129_v2, %v2128_v9 }
 0x4c8   :  { %v1985_v7 = vpop.permute.xlu2 %1984 }
 0x4c9   :  { %v2138_v56 = vperm.slane %v1985_v7, %v4139_v35 }
 0x4cc   :  { %v1979_v40 = vpop.permute.xlu0 %1978 }
 0x4cd   :  { %v2135_v29 = vperm.slane %v1979_v40, %v4121_v58 }
 0x4ce   :  { %3063 = vset.pattern.permute.xlu1 %v5592_v50  ;;  %3064 = vset.pattern.permute.xlu2 %v5625_v3 }
 0x4d0   :  { %v1994_v11 = vpop.permute.xlu2 %1993 }
 0x4d1   :  { %v2144_v60 = vperm.slane %v1994_v11, %v4149_v31 }
 0x4d4   :  { %v1988_v18 = vpop.permute.xlu0 %1987 }
 0x4d5   :  { %v2140_v0 = vperm.slane %v1988_v18, %v4142_v21 }
 0x4d6   :  { %2229 = vperm.xlu1 %3063, %v5624_v42   ;;  %2235 = vperm.xlu2 %3064, %v5624_v42  }
 0x4d8   :  { %v2003_v55 = vpop.permute.xlu2 %2002 }
 0x4d9   :  { %v2150_v49 = vperm.slane %v2003_v55, %v4225_v38  ;;  %v5631_v55 = vld [vmem:[#allocation26_spill] sm:$0xff] }
 0x4dc   :  { %v1997_v15 = vpop.permute.xlu0 %1996 }
 0x4dd   :  { %v2146_v14 = vperm.slane %v1997_v15, %v4178_v61 }
 0x4de   :  { %3065 = vset.pattern.permute.xlu1 %v5626_v48  ;;  %3066 = vset.pattern.permute.xlu2 %v5627_v44 }
 0x4e0   :  { %v2012_v32 = vpop.permute.xlu2 %2011  ;;  %v1973_v23 = vpop.permute.xlu1 %1972 }
 0x4e1   :  { %v2156_v5 = vperm.slane %v2012_v32, %v4267_v26  ;;  %v2131_v24 = vperm.slane %v1973_v23, %v4317_v20 }
 0x4e3   :  { %v2132_v47 = vsel %vm729_vm15, %v2131_v24, %v2130_v19 }
 0x4e4   :  { %v4897_v63 = vsel %vm733_vm0, %v2133_v45, %v2132_v47  ;;  %v2006_v28 = vpop.permute.xlu0 %2005 }
 0x4e5   :  { %v2152_v59 = vperm.slane %v2006_v28, %v4213_v34 }
 0x4e6   :  { %2241 = vperm.xlu1 %3065, %v5624_v42   ;;  %2247 = vperm.xlu2 %3066, %v5624_v42  }
 0x4e8   :  { %v2021_v22 = vpop.permute.xlu2 %2020  ;;  %v1982_v57 = vpop.permute.xlu1 %1981 }
 0x4e9   :  { %v2162_v27 = vperm.slane %v2021_v22, %v4317_v20  ;;  %v2136_v4 = vperm.slane %v1982_v57, %v4124_v33 }
 0x4eb   :  { %v2137_v16 = vsel %vm677_vm2, %v2136_v4, %v2135_v29 }
 0x4ec   :  { %v2139_v43 = vsel %vm681_vm3, %v2138_v56, %v2137_v16  ;;  %v2015_v6 = vpop.permute.xlu0 %2014 }
 0x4ed   :  { %v2158_v53 = vperm.slane %v2015_v6, %v4238_v41  ;;  %v2141_v37 = vsel %vm685_vm4, %v2140_v0, %v2139_v43  ;;  %v5630_v0 = vld [vmem:[#allocation25_spill] sm:$0xff] }
 0x4ee   :  { %3068 = vset.pattern.permute.xlu1 %v5628_v51  ;;  %3069 = vset.pattern.permute.xlu2 %v5629_v13 }
 0x4f0   :  { %v1991_v1 = vpop.permute.xlu1 %1990  ;;  %v2030_v46 = vpop.permute.xlu2 %2029 }
 0x4f1   :  { %v2142_v62 = vperm.slane %v1991_v1, %v4166_v30  ;;  %v2167_v52 = vperm.slane %v2030_v46, %v4124_v33  ;;  %v5632_v1 = vld [vmem:[#allocation28_spill] sm:$0xff]  ;;  %v5633_v46 = vld [vmem:[#allocation30_spill] sm:$0xff] }
 0x4f3   :  { %v2143_v10 = vsel %vm689_vm5, %v2142_v62, %v2141_v37  ;;  %v5634_v62 = vld [vmem:[#allocation36_spill] sm:$0xff] }
 0x4f4   :  { %v2145_v9 = vsel %vm693_vm6, %v2144_v60, %v2143_v10  ;;  %v2024_v45 = vpop.permute.xlu0 %2023 }
 0x4f5   :  { %v2164_v36 = vperm.slane %v2024_v45, %v4298_v54  ;;  %v2147_v8 = vsel %vm697_vm7, %v2146_v14, %v2145_v9 }
 0x4f6   :  { %2259 = vperm.xlu1 %3068, %v5624_v42   ;;  %2265 = vperm.xlu2 %3069, %v5624_v42  }
 0x4f8   :  { %v2000_v2 = vpop.permute.xlu1 %1999  ;;  %v2039_v19 = vpop.permute.xlu2 %2038 }
 0x4f9   :  { %v2148_v7 = vperm.slane %v2000_v2, %v4163_v39  ;;  %v2173_v56 = vperm.slane %v2039_v19, %v4166_v30 }
 0x4fb   :  { %v2149_v40 = vsel %vm701_vm8, %v2148_v7, %v2147_v8 }
 0x4fc   :  { %v2151_v29 = vsel %vm705_vm9, %v2150_v49, %v2149_v40  ;;  %v2033_v11 = vpop.permute.xlu0 %2032 }
 0x4fd   :  { %v2169_v60 = vperm.slane %v2033_v11, %v4139_v35  ;;  %v2153_v18 = vsel %vm709_vm10, %v2152_v59, %v2151_v29 }
 0x4fe   :  { %3070 = vset.pattern.permute.xlu1 %v5630_v0  ;;  %3071 = vset.pattern.permute.xlu2 %v5631_v55  ;;  %v5635_v55 = vld [vmem:[#allocation29_spill] sm:$0xff] }
 0x500   :  { %v2009_v15 = vpop.permute.xlu1 %2008  ;;  %v2048_v14 = vpop.permute.xlu2 %2047 }
 0x501   :  { %v2154_v44 = vperm.slane %v2009_v15, %v4169_v17  ;;  %v2179_v32 = vperm.slane %v2048_v14, %v4163_v39 }
 0x503   :  { %v2155_v23 = vsel %vm713_vm11, %v2154_v44, %v2153_v18 }
 0x504   :  { %v2157_v24 = vsel %vm717_vm12, %v2156_v5, %v2155_v23  ;;  %v2042_v49 = vpop.permute.xlu0 %2041 }
 0x505   :  { %v2175_v47 = vperm.slane %v2042_v49, %v4149_v31  ;;  %v2159_v28 = vsel %vm721_vm13, %v2158_v53, %v2157_v24 }
 0x506   :  { %2271 = vperm.xlu1 %3070, %v5624_v42   ;;  %2277 = vperm.xlu2 %3071, %v5624_v42  }
 0x508   :  { %v2018_v59 = vpop.permute.xlu1 %2017  ;;  %v2057_v22 = vpop.permute.xlu2 %2056 }
 0x509   :  { %v2160_v57 = vperm.slane %v2018_v59, %v4172_v25  ;;  %v2185_v4 = vperm.slane %v2057_v22, %v4169_v17  ;;  %v5637_v59 = vld [vmem:[#allocation18_spill] sm:$0xff] }
 0x50b   :  { %v2161_v16 = vsel %vm725_vm14, %v2160_v57, %v2159_v28 }
 0x50c   :  { %v2163_v43 = vsel %vm729_vm15, %v2162_v27, %v2161_v16  ;;  %v2051_v5 = vpop.permute.xlu0 %2050 }
 0x50d   :  { %v2165_v6 = vsel %vm733_vm0, %v2164_v36, %v2163_v43  ;;  %v2181_v37 = vperm.slane %v2051_v5, %v4225_v38 }
 0x50e   :  { %v2197_v53 = vsel %vm828_vm1, %v2165_v6, %v4832_v12  ;;  %3073 = vset.pattern.permute.xlu1 %v5632_v1  ;;  %3074 = vset.pattern.permute.xlu2 %v5633_v46  ;;  %v5638_v6 = vld [vmem:[#allocation35_spill] sm:$0xff] }
 0x50f   :  { %v4945_v10 = vadd.f32 %v2197_v53, %v5634_v62  ;;  %v5639_v62 = vld [vmem:[#allocation55_spill] sm:$0xff] }
 0x510   :  { %v2027_v9 = vpop.permute.xlu1 %2026  ;;  %v2066_v45 = vpop.permute.xlu2 %2065 }
 0x511   :  { %v2166_v8 = vperm.slane %v2027_v9, %v4121_v58  ;;  %v2191_v27 = vperm.slane %v2066_v45, %v4172_v25  ;;  %v5640_v45 = vld [vmem:[#allocation21_spill] sm:$0xff] }
 0x513   :  { %v2168_v36 = vsel %vm677_vm2, %v2167_v52, %v2166_v8  ;;  %v5636_v52 = vld [vmem:[#allocation17_spill] sm:$0xff] }
 0x514   :  { %v2060_v2 = vpop.permute.xlu0 %2059  ;;  %v2170_v19 = vsel %vm681_vm3, %v2169_v60, %v2168_v36 }
 0x515   :  { %v2187_v12 = vperm.slane %v2060_v2, %v4267_v26 }
 0x516   :  { %2289 = vperm.xlu1 %3073, %v5624_v42   ;;  %2295 = vperm.xlu2 %3074, %v5624_v42  }
 0x518   :  { %v2036_v7 = vpop.permute.xlu1 %2035 }
 0x519   :  { %v2171_v40 = vperm.slane %v2036_v7, %v4142_v21 }
 0x51b   :  { %v2172_v29 = vsel %vm685_vm4, %v2171_v40, %v2170_v19  ;;  %v5642_v19 = vld [vmem:[#allocation27_spill] sm:$0xff] }
 0x51c   :  { %v2174_v11 = vsel %vm689_vm5, %v2173_v56, %v2172_v29 }
 0x51d   :  { %v2176_v18 = vsel %vm693_vm6, %v2175_v47, %v2174_v11 }
 0x51e   :  { %3075 = vset.pattern.permute.xlu1 %v5635_v55  ;;  %3076 = vset.pattern.permute.xlu2 %v5636_v52 }
 0x520   :  { %v2045_v60 = vpop.permute.xlu1 %2044  ;;  %v5003_v36 = vpop.permute.xlu2 %2217 }
 0x521   :  { %v2177_v15 = vperm.slane %v2045_v60, %v4178_v61 }
 0x523   :  { %v2178_v14 = vsel %vm697_vm7, %v2177_v15, %v2176_v18  ;;  %v5643_v18 = vld [vmem:[#allocation63_spill] sm:$0xff] }
 0x524   :  { %v2180_v44 = vsel %vm701_vm8, %v2179_v32, %v2178_v14  ;;  %v2069_v32 = vpop.permute.xlu0 %2068 }
 0x525   :  { %v2182_v23 = vsel %vm705_vm9, %v2181_v37, %v2180_v44  ;;  %v2193_v16 = vperm.slane %v2069_v32, %v4317_v20 }
 0x526   :  { %2301 = vperm.xlu1 %3075, %v5624_v42   ;;  %2307 = vperm.xlu2 %3076, %v5624_v42  }
 0x528   :  { %v2054_v56 = vpop.permute.xlu1 %2053 }
 0x529   :  { %v2183_v24 = vperm.slane %v2054_v56, %v4213_v34 }
 0x52b   :  { %v2184_v49 = vsel %vm709_vm10, %v2183_v24, %v2182_v23  ;;  %v5645_v24 = vld [vmem:[#allocation65_spill] sm:$0xff] }
 0x52c   :  { %v2186_v47 = vsel %vm713_vm11, %v2185_v4, %v2184_v49 }
 0x52d   :  { %v2188_v28 = vsel %vm717_vm12, %v2187_v12, %v2186_v47 }
 0x52e   :  { %3078 = vset.pattern.permute.xlu1 %v5637_v59  ;;  %3079 = vset.pattern.permute.xlu2 %v5592_v50 }
 0x530   :  { %v2063_v22 = vpop.permute.xlu1 %2062 }
 0x531   :  { %v2189_v57 = vperm.slane %v2063_v22, %v4238_v41 }
 0x533   :  { %v2190_v42 = vsel %vm721_vm13, %v2189_v57, %v2188_v28  ;;  %v5646_v28 = vld [vmem:[#allocation74_spill] sm:$0xff]  ;;  %v5647_v57 = vld [vmem:[#allocation68_spill] sm:$0xff] }
 0x534   :  { %v2192_v43 = vsel %vm725_vm14, %v2191_v27, %v2190_v42 }
 0x535   :  { %v2194_v5 = vsel %vm729_vm15, %v2193_v16, %v2192_v43 }
 0x536   :  { %2319 = vperm.xlu1 %3078, %v5638_v6   ;;  %2325 = vperm.xlu2 %3079, %v5638_v6  }
 0x538   :  { %v2072_v4 = vpop.permute.xlu1 %2071 }
 0x539   :  { %v2195_v37 = vperm.slane %v2072_v4, %v4298_v54 }
 0x53b   :  { %v2196_v50 = vsel %vm733_vm0, %v2195_v37, %v2194_v5  ;;  %v5648_v37 = vld [vmem:[#allocation71_spill] sm:$0xff] }
 0x53c   :  { %v2198_v53 = vsel %vm828_vm1, %v2196_v50, %v4897_v63  ;;  %v5641_v63 = vld [vmem:[#allocation31_spill] sm:$0xff] }
 0x53d   :  { %v4984_v9 = vadd.f32 %v2198_v53, %v5639_v62  ;;  %v4997_v27 = vperm.slane %v5641_v63, 3 }
 0x53e   :  { %3080 = vset.pattern.permute.xlu1 %v5625_v3  ;;  %3081 = vset.pattern.permute.xlu2 %v5626_v48 }
 0x53f   :  { %v2438_v52 = vmul.f32 %v5643_v18, %v4997_v27  ;;  %v2443_v49 = vmul.f32 %v5645_v24, %v4997_v27  ;;  %v2458_v59 = vmul.f32 %v5646_v28, %v4997_v27  ;;  %v2448_v16 = vmul.f32 %v5647_v57, %v4997_v27 }
 0x540   :  { %v2453_v50 = vmul.f32 %v5648_v37, %v4997_v27 }
 0x546   :  { %2331 = vperm.xlu1 %3080, %v5638_v6   ;;  %2337 = vperm.xlu2 %3081, %v5638_v6  }
 0x548   :  { %v4992_v8 = vpop.permute.xlu1 %2229 }
 0x549   :  { %v2439_v44 = vmul.f32 %v4992_v8, %v4997_v27 }
 0x54e   :  { %3083 = vset.pattern.permute.xlu1 %v5640_v45  ;;  %3084 = vset.pattern.permute.xlu2 %v5628_v51  ;;  %v5007_v51 = vpop.permute.xlu2 %2235 }
 0x54f   :  { %v2440_v14 = vmul.f32 %v5007_v51, %v4997_v27 }
 0x556   :  { %2349 = vperm.xlu1 %3083, %v5638_v6   ;;  %2355 = vperm.xlu2 %3084, %v5638_v6   ;;  %v5011_v2 = vpop.permute.xlu2 %2247 }
 0x557   :  { %v2442_v47 = vmul.f32 %v5011_v2, %v4997_v27 }
 0x558   :  { %v4999_v3 = vpop.permute.xlu1 %2241 }
 0x559   :  { %v2441_v48 = vmul.f32 %v4999_v3, %v4997_v27 }
 0x55b   :  { %2578 = vperm.xlu0 %3093, %v2441_v48  }
 0x55e   :  { %3085 = vset.pattern.permute.xlu1 %v5629_v13  ;;  %3086 = vset.pattern.permute.xlu2 %v5630_v0  ;;  %v5017_v7 = vpop.permute.xlu2 %2265 }
 0x55f   :  { %v2445_v32 = vmul.f32 %v5017_v7, %v4997_v27 }
 0x566   :  { %2361 = vperm.xlu1 %3085, %v5638_v6   ;;  %2367 = vperm.xlu2 %3086, %v5638_v6   ;;  %v5025_v40 = vpop.permute.xlu2 %2277 }
 0x567   :  { %v2447_v42 = vmul.f32 %v5025_v40, %v4997_v27 }
 0x568   :  { %v5015_v12 = vpop.permute.xlu1 %2259 }
 0x569   :  { %v2444_v22 = vmul.f32 %v5015_v12, %v4997_v27 }
 0x56e   :  { %3088 = vset.pattern.permute.xlu1 %v5642_v19  ;;  %3089 = vset.pattern.permute.xlu2 %v5632_v1 }
 0x570   :  { %v5029_v1 = vpop.permute.xlu2 %2295 }
 0x571   :  { %v2450_v5 = vmul.f32 %v5029_v1, %v4997_v27 }
 0x576   :  { %2379 = vperm.xlu1 %3088, %v5638_v6   ;;  %2385 = vperm.xlu2 %3089, %v5638_v6  }
 0x578   :  { %v5021_v13 = vpop.permute.xlu1 %2271 }
 0x579   :  { %v2446_v0 = vmul.f32 %v5021_v13, %v4997_v27 }
 0x57b   :  { %2593 = vperm.xlu0 %3093, %v2446_v0  }
 0x57e   :  { %3090 = vset.pattern.permute.xlu1 %v5633_v46  ;;  %3091 = vset.pattern.permute.xlu2 %v5635_v55  ;;  %v2437_v46 = vmul.f32 %v5003_v36, %v4997_v27  ;;  %v5644_v55 = vmov 0  }
 0x580   :  { %v5041_v60 = vpop.permute.xlu2 %2307 }
 0x581   :  { %v2452_v15 = vmul.f32 %v5041_v60, %v4997_v27 }
 0x586   :  { %2391 = vperm.xlu1 %3090, %v5638_v6   ;;  %2397 = vperm.xlu2 %3091, %v5638_v6  }
 0x588   :  { %v5033_v29 = vpop.permute.xlu1 %2289 }
 0x589   :  { %v2449_v11 = vmul.f32 %v5033_v29, %v4997_v27 }
 0x58b   :  { %2602 = vperm.xlu0 %3093, %v2449_v11  }
 0x58e   :  { %3094 = vset.pattern.permute.xlu1 %v5644_v55  ;;  %3095 = vset.pattern.permute.xlu2 %v5644_v55 }
 0x58f   :  { %2566 = vperm.xlu1 %3094, %v2437_v46   ;;  %2569 = vperm.xlu2 %3095, %v2438_v52  }
 0x590   :  { %v5051_v23 = vpop.permute.xlu2 %2325 }
 0x591   :  { %v2455_v56 = vmul.f32 %v5051_v23, %v4997_v27 }
 0x593   :  { %2611 = vperm.xlu0 %3093, %v2452_v15  }
 0x597   :  { %2572 = vperm.xlu1 %3094, %v2439_v44   ;;  %2575 = vperm.xlu2 %3095, %v2440_v14   ;;  %v5649_v44 = vld [vmem:[#allocation76_spill] sm:$0xff] }
 0x598   :  { %v5069_v43 = vpop.permute.xlu1 %2301 }
 0x599   :  { %v2451_v6 = vmul.f32 %v5069_v43, %v4997_v27 }
 0x59b   :  { %2620 = vperm.xlu0 %3093, %v2455_v56   ;;  %v2463_v56 = vmul.f32 %v5649_v44, %v4997_v27 }
 0x59f   :  { %2581 = vperm.xlu1 %3094, %v2442_v47   ;;  %2584 = vperm.xlu2 %3095, %v2443_v49  }
 0x5a0   :  { %v5081_v62 = vpop.permute.xlu2 %2337 }
 0x5a1   :  { %v2457_v63 = vmul.f32 %v5081_v62, %v4997_v27 }
 0x5a3   :  { %2629 = vperm.xlu0 %3093, %v2458_v59  }
 0x5a7   :  { %2587 = vperm.xlu1 %3094, %v2444_v22   ;;  %2590 = vperm.xlu2 %3095, %v2445_v32  }
 0x5a8   :  { %v5075_v4 = vpop.permute.xlu1 %2319 }
 0x5a9   :  { %v2454_v53 = vmul.f32 %v5075_v4, %v4997_v27 }
 0x5af   :  { %2596 = vperm.xlu1 %3094, %v2447_v42   ;;  %2599 = vperm.xlu2 %3095, %v2448_v16   ;;  %v5650_v42 = vld [vmem:[#allocation78_spill] sm:$0xff] }
 0x5b0   :  { %v5089_v19 = vpop.permute.xlu2 %2355 }
 0x5b1   :  { %v2460_v11 = vmul.f32 %v5089_v19, %v4997_v27 }
 0x5b7   :  { %2605 = vperm.xlu1 %3094, %v2450_v5   ;;  %2608 = vperm.xlu2 %3095, %v2451_v6   ;;  %v2468_v5 = vmul.f32 %v5650_v42, %v4997_v27 }
 0x5b8   :  { %v5083_v45 = vpop.permute.xlu1 %2331 }
 0x5b9   :  { %v2456_v48 = vmul.f32 %v5083_v45, %v4997_v27 }
 0x5bf   :  { %2617 = vperm.xlu2 %3095, %v2454_v53   ;;  %2614 = vperm.xlu1 %3094, %v2453_v50  }
 0x5c0   :  { %v5101_v14 = vpop.permute.xlu2 %2367 }
 0x5c1   :  { %v2462_v49 = vmul.f32 %v5101_v14, %v4997_v27 }
 0x5c7   :  { %2626 = vperm.xlu2 %3095, %v2457_v63   ;;  %2623 = vperm.xlu1 %3094, %v2456_v48   ;;  %v5651_v48 = vld [vmem:[#allocation33_spill] sm:$0xff] }
 0x5c8   :  { %v5091_v0 = vpop.permute.xlu1 %2349 }
 0x5c9   :  { %v2459_v52 = vmul.f32 %v5091_v0, %v4997_v27 }
 0x5cd   :  { %v5097_v46 = vpop.permute.xlu0 %2578 }
 0x5cf   :  { %2635 = vperm.xlu2 %3095, %v2460_v11   ;;  %2632 = vperm.xlu1 %3094, %v2459_v52   ;;  %v5125_v11 = vperm.slane %v5651_v48, 3 }
 0x5d0   :  { %v5107_v47 = vpop.permute.xlu2 %2385 }
 0x5d1   :  { %v2465_v22 = vmul.f32 %v5107_v47, %v4997_v27  ;;  %v2471_v52 = vmul.f32 %v4992_v8, %v5125_v11  ;;  %v2470_v8 = vmul.f32 %v5643_v18, %v5125_v11  ;;  %v2469_v18 = vmul.f32 %v5003_v36, %v5125_v11 }
 0x5d7   :  { %2641 = vperm.xlu1 %3094, %v2462_v49   ;;  %2644 = vperm.xlu2 %3095, %v2463_v56  }
 0x5d8   :  { %v5109_v59 = vpop.permute.xlu1 %2361 }
 0x5d9   :  { %v2461_v32 = vmul.f32 %v5109_v59, %v4997_v27 }
 0x5db   :  { %2638 = vperm.xlu0 %3093, %v2461_v32  }
 0x5df   :  { %2650 = vperm.xlu1 %3094, %v2465_v22  }
 0x5e0   :  { %v5115_v16 = vpop.permute.xlu2 %2397 }
 0x5e1   :  { %v2467_v32 = vmul.f32 %v5115_v16, %v4997_v27 }
 0x5e7   :  { %2659 = vperm.xlu1 %3094, %v2468_v5  }
 0x5e8   :  { %v5119_v6 = vpop.permute.xlu1 %2379 }
 0x5e9   :  { %v2464_v50 = vmul.f32 %v5119_v6, %v4997_v27  ;;  %v2570_v53 = vpop.permute.xlu2 %2569 }
 0x5ea   :  { %v2758_v63 = vperm.slane %v2570_v53, %v4124_v33  ;;  %v2474_v53 = vmul.f32 %v5011_v2, %v5125_v11 }
 0x5eb   :  { %2647 = vperm.xlu0 %3093, %v2464_v50  }
 0x5ed   :  { %v5129_v56 = vpop.permute.xlu0 %2593 }
 0x5ef   :  { %2668 = vperm.xlu1 %3094, %v2471_v52  }
 0x5f1   :  { %v2576_v22 = vpop.permute.xlu2 %2575 }
 0x5f2   :  { %v2762_v5 = vperm.slane %v2576_v22, %v4142_v21 }
 0x5f3   :  { %2656 = vperm.xlu0 %3093, %v2467_v32   ;;  %v2477_v32 = vmul.f32 %v5017_v7, %v5125_v11 }
 0x5f7   :  { %2677 = vperm.xlu1 %3094, %v2474_v53  }
 0x5f8   :  { %v5138_v50 = vpop.permute.xlu1 %2391 }
 0x5f9   :  { %v2466_v48 = vmul.f32 %v5138_v50, %v4997_v27  ;;  %v2585_v52 = vpop.permute.xlu2 %2584  ;;  %v2473_v27 = vmul.f32 %v4999_v3, %v5125_v11  ;;  %v2472_v3 = vmul.f32 %v5007_v51, %v5125_v11 }
 0x5fa   :  { %v2768_v49 = vperm.slane %v2585_v52, %v4178_v61  ;;  %v2480_v52 = vmul.f32 %v5647_v57, %v5125_v11 }
 0x5fb   :  { %2653 = vperm.xlu2 %3095, %v2466_v48   ;;  %2665 = vperm.xlu0 %3093, %v2470_v8  }
 0x5fd   :  { %v5147_v22 = vpop.permute.xlu0 %2602 }
 0x5fe   :  { %v2780_v2 = vperm.slane %v5147_v22, %v4238_v41  ;;  %v2495_v22 = vmul.f32 %v5649_v44, %v5125_v11 }
 0x5ff   :  { %2686 = vperm.xlu1 %3094, %v2477_v32  }
 0x601   :  { %v2567_v53 = vpop.permute.xlu1 %2566  ;;  %v2591_v15 = vpop.permute.xlu2 %2590 }
 0x602   :  { %v2757_v48 = vperm.slane %v2567_v53, %v4121_v58  ;;  %v2772_v8 = vperm.slane %v2591_v15, %v4225_v38  ;;  %v2476_v53 = vmul.f32 %v5015_v12, %v5125_v11  ;;  %v5652_v12 = vperm.slane %v5097_v46, %v4166_v30 }
 0x603   :  { %2662 = vperm.xlu2 %3095, %v2469_v18   ;;  %2674 = vperm.xlu0 %3093, %v2473_v27   ;;  %v2486_v46 = vmul.f32 %v5075_v4, %v5125_v11 }
 0x604   :  { %v2759_v7 = vsel %vm677_vm2, %v2758_v63, %v2757_v48  ;;  %v2483_v48 = vmul.f32 %v5069_v43, %v5125_v11 }
 0x605   :  { %v5160_v32 = vpop.permute.xlu0 %2611 }
 0x607   :  { %2695 = vperm.xlu1 %3094, %v2480_v52  }
 0x609   :  { %v2573_v15 = vpop.permute.xlu1 %2572  ;;  %v2600_v18 = vpop.permute.xlu2 %2599 }
 0x60a   :  { %v2760_v27 = vperm.slane %v2573_v15, %v4139_v35  ;;  %v2778_v63 = vperm.slane %v2600_v18, %v4267_v26 }
 0x60b   :  { %2671 = vperm.xlu2 %3095, %v2472_v3   ;;  %2683 = vperm.xlu0 %3093, %v2476_v53   ;;  %v2475_v3 = vmul.f32 %v5645_v24, %v5125_v11 }
 0x60c   :  { %v2761_v57 = vsel %vm681_vm3, %v2760_v27, %v2759_v7  ;;  %v2479_v7 = vmul.f32 %v5025_v40, %v5125_v11 }
 0x60d   :  { %v2763_v52 = vsel %vm685_vm4, %v2762_v5, %v2761_v57  ;;  %v5174_v36 = vpop.permute.xlu0 %2620 }
 0x60e   :  { %v2791_v51 = vperm.slane %v5174_v36, %v4139_v35  ;;  %v2765_v15 = vsel %vm689_vm5, %v5652_v12, %v2763_v52  ;;  %v2478_v52 = vmul.f32 %v5021_v13, %v5125_v11 }
 0x60f   :  { %2704 = vperm.xlu1 %3094, %v2483_v48   ;;  %v2482_v48 = vmul.f32 %v5029_v1, %v5125_v11  ;;  %v5653_v1 = vperm.slane %v5129_v56, %v4213_v34  ;;  %v2492_v56 = vmul.f32 %v5089_v19, %v5125_v11 }
 0x611   :  { %v2582_v43 = vpop.permute.xlu1 %2581  ;;  %v2609_v53 = vpop.permute.xlu2 %2608 }
 0x612   :  { %v2766_v5 = vperm.slane %v2582_v43, %v4149_v31  ;;  %v2784_v18 = vperm.slane %v2609_v53, %v4317_v20  ;;  %v2485_v53 = vmul.f32 %v5648_v37, %v5125_v11  ;;  %v2484_v37 = vmul.f32 %v5041_v60, %v5125_v11 }
 0x613   :  { %2680 = vperm.xlu2 %3095, %v2475_v3   ;;  %2692 = vperm.xlu0 %3093, %v2479_v7   ;;  %v2489_v7 = vmul.f32 %v5081_v62, %v5125_v11  ;;  %v5654_v60 = vperm.slane %v5160_v32, %v4298_v54 }
 0x614   :  { %v2767_v27 = vsel %vm693_vm6, %v2766_v5, %v2765_v15  ;;  %v2481_v5 = vmul.f32 %v5033_v29, %v5125_v11 }
 0x615   :  { %v5191_v57 = vpop.permute.xlu0 %2629  ;;  %v2769_v24 = vsel %vm697_vm7, %v2768_v49, %v2767_v27 }
 0x616   :  { %v2797_v40 = vperm.slane %v5191_v57, %v4149_v31 }
 0x617   :  { %2713 = vperm.xlu1 %3094, %v2486_v46  }
 0x619   :  { %v2588_v12 = vpop.permute.xlu1 %2587  ;;  %v2618_v3 = vpop.permute.xlu2 %2617 }
 0x61a   :  { %v2770_v15 = vperm.slane %v2588_v12, %v4163_v39  ;;  %v2789_v4 = vperm.slane %v2618_v3, %v4124_v33 }
 0x61b   :  { %2689 = vperm.xlu2 %3095, %v2478_v52   ;;  %2701 = vperm.xlu0 %3093, %v2482_v48   ;;  %v2488_v48 = vmul.f32 %v5083_v45, %v5125_v11 }
 0x61c   :  { %v2771_v49 = vsel %vm701_vm8, %v2770_v15, %v2769_v24  ;;  %v2487_v15 = vmul.f32 %v5051_v23, %v5125_v11 }
 0x61d   :  { %v2773_v43 = vsel %vm705_vm9, %v2772_v8, %v2771_v49  ;;  %v2491_v49 = vmul.f32 %v5091_v0, %v5125_v11  ;;  %v2490_v0 = vmul.f32 %v5646_v28, %v5125_v11  ;;  %v2493_v28 = vmul.f32 %v5109_v59, %v5125_v11 }
 0x61e   :  { %v2775_v13 = vsel %vm709_vm10, %v5653_v1, %v2773_v43 }
 0x61f   :  { %2722 = vperm.xlu1 %3094, %v2489_v7  }
 0x621   :  { %v2597_v27 = vpop.permute.xlu1 %2596  ;;  %v2627_v46 = vpop.permute.xlu2 %2626 }
 0x622   :  { %v2776_v57 = vperm.slane %v2597_v27, %v4169_v17  ;;  %v2795_v62 = vperm.slane %v2627_v46, %v4166_v30 }
 0x623   :  { %2698 = vperm.xlu2 %3095, %v2481_v5   ;;  %2710 = vperm.xlu0 %3093, %v2485_v53  }
 0x624   :  { %v2777_v8 = vsel %vm713_vm11, %v2776_v57, %v2775_v13  ;;  %v2494_v13 = vmul.f32 %v5101_v14, %v5125_v11 }
 0x625   :  { %v2779_v24 = vsel %vm717_vm12, %v2778_v63, %v2777_v8 }
 0x626   :  { %v2781_v29 = vsel %vm721_vm13, %v2780_v2, %v2779_v24 }
 0x627   :  { %2731 = vperm.xlu1 %3094, %v2492_v56  }
 0x629   :  { %v2606_v52 = vpop.permute.xlu1 %2605  ;;  %v2636_v12 = vpop.permute.xlu2 %2635 }
 0x62a   :  { %v2782_v3 = vperm.slane %v2606_v52, %v4172_v25  ;;  %v2801_v19 = vperm.slane %v2636_v12, %v4163_v39 }
 0x62b   :  { %2707 = vperm.xlu2 %3095, %v2484_v37   ;;  %2719 = vperm.xlu0 %3093, %v2488_v48  }
 0x62c   :  { %v2783_v63 = vsel %vm725_vm14, %v2782_v3, %v2781_v29  ;;  %v2499_v29 = vmul.f32 %v5115_v16, %v5125_v11 }
 0x62d   :  { %v2785_v2 = vsel %vm729_vm15, %v2784_v18, %v2783_v63  ;;  %v2498_v18 = vmul.f32 %v5138_v50, %v5125_v11 }
 0x62e   :  { %v5238_v45 = vsel %vm733_vm0, %v5654_v60, %v2785_v2 }
 0x62f   :  { %2740 = vperm.xlu1 %3094, %v2495_v22  }
 0x631   :  { %v2615_v7 = vpop.permute.xlu1 %2614  ;;  %v2645_v43 = vpop.permute.xlu2 %2644 }
 0x632   :  { %v2788_v1 = vperm.slane %v2615_v7, %v4121_v58  ;;  %v2807_v44 = vperm.slane %v2645_v43, %v4169_v17 }
 0x633   :  { %2716 = vperm.xlu2 %3095, %v2487_v15   ;;  %2728 = vperm.xlu0 %3093, %v2491_v49  }
 0x634   :  { %v2790_v32 = vsel %vm677_vm2, %v2789_v4, %v2788_v1 }
 0x635   :  { %v2792_v23 = vsel %vm681_vm3, %v2791_v51, %v2790_v32  ;;  %v2497_v51 = vmul.f32 %v5107_v47, %v5125_v11 }
 0x637   :  { %2749 = vperm.xlu1 %3094, %v2498_v18  }
 0x639   :  { %v2624_v53 = vpop.permute.xlu1 %2623 }
 0x63a   :  { %v2793_v5 = vperm.slane %v2624_v53, %v4142_v21 }
 0x63b   :  { %2725 = vperm.xlu2 %3095, %v2490_v0   ;;  %2737 = vperm.xlu0 %3093, %v2494_v13  }
 0x63c   :  { %v2794_v4 = vsel %vm685_vm4, %v2793_v5, %v2792_v23 }
 0x63d   :  { %v2796_v50 = vsel %vm689_vm5, %v2795_v62, %v2794_v4  ;;  %v2500_v62 = vmul.f32 %v5650_v42, %v5125_v11 }
 0x63e   :  { %v2798_v36 = vsel %vm693_vm6, %v2797_v40, %v2796_v50  ;;  %v2496_v40 = vmul.f32 %v5119_v6, %v5125_v11 }
 0x641   :  { %v2633_v27 = vpop.permute.xlu1 %2632 }
 0x642   :  { %v2799_v14 = vperm.slane %v2633_v27, %v4178_v61 }
 0x643   :  { %2734 = vperm.xlu2 %3095, %v2493_v28   ;;  %2746 = vperm.xlu0 %3093, %v2497_v51  }
 0x644   :  { %v2800_v46 = vsel %vm697_vm7, %v2799_v14, %v2798_v36 }
 0x645   :  { %v2802_v57 = vsel %vm701_vm8, %v2801_v19, %v2800_v46 }
 0x649   :  { %v2642_v8 = vpop.permute.xlu1 %2641 }
 0x64a   :  { %v2805_v47 = vperm.slane %v2642_v8, %v4213_v34 }
 0x64b   :  { %2743 = vperm.xlu2 %3095, %v2496_v40   ;;  %2755 = vperm.xlu0 %3093, %v2500_v62  }
 0x64d   :  { %v2639_v59 = vpop.permute.xlu0 %2638 }
 0x64e   :  { %v2803_v56 = vperm.slane %v2639_v59, %v4225_v38 }
 0x650   :  { %v2804_v24 = vsel %vm705_vm9, %v2803_v56, %v2802_v57 }
 0x651   :  { %v2806_v37 = vsel %vm709_vm10, %v2805_v47, %v2804_v24  ;;  %v2651_v48 = vpop.permute.xlu1 %2650 }
 0x652   :  { %v2811_v42 = vperm.slane %v2651_v48, %v4238_v41  ;;  %v2808_v6 = vsel %vm713_vm11, %v2807_v44, %v2806_v37 }
 0x653   :  { %2752 = vperm.xlu2 %3095, %v2499_v29  }
 0x655   :  { %v2654_v52 = vpop.permute.xlu2 %2653 }
 0x656   :  { %v2813_v12 = vperm.slane %v2654_v52, %v4172_v25 }
 0x659   :  { %v2660_v3 = vpop.permute.xlu1 %2659 }
 0x65a   :  { %v2817_v19 = vperm.slane %v2660_v3, %v4298_v54 }
 0x65d   :  { %v2663_v63 = vpop.permute.xlu2 %2662  ;;  %v2648_v22 = vpop.permute.xlu0 %2647 }
 0x65e   :  { %v2809_v2 = vperm.slane %v2648_v22, %v4267_v26  ;;  %v2819_v53 = vperm.slane %v2663_v63, %v4121_v58 }
 0x660   :  { %v2810_v16 = vsel %vm717_vm12, %v2809_v2, %v2808_v6 }
 0x661   :  { %v2812_v11 = vsel %vm721_vm13, %v2811_v42, %v2810_v16  ;;  %v2669_v60 = vpop.permute.xlu1 %2668 }
 0x662   :  { %v2814_v15 = vsel %vm725_vm14, %v2813_v12, %v2812_v11  ;;  %v2822_v4 = vperm.slane %v2669_v60, %v4139_v35 }
 0x665   :  { %v2672_v49 = vpop.permute.xlu2 %2671  ;;  %v2657_v7 = vpop.permute.xlu0 %2656 }
 0x666   :  { %v2815_v43 = vperm.slane %v2657_v7, %v4317_v20  ;;  %v2824_v27 = vperm.slane %v2672_v49, %v4142_v21 }
 0x668   :  { %v2816_v1 = vsel %vm729_vm15, %v2815_v43, %v2814_v15 }
 0x669   :  { %v5289_v44 = vsel %vm733_vm0, %v2817_v19, %v2816_v1  ;;  %v2678_v32 = vpop.permute.xlu1 %2677 }
 0x66a   :  { %v2828_v62 = vperm.slane %v2678_v32, %v4149_v31 }
 0x66d   :  { %v2681_v18 = vpop.permute.xlu2 %2680  ;;  %v2666_v23 = vpop.permute.xlu0 %2665 }
 0x66e   :  { %v2820_v0 = vperm.slane %v2666_v23, %v4124_v33  ;;  %v2830_v56 = vperm.slane %v2681_v18, %v4178_v61 }
 0x670   :  { %v2821_v5 = vsel %vm677_vm2, %v2820_v0, %v2819_v53 }
 0x671   :  { %v2687_v13 = vpop.permute.xlu1 %2686  ;;  %v2823_v51 = vsel %vm681_vm3, %v2822_v4, %v2821_v5 }
 0x672   :  { %v2825_v14 = vsel %vm685_vm4, %v2824_v27, %v2823_v51  ;;  %v2834_v37 = vperm.slane %v2687_v13, %v4225_v38 }
 0x675   :  { %v2690_v50 = vpop.permute.xlu2 %2689  ;;  %v2675_v36 = vpop.permute.xlu0 %2674 }
 0x676   :  { %v2826_v28 = vperm.slane %v2675_v36, %v4166_v30  ;;  %v2836_v52 = vperm.slane %v2690_v50, %v4213_v34 }
 0x678   :  { %v2827_v46 = vsel %vm689_vm5, %v2826_v28, %v2825_v14 }
 0x679   :  { %v2696_v57 = vpop.permute.xlu1 %2695  ;;  %v2829_v8 = vsel %vm693_vm6, %v2828_v62, %v2827_v46 }
 0x67a   :  { %v2831_v24 = vsel %vm697_vm7, %v2830_v56, %v2829_v8  ;;  %v2840_v22 = vperm.slane %v2696_v57, %v4267_v26 }
 0x67d   :  { %v2684_v40 = vpop.permute.xlu0 %2683  ;;  %v2699_v47 = vpop.permute.xlu2 %2698 }
 0x67e   :  { %v2832_v59 = vperm.slane %v2684_v40, %v4163_v39  ;;  %v2842_v16 = vperm.slane %v2699_v47, %v4238_v41 }
 0x680   :  { %v2833_v29 = vsel %vm701_vm8, %v2832_v59, %v2831_v24 }
 0x681   :  { %v2835_v48 = vsel %vm705_vm9, %v2834_v37, %v2833_v29  ;;  %v2705_v42 = vpop.permute.xlu1 %2704 }
 0x682   :  { %v2837_v19 = vsel %vm709_vm10, %v2836_v52, %v2835_v48  ;;  %v2846_v15 = vperm.slane %v2705_v42, %v4317_v20 }
 0x685   :  { %v2693_v6 = vpop.permute.xlu0 %2692  ;;  %v2708_v3 = vpop.permute.xlu2 %2707 }
 0x686   :  { %v2838_v12 = vperm.slane %v2693_v6, %v4169_v17  ;;  %v2848_v43 = vperm.slane %v2708_v3, %v4298_v54 }
 0x688   :  { %v2839_v63 = vsel %vm713_vm11, %v2838_v12, %v2837_v19  ;;  %v2891_v12 = vld [vmem:[#allocation8 + $0x4] sm:$0x1] }
 0x689   :  { %v2841_v2 = vsel %vm717_vm12, %v2840_v22, %v2839_v63  ;;  %v2714_v49 = vpop.permute.xlu1 %2713 }
 0x68a   :  { %v2843_v7 = vsel %vm721_vm13, %v2842_v16, %v2841_v2  ;;  %v2851_v51 = vperm.slane %v2714_v49, %v4124_v33 }
 0x68d   :  { %v2702_v11 = vpop.permute.xlu0 %2701  ;;  %v2717_v18 = vpop.permute.xlu2 %2716 }
 0x68e   :  { %v2844_v60 = vperm.slane %v2702_v11, %v4172_v25  ;;  %v2853_v14 = vperm.slane %v2717_v18, %v4139_v35  ;;  %v2890_v18 = vld [vmem:[#allocation8 + $0x3] sm:$0x1] }
 0x690   :  { %v2845_v1 = vsel %vm725_vm14, %v2844_v60, %v2843_v7 }
 0x691   :  { %v2847_v32 = vsel %vm729_vm15, %v2846_v15, %v2845_v1  ;;  %v2723_v5 = vpop.permute.xlu1 %2722 }
 0x692   :  { %v2849_v23 = vsel %vm733_vm0, %v2848_v43, %v2847_v32  ;;  %v2857_v62 = vperm.slane %v2723_v5, %v4166_v30  ;;  %v3096_v5 = vld [vmem:[#allocation8] ss:$0 sm:$0xff] }
 0x693   :  { %v2881_v0 = vsel %vm828_vm1, %v2849_v23, %v5238_v45 }
 0x694   :  { %v5325_v13 = vadd.f32 %v2881_v0, %v4945_v10 }
 0x695   :  { %v2711_v53 = vpop.permute.xlu0 %2710  ;;  %v2726_v4 = vpop.permute.xlu2 %2725 }
 0x696   :  { %v2850_v50 = vperm.slane %v2711_v53, %v4121_v58  ;;  %v2951_v46 = vmul.f32 -1.442695, %v5325_v13 }
 0x698   :  { %v2852_v28 = vsel %vm677_vm2, %v2851_v51, %v2850_v50  ;;  %3101 = vpow2.f32 %v2951_v46  ;;  %vm2892_vm2 = vcmp.gt.f32.partialorder %v2891_v12, 0.0  ;;  %v2898_v51 = vmul.f32 %v3096_v5, %v5325_v13 }
 0x699   :  { %v2732_v45 = vpop.permute.xlu1 %2731  ;;  %v2854_v10 = vsel %vm681_vm3, %v2853_v14, %v2852_v28  ;;  %v3097_v28 = vld [vmem:[#allocation8 + $0x1] ss:$0 sm:$0xff] }
 0x69a   :  { %v2863_v56 = vperm.slane %v2732_v45, %v4163_v39 }
 0x69d   :  { %v2720_v36 = vpop.permute.xlu0 %2719  ;;  %v2735_v58 = vpop.permute.xlu2 %2734 }
 0x69e   :  { %v2855_v27 = vperm.slane %v2720_v36, %v4142_v21  ;;  %v2859_v21 = vperm.slane %v2726_v4, %v4149_v31  ;;  %v3102_v47 = vpop.eup %3101  ;;  %v2865_v42 = vperm.slane %v2735_v58, %v4225_v38 }
 0x69f   :  { %v2910_v48 = vadd.f32 1.0, %v3102_v47 }
 0x6a0   :  { %v2856_v57 = vsel %vm685_vm4, %v2855_v27, %v2854_v10  ;;  %vm2906_vm4 = vcmp.gt.f32.partialorder %v2890_v18, 0.0  ;;  %v3098_v27 = vld [vmem:[#allocation8 + $0x2] ss:$0 sm:$0xff]  ;;  %v2900_v10 = vadd.f32 %v3097_v28, %v2898_v51 }
 0x6a1   :  { %v2858_v33 = vsel %vm689_vm5, %v2857_v62, %v2856_v57  ;;  %v2741_v24 = vpop.permute.xlu1 %2740  ;;  %3103 = vrcp.f32 %v2910_v48  ;;  %v2926_v50 = vsel %vm2906_vm4, 1, %v5644_v55  ;;  %v2920_v36 = vand.u32 2147483647, %v2910_v48 }
 0x6a2   :  { %v2860_v35 = vsel %vm693_vm6, %v2859_v21, %v2858_v33  ;;  %v2869_v52 = vperm.slane %v2741_v24, %v4169_v17  ;;  %v2893_v17 = vsel %vm2892_vm2, 1, %v5644_v55  ;;  %vm2916_vm6 = vweird.f32 %v2910_v48 }
 0x6a3   :  { %v2894_v7 = vperm.slane %v2893_v17, 0 }
 0x6a5   :  { %v2729_v40 = vpop.permute.xlu0 %2728  ;;  %v2744_v6 = vpop.permute.xlu2 %2743  ;;  %vm5362_vm3 = vcmp.eq.s32.totalorder %v2894_v7, 1 }
 0x6a6   :  { %v2861_v8 = vperm.slane %v2729_v40, %v4178_v61  ;;  %v2871_v19 = vperm.slane %v2744_v6, %v4267_v26 }
 0x6a7   :  { %v3104_v22 = vpop.eup %3103 }
 0x6a8   :  { %v2862_v59 = vsel %vm697_vm7, %v2861_v8, %v2860_v35  ;;  %v2912_v60 = vmul.f32 %v3104_v22, %v2910_v48  ;;  %vm2917_vm5 = vweird.f32 %v3104_v22 }
 0x6a9   :  { %v2864_v30 = vsel %vm701_vm8, %v2863_v56, %v2862_v59  ;;  %vm2918_vm7 = vmor %vm2916_vm6, %vm2917_vm5  ;;  %vm2921_vm8 = vcmp.eq.f32.partialorder %v2920_v36, 8.507059e+37 }
 0x6aa   :  { %v2866_v61 = vsel %vm705_vm9, %v2865_v42, %v2864_v30  ;;  %v2913_v1 = vsub.f32 1.0, %v2912_v60 }
 0x6ad   :  { %v2738_v29 = vpop.permute.xlu0 %2737  ;;  %v2753_v11 = vpop.permute.xlu2 %2752 }
 0x6ae   :  { %v2867_v37 = vperm.slane %v2738_v29, %v4213_v34  ;;  %v2750_v34 = vpop.permute.xlu1 %2749  ;;  %v2877_v49 = vperm.slane %v2753_v11, %v4317_v20  ;;  %v2914_v20 = vmul.f32 %v3104_v22, %v2913_v1 }
 0x6af   :  { %v2875_v16 = vperm.slane %v2750_v34, %v4172_v25 }
 0x6b0   :  { %v2868_v31 = vsel %vm709_vm10, %v2867_v37, %v2866_v61  ;;  %v2915_v4 = vadd.f32 %v3104_v22, %v2914_v20 }
 0x6b1   :  { %v2870_v39 = vsel %vm713_vm11, %v2869_v52, %v2868_v31 }
 0x6b2   :  { %v2872_v38 = vsel %vm717_vm12, %v2871_v19, %v2870_v39  ;;  %v2919_v14 = vsel %vm2918_vm7, %v3104_v22, %v2915_v4 }
 0x6b5   :  { %v2747_v3 = vpop.permute.xlu0 %2746 }
 0x6b6   :  { %v2873_v63 = vperm.slane %v2747_v3, %v4238_v41 }
 0x6b8   :  { %v2874_v2 = vsel %vm721_vm13, %v2873_v63, %v2872_v38 }
 0x6b9   :  { %v2876_v15 = vsel %vm725_vm14, %v2875_v16, %v2874_v2 }
 0x6ba   :  { %v2878_v43 = vsel %vm729_vm15, %v2877_v49, %v2876_v15 }
 0x6bd   :  { %v2756_v26 = vpop.permute.xlu0 %2755 }
 0x6be   :  { %v2879_v41 = vperm.slane %v2756_v26, %v4298_v54 }
 0x6c0   :  { %v2880_v32 = vsel %vm733_vm0, %v2879_v41, %v2878_v43 }
 0x6c1   :  { %v2882_v25 = vsel %vm828_vm1, %v2880_v32, %v5289_v44  ;;  %v2922_v44 = vand.u32 2147483648, %v2910_v48 }
 0x6c2   :  { %v2886_v0 = vadd.f32 %v2882_v25, %v4984_v9  ;;  %v2927_v9 = vperm.slane %v2926_v50, 0 }
 0x6c3   :  { %v2923_v46 = vor.u32 1.1754944e-38, %v2922_v44 }
 0x6c4   :  { %v2896_v53 = vsel %vm5362_vm3, %v2886_v0, 0.0  ;;  %vm2928_vm9 = vcmp.eq.s32.totalorder %v2927_v9, 1 }
 0x6c5   :  { %v2901_v54 = vmul.f32 1.442695, %v2896_v53  ;;  %v2924_v62 = vsel %vm2921_vm8, %v2923_v46, %v2919_v14 }
 0x6c6   :  { %v2929_v40 = vsel %vm2928_vm9, %v2924_v62, %v5325_v13 }
 0x6c7   :  { %3105 = vpow2.f32 %v2901_v54 }
 0x6cd   :  { %v3106_v45 = vpop.eup %3105 }
 0x6ce   :  { %v2904_v57 = vmul.f32 %v3106_v45, %v3098_v27 }
 0x6d0   :  { %v2905_v55 = vadd.f32 %v2904_v57, %v2900_v10 }
 0x6d2   :  { %v2930_v58 = vsel %vm5362_vm3, %v2905_v55, %v2929_v40 }
 0x6d3   :  { %2931 = vst [vmem:[#allocation10] sm:$0x3] %v2930_v58 }
 0x6d4   :  { %2942 = dma.vmem_to_hbm [thread:$0]  %s2938_s3, 32, %s2940_s11, [#allocation4]  }
 0x6d5   :  { %3233 = dma.done.wait [#allocation4], 32  }
 0x6d6   :  { %3234 = vsyncadd [#allocation4], 4294967264 }
 0x6d7   :  { %2947 = vsyncpa [#allocation3], 1 }
 0x6d8   :  { %2948 = vsyncpa [#allocation6], 1 }
 0x6d9   :  { %2949 = vsyncpa [#allocation9], 1 }
 0x6da   :  { %2950 = vsyncpa [#allocation4], 1 }

</bundles_post_ra>
